<compile_context>
chip_gen: v5e
topology: v5e:2x2
jax: 0.10.0
libtpu: 0.0.40
codegen_flags: <defaults>
</compile_context>

<pallas_src>
import math

import numpy as np

import jax
import jax.numpy as jnp
from jax.experimental import pallas as pl
from jax.experimental.pallas import tpu as pltpu


_PARALLEL = pltpu.CompilerParams(dimension_semantics=("parallel",))


# ----------------------------------------------------------------------------
# in-kernel helpers
# ----------------------------------------------------------------------------
def _act(x, act):
    if act == "none":
        return x
    if act == "relu":
        return jnp.maximum(x, 0.0)
    if act == "lrelu":                       # nn.LeakyReLU(negative_slope=0.2)
        return jnp.where(x >= 0, x, 0.2 * x)
    if act == "sigmoid":
        return jax.nn.sigmoid(x)
    raise ValueError(act)


def _taps_3x3(x_ref, S, w_sp):
    """The 9 spatially-shifted taps (each (C, S)) of a stride-1 / pad-1 3x3
    conv, built in-kernel from ONE zero-padded, spatially-flattened image
    block of shape (1, C, S + 2*(w_sp+1)).  Flat tap offsets are the constant
    (kh-1)*w_sp + (kw-1); left/right edge wrap-around is masked back to 0."""
    pad = w_sp + 1
    col = jax.lax.broadcasted_iota(jnp.int32, (1, S), 1) % w_sp   # pixel column
    not_left = col != 0
    not_right = col != (w_sp - 1)
    taps = []
    for kh in range(3):
        for kw in range(3):
            off = pad + (kh - 1) * w_sp + (kw - 1)
            t = x_ref[0, :, off:off + S]
            if kw == 0:                       # tap is the left neighbour
                t = jnp.where(not_left, t, 0.0)
            elif kw == 2:                     # tap is the right neighbour
                t = jnp.where(not_right, t, 0.0)
            taps.append(t)
    return taps


def _pad_flat(x, w_sp):
    """Zero-pad the flattened spatial axis by (w_sp + 1) per side: covers the
    +-1 row / +-1 column reach of a 3x3 kernel (only ~2 rows of extra bytes,
    vs. the previous 9x im2col duplication)."""
    p = w_sp + 1
    return jnp.pad(x, ((0, 0), (0, 0), (p, p)))


# ----------------------------------------------------------------------------
# Pallas kernels
# ----------------------------------------------------------------------------
def dense_conv(x, w, b, *, ksize, H, W, act, residual=None, concat_out=False):
    """Dense conv (ksize in {1, 3}, stride 1, pad (ksize-1)//2), flattened NCHW.

    x         : (N, Cin, H*W) f32
    w         : (Cout, ksize*ksize*Cin) bf16 (taps folded into the contraction)
    b         : (Cout, 1) f32 or None
    residual  : (N, Cout, H*W) f32 or None; added AFTER the activation.
    concat_out: emit (N, 2*Cout, H*W) = [residual, conv + residual]
                (fuses TFB_Residual's channel concat into the store).
    """
    N, Cin, S = x.shape
    assert S == H * W
    Cout = w.shape[0]
    has_b = b is not None
    has_r = residual is not None
    assert (not concat_out) or has_r
    out_c = 2 * Cout if concat_out else Cout

    x_in = _pad_flat(x, W) if ksize == 3 else x
    Sin = x_in.shape[-1]

    def kernel(*refs):
        refs = list(refs)
        x_ref = refs.pop(0)
        w_ref = refs.pop(0)
        b_ref = refs.pop(0) if has_b else None
        r_ref = refs.pop(0) if has_r else None
        o_ref = refs.pop(0)

        if ksize == 1:
            xcat = x_ref[0].astype(jnp.bfloat16)                          # (Cin, S)
        else:
            taps = _taps_3x3(x_ref, S, W)
            xcat = jnp.concatenate(taps, axis=0).astype(jnp.bfloat16)     # (9Cin, S)

        # single MXU matmul: bf16 in, f32 accumulate (no zero-init accumulator)
        acc = jnp.dot(w_ref[...], xcat, preferred_element_type=jnp.float32)
        if has_b:
            acc = acc + b_ref[...]
        acc = _act(acc, act)                                              # f32 epilogue
        if has_r:
            acc = acc + r_ref[0]
        if concat_out:
            acc = jnp.concatenate([r_ref[0], acc], axis=0)                # [x, out+x]
        o_ref[0] = acc.astype(o_ref.dtype)

    in_specs = [
        pl.BlockSpec((1, Cin, Sin), lambda n: (n, 0, 0)),
        pl.BlockSpec(w.shape, lambda n: (0, 0)),
    ]
    args = [x_in, w]
    if has_b:
        in_specs.append(pl.BlockSpec(b.shape, lambda n: (0, 0)))
        args.append(b)
    if has_r:
        in_specs.append(pl.BlockSpec((1, Cout, S), lambda n: (n, 0, 0)))
        args.append(residual)

    return pl.pallas_call(
        kernel,
        out_shape=jax.ShapeDtypeStruct((N, out_c, S), jnp.float32),
        grid=(N,),
        in_specs=in_specs,
        out_specs=pl.BlockSpec((1, out_c, S), lambda n: (n, 0, 0)),
        compiler_params=_PARALLEL,
    )(*args)


def dsconv_relu(x, w_dw, b_dw, w_pw, *, h, w_sp):
    """DSConv (3x3 depthwise w/ bias -> 1x1 pointwise, no bias) + ReLU, fused.

    x: (N, C, h*w) f32;  w_dw: (C, 9) f32;  b_dw: (C, 1) f32;  w_pw: (Cout, C) bf16
    """
    N, C, s = x.shape
    assert s == h * w_sp
    Cout = w_pw.shape[0]
    x_in = _pad_flat(x, w_sp)
    Sin = x_in.shape[-1]

    def kernel(x_ref, wd_ref, bd_ref, wp_ref, o_ref):
        wd = wd_ref[...]                                        # (C, 9)
        taps = _taps_3x3(x_ref, s, w_sp)
        acc = taps[0] * wd[:, 0:1]                              # f32 VPU (v5e-safe)
        for k in range(1, 9):
            acc = acc + taps[k] * wd[:, k:k + 1]
        acc = acc + bd_ref[...]                                 # (C, s) depthwise out
        out = jnp.dot(wp_ref[...], acc.astype(jnp.bfloat16),
                      preferred_element_type=jnp.float32)       # (Cout, s) pointwise
        o_ref[0] = jnp.maximum(out, 0.0).astype(o_ref.dtype)

    return pl.pallas_call(
        kernel,
        out_shape=jax.ShapeDtypeStruct((N, Cout, s), jnp.float32),
        grid=(N,),
        in_specs=[
            pl.BlockSpec((1, C, Sin), lambda n: (n, 0, 0)),
            pl.BlockSpec(w_dw.shape, lambda n: (0, 0)),
            pl.BlockSpec(b_dw.shape, lambda n: (0, 0)),
            pl.BlockSpec(w_pw.shape, lambda n: (0, 0)),
        ],
        out_specs=pl.BlockSpec((1, Cout, s), lambda n: (n, 0, 0)),
        compiler_params=_PARALLEL,
    )(x_in, w_dw, b_dw, w_pw)


def mcsa_tail(y4, w_fin, up_t, x_llf, x_in):
    """Fused tail of MCSALayer + the TFB residual:
         att = sigmoid(1x1 conv(y4))                          # (F, h*w)
         up  = bilinear_x2(att) = att @ kron(R, C)^T          # (F, H*W), interleaved
         out = x_llf * up + x_in
    """
    N, C4, s = y4.shape
    F = w_fin.shape[0]
    S = up_t.shape[1]

    def kernel(y_ref, wf_ref, k_ref, xl_ref, xi_ref, o_ref):
        att = jnp.dot(wf_ref[...], y_ref[0].astype(jnp.bfloat16),
                      preferred_element_type=jnp.float32)                  # (F, s)
        att = jax.nn.sigmoid(att)
        up = jnp.dot(att, k_ref[...], preferred_element_type=jnp.float32)  # (F, S)
        o_ref[0] = (xl_ref[0] * up + xi_ref[0]).astype(o_ref.dtype)

    return pl.pallas_call(
        kernel,
        out_shape=jax.ShapeDtypeStruct((N, F, S), jnp.float32),
        grid=(N,),
        in_specs=[
            pl.BlockSpec((1, C4, s), lambda n: (n, 0, 0)),
            pl.BlockSpec(w_fin.shape, lambda n: (0, 0)),
            pl.BlockSpec(up_t.shape, lambda n: (0, 0)),
            pl.BlockSpec((1, F, S), lambda n: (n, 0, 0)),
            pl.BlockSpec((1, F, S), lambda n: (n, 0, 0)),
        ],
        out_specs=pl.BlockSpec((1, F, S), lambda n: (n, 0, 0)),
        compiler_params=_PARALLEL,
    )(y4, w_fin, up_t, x_llf, x_in)


# ----------------------------------------------------------------------------
# weights (PyTorch layouts -> kernel layouts), deterministic init
# ----------------------------------------------------------------------------
def conv_w_flat(w):
    """(Cout, Cin, kh, kw) -> (Cout, kh*kw*Cin) bf16, matching in-kernel tap order."""
    co, ci, kh, kw = w.shape
    return jnp.transpose(w, (0, 2, 3, 1)).reshape(co, kh * kw * ci).astype(jnp.bfloat16)


def dw_w_flat(w):
    """(C, 1, 3, 3) -> (C, 9) f32 (kh major, kw minor: matches tap order)."""
    return w.reshape(w.shape[0], 9)


def _bilinear_up2_1d(n):
    """(2n, n) 1-D x2 bilinear upsample matrix, align_corners=False
    (matches torch F.interpolate / nn.Upsample, incl. edge clamping)."""
    m = np.zeros((2 * n, n), np.float32)
    for o in range(2 * n):
        src = max((o + 0.5) / 2.0 - 0.5, 0.0)
        i0 = min(int(math.floor(src)), n - 1)
        frac = src - i0
        i1 = min(i0 + 1, n - 1)
        m[o, i0] += 1.0 - frac
        m[o, i1] += frac
    return m


def _conv_w(key, cout, cin, k):
    return jax.random.normal(key, (cout, cin, k, k), jnp.float32) / math.sqrt(cin * k * k)


def _dw_w(key, c, k):
    return jax.random.normal(key, (c, 1, k, k), jnp.float32) / math.sqrt(k * k)


def _bias(key, c):
    return (jax.random.normal(key, (c,), jnp.float32) * 0.05).reshape(c, 1)


def init_params(key, num_feat, n_res, H, W):
    keys = iter(jax.random.split(key, 4 * n_res + 12))
    p = {"res": []}
    for i in range(n_res):
        c = num_feat * (2 ** i)
        w1 = _conv_w(next(keys), c, c, 3)
        b1 = _bias(next(keys), c)
        w2 = _conv_w(next(keys), c, c, 3)
        b2 = _bias(next(keys), c)
        p["res"].append((conv_w_flat(w1), b1, conv_w_flat(w2), b2))
    c_in = num_feat * (2 ** n_res)
    c4 = num_feat * 4
    p["llf_w"] = conv_w_flat(_conv_w(next(keys), num_feat, c_in, 1))     # (F, c_in)
    p["dw1_w"] = dw_w_flat(_dw_w(next(keys), c4, 3))
    p["dw1_b"] = _bias(next(keys), c4)
    p["pw1_w"] = conv_w_flat(_conv_w(next(keys), c4, c4, 1))             # (c4, c4)
    p["dw2_w"] = dw_w_flat(_dw_w(next(keys), c4, 3))
    p["dw2_b"] = _bias(next(keys), c4)
    p["pw2_w"] = conv_w_flat(_conv_w(next(keys), c4, c4, 1))
    p["fin_w"] = conv_w_flat(_conv_w(next(keys), num_feat, c4, 1))       # (F, c4)
    # x2 bilinear upsample as ONE matmul: up_flat = att_flat @ kron(R, C)^T
    up_k = np.kron(_bilinear_up2_1d(H // 2), _bilinear_up2_1d(W // 2))   # (H*W, h*w)
    p["up_t"] = jnp.asarray(up_k.T)                                      # (h*w, H*W)
    return p


# ----------------------------------------------------------------------------
# TFB forward (flattened-spatial NCHW: (N, C, H*W))
# ----------------------------------------------------------------------------
def tfb_forward(x_nchw, params, *, num_feat, H, W):
    N = x_nchw.shape[0]
    F = num_feat
    S = H * W
    h, w = H // 2, W // 2
    s = h * w

    x = x_nchw.reshape(N, F, S)

    # --- body: TFB_Residual blocks:  f -> cat([f, conv(lrelu(conv(f))) + f]) ---
    feat = x
    for (w1, b1, w2, b2) in params["res"]:
        t = dense_conv(feat, w1, b1, ksize=3, H=H, W=W, act="lrelu")
        feat = dense_conv(t, w2, b2, ksize=3, H=H, W=W, act="none",
                          residual=feat, concat_out=True)   # fused "+x" and concat

    # --- llf: 1x1 conv, no bias ---
    x_llf = dense_conv(feat, params["llf_w"], None, ksize=1, H=H, W=W, act="none")

    # --- MCSA: space-to-channel (same order as the torch.cat), 2x DSConv+ReLU ---
    xl4 = x_llf.reshape(N, F, H, W)
    y = jnp.concatenate(
        [xl4[:, :, 0::2, 0::2], xl4[:, :, 1::2, 0::2],
         xl4[:, :, 0::2, 1::2], xl4[:, :, 1::2, 1::2]], axis=1,
    ).reshape(N, 4 * F, s)

    y = dsconv_relu(y, params["dw1_w"], params["dw1_b"], params["pw1_w"], h=h, w_sp=w)
    y = dsconv_relu(y, params["dw2_w"], params["dw2_b"], params["pw2_w"], h=h, w_sp=w)

    # --- fused: 1x1 conv + sigmoid + bilinear x2 upsample + (* x_llf) + (+ x) ---
    out = mcsa_tail(y, params["fin_w"], params["up_t"], x_llf, x)
    return out.reshape(N, F, H, W)


# ----------------------------------------------------------------------------
# main
# ----------------------------------------------------------------------------
if __name__ == "__main__":
    num_feat, n_res = 4, 2
    N, H, W = 2, 16, 16

    key = jax.random.PRNGKey(0)
    k_x, k_p = jax.random.split(key)

    x = jax.random.normal(k_x, (N, num_feat, H, W), jnp.float32)   # NCHW (PyTorch layout)
    params = init_params(k_p, num_feat, n_res, H, W)

    fwd = jax.jit(lambda xx: tfb_forward(xx, params, num_feat=num_feat, H=H, W=W))
    out = jax.block_until_ready(fwd(x))

    assert out.shape == (N, num_feat, H, W), out.shape
    assert bool(jnp.all(jnp.isfinite(out)))
    print("KERNEL_OK")
</pallas_src>

<mosaic_0001>
module attributes {stable_mosaic.version = 11 : i64} {
  func.func @kernel(%arg0: i32, %arg1: memref<1x4x290xf32, #tpu.memory_space<vmem>>, %arg2: memref<4x36xbf16, #tpu.memory_space<vmem>>, %arg3: memref<4x1xf32, #tpu.memory_space<vmem>>, %arg4: memref<1x4x256xf32, #tpu.memory_space<vmem>>) attributes {dimension_semantics = [#tpu.dimension_semantics<parallel>], iteration_bounds = array<i64: 2>, scalar_prefetch = 0 : i64, scratch_operands = 0 : i64, tpu.core_type = #tpu.core_type<tc>, window_params = [{transform_indices = @transform_0, window_bounds = array<i64: 1, 4, 290>}, {pipeline_mode = #tpu.pipeline_mode<synchronous>, transform_indices = @transform_1, window_bounds = array<i64: 4, 36>}, {pipeline_mode = #tpu.pipeline_mode<synchronous>, transform_indices = @transform_2, window_bounds = array<i64: 4, 1>}, {transform_indices = @transform_3, window_bounds = array<i64: 1, 4, 256>}]} {
    %0 = tpu.iota {dimensions = array<i32: 1>} : vector<1x256xi32>
    %c16_i32 = arith.constant 16 : i32
    %c0_i32 = arith.constant 0 : i32
    %1 = arith.cmpi eq, %c16_i32, %c0_i32 : i32
    %c1_i32 = arith.constant 1 : i32
    %2 = arith.select %1, %c1_i32, %c16_i32 : i32
    %3 = vector.broadcast %2 : i32 to vector<1x256xi32>
    %4 = arith.remsi %0, %3 : vector<1x256xi32>
    %c0_i32_0 = arith.constant 0 : i32
    %5 = vector.broadcast %c0_i32_0 : i32 to vector<1x256xi32>
    %6 = arith.cmpi ne, %4, %5 : vector<1x256xi32>
    %c0_i32_1 = arith.constant 0 : i32
    %7 = vector.broadcast %c0_i32_1 : i32 to vector<1x256xi32>
    %8 = arith.cmpi slt, %4, %7 : vector<1x256xi32>
    %c0_i32_2 = arith.constant 0 : i32
    %9 = arith.cmpi slt, %2, %c0_i32_2 : i32
    %10 = vector.broadcast %9 : i1 to vector<1x256xi1>
    %11 = vector.broadcast %10 : vector<1x256xi1> to vector<1x256xi1>
    %12 = arith.xori %8, %11 : vector<1x256xi1>
    %13 = arith.andi %12, %6 : vector<1x256xi1>
    %14 = vector.broadcast %2 : i32 to vector<1x256xi32>
    %15 = arith.addi %4, %14 : vector<1x256xi32>
    %16 = arith.select %13, %15, %4 : vector<1x256xi1>, vector<1x256xi32>
    %c0_i32_3 = arith.constant 0 : i32
    %17 = vector.broadcast %c0_i32_3 : i32 to vector<1x256xi32>
    %18 = arith.cmpi ne, %16, %17 : vector<1x256xi32>
    %c15_i32 = arith.constant 15 : i32
    %19 = vector.broadcast %c15_i32 : i32 to vector<1x256xi32>
    %20 = arith.cmpi ne, %16, %19 : vector<1x256xi32>
    %c0 = arith.constant 0 : index
    %c0_4 = arith.constant 0 : index
    %c0_5 = arith.constant 0 : index
    %21 = vector.load %arg1[%c0, %c0_4, %c0_5] : memref<1x4x290xf32, #tpu.memory_space<vmem>>, vector<1x4x256xf32>
    %22 = vector.shape_cast %21 : vector<1x4x256xf32> to vector<4x256xf32>
    %cst = arith.constant 0.000000e+00 : f32
    %23 = vector.shape_cast %18 : vector<1x256xi1> to vector<1x256xi1>
    %24 = vector.broadcast %23 : vector<1x256xi1> to vector<4x256xi1>
    %25 = vector.broadcast %cst : f32 to vector<4x256xf32>
    %26 = arith.select %24, %22, %25 : vector<4x256xi1>, vector<4x256xf32>
    %c0_6 = arith.constant 0 : index
    %c0_7 = arith.constant 0 : index
    %c1 = arith.constant 1 : index
    %27 = vector.load %arg1[%c0_6, %c0_7, %c1] : memref<1x4x290xf32, #tpu.memory_space<vmem>>, vector<1x4x256xf32>
    %28 = vector.shape_cast %27 : vector<1x4x256xf32> to vector<4x256xf32>
    %c0_8 = arith.constant 0 : index
    %c0_9 = arith.constant 0 : index
    %c2 = arith.constant 2 : index
    %29 = vector.load %arg1[%c0_8, %c0_9, %c2] : memref<1x4x290xf32, #tpu.memory_space<vmem>>, vector<1x4x256xf32>
    %30 = vector.shape_cast %29 : vector<1x4x256xf32> to vector<4x256xf32>
    %cst_10 = arith.constant 0.000000e+00 : f32
    %31 = vector.shape_cast %20 : vector<1x256xi1> to vector<1x256xi1>
    %32 = vector.broadcast %31 : vector<1x256xi1> to vector<4x256xi1>
    %33 = vector.broadcast %cst_10 : f32 to vector<4x256xf32>
    %34 = arith.select %32, %30, %33 : vector<4x256xi1>, vector<4x256xf32>
    %c0_11 = arith.constant 0 : index
    %c0_12 = arith.constant 0 : index
    %c16 = arith.constant 16 : index
    %35 = vector.load %arg1[%c0_11, %c0_12, %c16] : memref<1x4x290xf32, #tpu.memory_space<vmem>>, vector<1x4x256xf32>
    %36 = vector.shape_cast %35 : vector<1x4x256xf32> to vector<4x256xf32>
    %cst_13 = arith.constant 0.000000e+00 : f32
    %37 = vector.shape_cast %18 : vector<1x256xi1> to vector<1x256xi1>
    %38 = vector.broadcast %37 : vector<1x256xi1> to vector<4x256xi1>
    %39 = vector.broadcast %cst_13 : f32 to vector<4x256xf32>
    %40 = arith.select %38, %36, %39 : vector<4x256xi1>, vector<4x256xf32>
    %c0_14 = arith.constant 0 : index
    %c0_15 = arith.constant 0 : index
    %c17 = arith.constant 17 : index
    %41 = vector.load %arg1[%c0_14, %c0_15, %c17] : memref<1x4x290xf32, #tpu.memory_space<vmem>>, vector<1x4x256xf32>
    %42 = vector.shape_cast %41 : vector<1x4x256xf32> to vector<4x256xf32>
    %c0_16 = arith.constant 0 : index
    %c0_17 = arith.constant 0 : index
    %c18 = arith.constant 18 : index
    %43 = vector.load %arg1[%c0_16, %c0_17, %c18] : memref<1x4x290xf32, #tpu.memory_space<vmem>>, vector<1x4x256xf32>
    %44 = vector.shape_cast %43 : vector<1x4x256xf32> to vector<4x256xf32>
    %cst_18 = arith.constant 0.000000e+00 : f32
    %45 = vector.shape_cast %20 : vector<1x256xi1> to vector<1x256xi1>
    %46 = vector.broadcast %45 : vector<1x256xi1> to vector<4x256xi1>
    %47 = vector.broadcast %cst_18 : f32 to vector<4x256xf32>
    %48 = arith.select %46, %44, %47 : vector<4x256xi1>, vector<4x256xf32>
    %c0_19 = arith.constant 0 : index
    %c0_20 = arith.constant 0 : index
    %c32 = arith.constant 32 : index
    %49 = vector.load %arg1[%c0_19, %c0_20, %c32] : memref<1x4x290xf32, #tpu.memory_space<vmem>>, vector<1x4x256xf32>
    %50 = vector.shape_cast %49 : vector<1x4x256xf32> to vector<4x256xf32>
    %cst_21 = arith.constant 0.000000e+00 : f32
    %51 = vector.shape_cast %18 : vector<1x256xi1> to vector<1x256xi1>
    %52 = vector.broadcast %51 : vector<1x256xi1> to vector<4x256xi1>
    %53 = vector.broadcast %cst_21 : f32 to vector<4x256xf32>
    %54 = arith.select %52, %50, %53 : vector<4x256xi1>, vector<4x256xf32>
    %c0_22 = arith.constant 0 : index
    %c0_23 = arith.constant 0 : index
    %c33 = arith.constant 33 : index
    %55 = vector.load %arg1[%c0_22, %c0_23, %c33] : memref<1x4x290xf32, #tpu.memory_space<vmem>>, vector<1x4x256xf32>
    %56 = vector.shape_cast %55 : vector<1x4x256xf32> to vector<4x256xf32>
    %c0_24 = arith.constant 0 : index
    %c0_25 = arith.constant 0 : index
    %c34 = arith.constant 34 : index
    %57 = vector.load %arg1[%c0_24, %c0_25, %c34] : memref<1x4x290xf32, #tpu.memory_space<vmem>>, vector<1x4x256xf32>
    %58 = vector.shape_cast %57 : vector<1x4x256xf32> to vector<4x256xf32>
    %cst_26 = arith.constant 0.000000e+00 : f32
    %59 = vector.shape_cast %20 : vector<1x256xi1> to vector<1x256xi1>
    %60 = vector.broadcast %59 : vector<1x256xi1> to vector<4x256xi1>
    %61 = vector.broadcast %cst_26 : f32 to vector<4x256xf32>
    %62 = arith.select %60, %58, %61 : vector<4x256xi1>, vector<4x256xf32>
    %63 = tpu.concatenate %26, %28, %34, %40, %42, %48, %54, %56, %62 in 0 : vector<4x256xf32>, vector<4x256xf32>, vector<4x256xf32>, vector<4x256xf32>, vector<4x256xf32>, vector<4x256xf32>, vector<4x256xf32>, vector<4x256xf32>, vector<4x256xf32> -> vector<36x256xf32>
    %64 = arith.truncf %63 : vector<36x256xf32> to vector<36x256xbf16>
    %c0_27 = arith.constant 0 : index
    %c0_28 = arith.constant 0 : index
    %65 = vector.load %arg2[%c0_27, %c0_28] : memref<4x36xbf16, #tpu.memory_space<vmem>>, vector<4x36xbf16>
    %cst_29 = arith.constant dense<0.000000e+00> : vector<4x256xf32>
    %66 = tpu.matmul %65, %64, %cst_29 {dimension_numbers = #tpu.dot_dimension_numbers<[1], [0], [0], [1], [0, 0, 1, 1], [], []>} : vector<4x36xbf16>, vector<36x256xbf16>, vector<4x256xf32> -> vector<4x256xf32>
    %c0_30 = arith.constant 0 : index
    %c0_31 = arith.constant 0 : index
    %67 = vector.load %arg3[%c0_30, %c0_31] : memref<4x1xf32, #tpu.memory_space<vmem>>, vector<4x1xf32>
    %68 = vector.broadcast %67 : vector<4x1xf32> to vector<4x256xf32>
    %69 = arith.addf %66, %68 : vector<4x256xf32>
    %cst_32 = arith.constant 0.000000e+00 : f32
    %70 = vector.broadcast %cst_32 : f32 to vector<4x256xf32>
    %71 = arith.cmpf oge, %69, %70 : vector<4x256xf32>
    %cst_33 = arith.constant 2.000000e-01 : f32
    %72 = vector.broadcast %cst_33 : f32 to vector<4x256xf32>
    %73 = arith.mulf %72, %69 : vector<4x256xf32>
    %74 = arith.select %71, %69, %73 : vector<4x256xi1>, vector<4x256xf32>
    %c0_34 = arith.constant 0 : index
    %c0_35 = arith.constant 0 : index
    %c0_36 = arith.constant 0 : index
    %75 = vector.load %arg4[%c0_34, %c0_35, %c0_36] : memref<1x4x256xf32, #tpu.memory_space<vmem>>, vector<1x4x256xf32>
    %76 = vector.shape_cast %75 : vector<1x4x256xf32> to vector<4x256xf32>
    %77 = vector.shape_cast %74 : vector<4x256xf32> to vector<1x4x256xf32>
    tpu.vector_store %arg4[%c0_34, %c0_35, %c0_36], %77 {strides = array<i32>} : memref<1x4x256xf32, #tpu.memory_space<vmem>>, vector<1x4x256xf32>,
    return
  }
  func.func @transform_0(%arg0: i32) -> (i32, i32, i32) {
    %c0_i32 = arith.constant 0 : i32
    %c0_i32_0 = arith.constant 0 : i32
    %c0_i32_1 = arith.constant 0 : i32
    return %arg0, %c0_i32, %c0_i32_0 : i32, i32, i32
  }
  func.func @transform_1(%arg0: i32) -> (i32, i32) {
    %c0_i32 = arith.constant 0 : i32
    %c0_i32_0 = arith.constant 0 : i32
    %c0_i32_1 = arith.constant 0 : i32
    return %c0_i32, %c0_i32_0 : i32, i32
  }
  func.func @transform_2(%arg0: i32) -> (i32, i32) {
    %c0_i32 = arith.constant 0 : i32
    %c0_i32_0 = arith.constant 0 : i32
    %c0_i32_1 = arith.constant 0 : i32
    return %c0_i32, %c0_i32_0 : i32, i32
  }
  func.func @transform_3(%arg0: i32) -> (i32, i32, i32) {
    %c0_i32 = arith.constant 0 : i32
    %c0_i32_0 = arith.constant 0 : i32
    %c0_i32_1 = arith.constant 0 : i32
    return %arg0, %c0_i32, %c0_i32_0 : i32, i32, i32
  }
}

module attributes {stable_mosaic.version = 11 : i64} {
  func.func @kernel(%arg0: i32, %arg1: memref<1x4x290xf32, #tpu.memory_space<vmem>>, %arg2: memref<4x36xbf16, #tpu.memory_space<vmem>>, %arg3: memref<4x1xf32, #tpu.memory_space<vmem>>, %arg4: memref<1x4x256xf32, #tpu.memory_space<vmem>>, %arg5: memref<1x8x256xf32, #tpu.memory_space<vmem>>) attributes {dimension_semantics = [#tpu.dimension_semantics<parallel>], iteration_bounds = array<i64: 2>, scalar_prefetch = 0 : i64, scratch_operands = 0 : i64, tpu.core_type = #tpu.core_type<tc>, window_params = [{transform_indices = @transform_0, window_bounds = array<i64: 1, 4, 290>}, {pipeline_mode = #tpu.pipeline_mode<synchronous>, transform_indices = @transform_1, window_bounds = array<i64: 4, 36>}, {pipeline_mode = #tpu.pipeline_mode<synchronous>, transform_indices = @transform_2, window_bounds = array<i64: 4, 1>}, {transform_indices = @transform_3, window_bounds = array<i64: 1, 4, 256>}, {transform_indices = @transform_4, window_bounds = array<i64: 1, 8, 256>}]} {
    %0 = tpu.iota {dimensions = array<i32: 1>} : vector<1x256xi32>
    %c16_i32 = arith.constant 16 : i32
    %c0_i32 = arith.constant 0 : i32
    %1 = arith.cmpi eq, %c16_i32, %c0_i32 : i32
    %c1_i32 = arith.constant 1 : i32
    %2 = arith.select %1, %c1_i32, %c16_i32 : i32
    %3 = vector.broadcast %2 : i32 to vector<1x256xi32>
    %4 = arith.remsi %0, %3 : vector<1x256xi32>
    %c0_i32_0 = arith.constant 0 : i32
    %5 = vector.broadcast %c0_i32_0 : i32 to vector<1x256xi32>
    %6 = arith.cmpi ne, %4, %5 : vector<1x256xi32>
    %c0_i32_1 = arith.constant 0 : i32
    %7 = vector.broadcast %c0_i32_1 : i32 to vector<1x256xi32>
    %8 = arith.cmpi slt, %4, %7 : vector<1x256xi32>
    %c0_i32_2 = arith.constant 0 : i32
    %9 = arith.cmpi slt, %2, %c0_i32_2 : i32
    %10 = vector.broadcast %9 : i1 to vector<1x256xi1>
    %11 = vector.broadcast %10 : vector<1x256xi1> to vector<1x256xi1>
    %12 = arith.xori %8, %11 : vector<1x256xi1>
    %13 = arith.andi %12, %6 : vector<1x256xi1>
    %14 = vector.broadcast %2 : i32 to vector<1x256xi32>
    %15 = arith.addi %4, %14 : vector<1x256xi32>
    %16 = arith.select %13, %15, %4 : vector<1x256xi1>, vector<1x256xi32>
    %c0_i32_3 = arith.constant 0 : i32
    %17 = vector.broadcast %c0_i32_3 : i32 to vector<1x256xi32>
    %18 = arith.cmpi ne, %16, %17 : vector<1x256xi32>
    %c15_i32 = arith.constant 15 : i32
    %19 = vector.broadcast %c15_i32 : i32 to vector<1x256xi32>
    %20 = arith.cmpi ne, %16, %19 : vector<1x256xi32>
    %c0 = arith.constant 0 : index
    %c0_4 = arith.constant 0 : index
    %c0_5 = arith.constant 0 : index
    %21 = vector.load %arg1[%c0, %c0_4, %c0_5] : memref<1x4x290xf32, #tpu.memory_space<vmem>>, vector<1x4x256xf32>
    %22 = vector.shape_cast %21 : vector<1x4x256xf32> to vector<4x256xf32>
    %cst = arith.constant 0.000000e+00 : f32
    %23 = vector.shape_cast %18 : vector<1x256xi1> to vector<1x256xi1>
    %24 = vector.broadcast %23 : vector<1x256xi1> to vector<4x256xi1>
    %25 = vector.broadcast %cst : f32 to vector<4x256xf32>
    %26 = arith.select %24, %22, %25 : vector<4x256xi1>, vector<4x256xf32>
    %c0_6 = arith.constant 0 : index
    %c0_7 = arith.constant 0 : index
    %c1 = arith.constant 1 : index
    %27 = vector.load %arg1[%c0_6, %c0_7, %c1] : memref<1x4x290xf32, #tpu.memory_space<vmem>>, vector<1x4x256xf32>
    %28 = vector.shape_cast %27 : vector<1x4x256xf32> to vector<4x256xf32>
    %c0_8 = arith.constant 0 : index
    %c0_9 = arith.constant 0 : index
    %c2 = arith.constant 2 : index
    %29 = vector.load %arg1[%c0_8, %c0_9, %c2] : memref<1x4x290xf32, #tpu.memory_space<vmem>>, vector<1x4x256xf32>
    %30 = vector.shape_cast %29 : vector<1x4x256xf32> to vector<4x256xf32>
    %cst_10 = arith.constant 0.000000e+00 : f32
    %31 = vector.shape_cast %20 : vector<1x256xi1> to vector<1x256xi1>
    %32 = vector.broadcast %31 : vector<1x256xi1> to vector<4x256xi1>
    %33 = vector.broadcast %cst_10 : f32 to vector<4x256xf32>
    %34 = arith.select %32, %30, %33 : vector<4x256xi1>, vector<4x256xf32>
    %c0_11 = arith.constant 0 : index
    %c0_12 = arith.constant 0 : index
    %c16 = arith.constant 16 : index
    %35 = vector.load %arg1[%c0_11, %c0_12, %c16] : memref<1x4x290xf32, #tpu.memory_space<vmem>>, vector<1x4x256xf32>
    %36 = vector.shape_cast %35 : vector<1x4x256xf32> to vector<4x256xf32>
    %cst_13 = arith.constant 0.000000e+00 : f32
    %37 = vector.shape_cast %18 : vector<1x256xi1> to vector<1x256xi1>
    %38 = vector.broadcast %37 : vector<1x256xi1> to vector<4x256xi1>
    %39 = vector.broadcast %cst_13 : f32 to vector<4x256xf32>
    %40 = arith.select %38, %36, %39 : vector<4x256xi1>, vector<4x256xf32>
    %c0_14 = arith.constant 0 : index
    %c0_15 = arith.constant 0 : index
    %c17 = arith.constant 17 : index
    %41 = vector.load %arg1[%c0_14, %c0_15, %c17] : memref<1x4x290xf32, #tpu.memory_space<vmem>>, vector<1x4x256xf32>
    %42 = vector.shape_cast %41 : vector<1x4x256xf32> to vector<4x256xf32>
    %c0_16 = arith.constant 0 : index
    %c0_17 = arith.constant 0 : index
    %c18 = arith.constant 18 : index
    %43 = vector.load %arg1[%c0_16, %c0_17, %c18] : memref<1x4x290xf32, #tpu.memory_space<vmem>>, vector<1x4x256xf32>
    %44 = vector.shape_cast %43 : vector<1x4x256xf32> to vector<4x256xf32>
    %cst_18 = arith.constant 0.000000e+00 : f32
    %45 = vector.shape_cast %20 : vector<1x256xi1> to vector<1x256xi1>
    %46 = vector.broadcast %45 : vector<1x256xi1> to vector<4x256xi1>
    %47 = vector.broadcast %cst_18 : f32 to vector<4x256xf32>
    %48 = arith.select %46, %44, %47 : vector<4x256xi1>, vector<4x256xf32>
    %c0_19 = arith.constant 0 : index
    %c0_20 = arith.constant 0 : index
    %c32 = arith.constant 32 : index
    %49 = vector.load %arg1[%c0_19, %c0_20, %c32] : memref<1x4x290xf32, #tpu.memory_space<vmem>>, vector<1x4x256xf32>
    %50 = vector.shape_cast %49 : vector<1x4x256xf32> to vector<4x256xf32>
    %cst_21 = arith.constant 0.000000e+00 : f32
    %51 = vector.shape_cast %18 : vector<1x256xi1> to vector<1x256xi1>
    %52 = vector.broadcast %51 : vector<1x256xi1> to vector<4x256xi1>
    %53 = vector.broadcast %cst_21 : f32 to vector<4x256xf32>
    %54 = arith.select %52, %50, %53 : vector<4x256xi1>, vector<4x256xf32>
    %c0_22 = arith.constant 0 : index
    %c0_23 = arith.constant 0 : index
    %c33 = arith.constant 33 : index
    %55 = vector.load %arg1[%c0_22, %c0_23, %c33] : memref<1x4x290xf32, #tpu.memory_space<vmem>>, vector<1x4x256xf32>
    %56 = vector.shape_cast %55 : vector<1x4x256xf32> to vector<4x256xf32>
    %c0_24 = arith.constant 0 : index
    %c0_25 = arith.constant 0 : index
    %c34 = arith.constant 34 : index
    %57 = vector.load %arg1[%c0_24, %c0_25, %c34] : memref<1x4x290xf32, #tpu.memory_space<vmem>>, vector<1x4x256xf32>
    %58 = vector.shape_cast %57 : vector<1x4x256xf32> to vector<4x256xf32>
    %cst_26 = arith.constant 0.000000e+00 : f32
    %59 = vector.shape_cast %20 : vector<1x256xi1> to vector<1x256xi1>
    %60 = vector.broadcast %59 : vector<1x256xi1> to vector<4x256xi1>
    %61 = vector.broadcast %cst_26 : f32 to vector<4x256xf32>
    %62 = arith.select %60, %58, %61 : vector<4x256xi1>, vector<4x256xf32>
    %63 = tpu.concatenate %26, %28, %34, %40, %42, %48, %54, %56, %62 in 0 : vector<4x256xf32>, vector<4x256xf32>, vector<4x256xf32>, vector<4x256xf32>, vector<4x256xf32>, vector<4x256xf32>, vector<4x256xf32>, vector<4x256xf32>, vector<4x256xf32> -> vector<36x256xf32>
    %64 = arith.truncf %63 : vector<36x256xf32> to vector<36x256xbf16>
    %c0_27 = arith.constant 0 : index
    %c0_28 = arith.constant 0 : index
    %65 = vector.load %arg2[%c0_27, %c0_28] : memref<4x36xbf16, #tpu.memory_space<vmem>>, vector<4x36xbf16>
    %cst_29 = arith.constant dense<0.000000e+00> : vector<4x256xf32>
    %66 = tpu.matmul %65, %64, %cst_29 {dimension_numbers = #tpu.dot_dimension_numbers<[1], [0], [0], [1], [0, 0, 1, 1], [], []>} : vector<4x36xbf16>, vector<36x256xbf16>, vector<4x256xf32> -> vector<4x256xf32>
    %c0_30 = arith.constant 0 : index
    %c0_31 = arith.constant 0 : index
    %67 = vector.load %arg3[%c0_30, %c0_31] : memref<4x1xf32, #tpu.memory_space<vmem>>, vector<4x1xf32>
    %68 = vector.broadcast %67 : vector<4x1xf32> to vector<4x256xf32>
    %69 = arith.addf %66, %68 : vector<4x256xf32>
    %c0_32 = arith.constant 0 : index
    %c0_33 = arith.constant 0 : index
    %c0_34 = arith.constant 0 : index
    %70 = vector.load %arg4[%c0_32, %c0_33, %c0_34] : memref<1x4x256xf32, #tpu.memory_space<vmem>>, vector<1x4x256xf32>
    %71 = vector.shape_cast %70 : vector<1x4x256xf32> to vector<4x256xf32>
    %72 = arith.addf %69, %71 : vector<4x256xf32>
    %c0_35 = arith.constant 0 : index
    %c0_36 = arith.constant 0 : index
    %c0_37 = arith.constant 0 : index
    %73 = vector.load %arg4[%c0_35, %c0_36, %c0_37] : memref<1x4x256xf32, #tpu.memory_space<vmem>>, vector<1x4x256xf32>
    %74 = vector.shape_cast %73 : vector<1x4x256xf32> to vector<4x256xf32>
    %75 = tpu.concatenate %74, %72 in 0 : vector<4x256xf32>, vector<4x256xf32> -> vector<8x256xf32>
    %c0_38 = arith.constant 0 : index
    %c0_39 = arith.constant 0 : index
    %c0_40 = arith.constant 0 : index
    %76 = vector.load %arg5[%c0_38, %c0_39, %c0_40] : memref<1x8x256xf32, #tpu.memory_space<vmem>>, vector<1x8x256xf32>
    %77 = vector.shape_cast %76 : vector<1x8x256xf32> to vector<8x256xf32>
    %78 = vector.shape_cast %75 : vector<8x256xf32> to vector<1x8x256xf32>
    tpu.vector_store %arg5[%c0_38, %c0_39, %c0_40], %78 {strides = array<i32>} : memref<1x8x256xf32, #tpu.memory_space<vmem>>, vector<1x8x256xf32>,
    return
  }
  func.func @transform_0(%arg0: i32) -> (i32, i32, i32) {
    %c0_i32 = arith.constant 0 : i32
    %c0_i32_0 = arith.constant 0 : i32
    %c0_i32_1 = arith.constant 0 : i32
    return %arg0, %c0_i32, %c0_i32_0 : i32, i32, i32
  }
  func.func @transform_1(%arg0: i32) -> (i32, i32) {
    %c0_i32 = arith.constant 0 : i32
    %c0_i32_0 = arith.constant 0 : i32
    %c0_i32_1 = arith.constant 0 : i32
    return %c0_i32, %c0_i32_0 : i32, i32
  }
  func.func @transform_2(%arg0: i32) -> (i32, i32) {
    %c0_i32 = arith.constant 0 : i32
    %c0_i32_0 = arith.constant 0 : i32
    %c0_i32_1 = arith.constant 0 : i32
    return %c0_i32, %c0_i32_0 : i32, i32
  }
  func.func @transform_3(%arg0: i32) -> (i32, i32, i32) {
    %c0_i32 = arith.constant 0 : i32
    %c0_i32_0 = arith.constant 0 : i32
    %c0_i32_1 = arith.constant 0 : i32
    return %arg0, %c0_i32, %c0_i32_0 : i32, i32, i32
  }
  func.func @transform_4(%arg0: i32) -> (i32, i32, i32) {
    %c0_i32 = arith.constant 0 : i32
    %c0_i32_0 = arith.constant 0 : i32
    %c0_i32_1 = arith.constant 0 : i32
    return %arg0, %c0_i32, %c0_i32_0 : i32, i32, i32
  }
}

module attributes {stable_mosaic.version = 11 : i64} {
  func.func @kernel(%arg0: i32, %arg1: memref<1x8x290xf32, #tpu.memory_space<vmem>>, %arg2: memref<8x72xbf16, #tpu.memory_space<vmem>>, %arg3: memref<8x1xf32, #tpu.memory_space<vmem>>, %arg4: memref<1x8x256xf32, #tpu.memory_space<vmem>>) attributes {dimension_semantics = [#tpu.dimension_semantics<parallel>], iteration_bounds = array<i64: 2>, scalar_prefetch = 0 : i64, scratch_operands = 0 : i64, tpu.core_type = #tpu.core_type<tc>, window_params = [{transform_indices = @transform_0, window_bounds = array<i64: 1, 8, 290>}, {pipeline_mode = #tpu.pipeline_mode<synchronous>, transform_indices = @transform_1, window_bounds = array<i64: 8, 72>}, {pipeline_mode = #tpu.pipeline_mode<synchronous>, transform_indices = @transform_2, window_bounds = array<i64: 8, 1>}, {transform_indices = @transform_3, window_bounds = array<i64: 1, 8, 256>}]} {
    %0 = tpu.iota {dimensions = array<i32: 1>} : vector<1x256xi32>
    %c16_i32 = arith.constant 16 : i32
    %c0_i32 = arith.constant 0 : i32
    %1 = arith.cmpi eq, %c16_i32, %c0_i32 : i32
    %c1_i32 = arith.constant 1 : i32
    %2 = arith.select %1, %c1_i32, %c16_i32 : i32
    %3 = vector.broadcast %2 : i32 to vector<1x256xi32>
    %4 = arith.remsi %0, %3 : vector<1x256xi32>
    %c0_i32_0 = arith.constant 0 : i32
    %5 = vector.broadcast %c0_i32_0 : i32 to vector<1x256xi32>
    %6 = arith.cmpi ne, %4, %5 : vector<1x256xi32>
    %c0_i32_1 = arith.constant 0 : i32
    %7 = vector.broadcast %c0_i32_1 : i32 to vector<1x256xi32>
    %8 = arith.cmpi slt, %4, %7 : vector<1x256xi32>
    %c0_i32_2 = arith.constant 0 : i32
    %9 = arith.cmpi slt, %2, %c0_i32_2 : i32
    %10 = vector.broadcast %9 : i1 to vector<1x256xi1>
    %11 = vector.broadcast %10 : vector<1x256xi1> to vector<1x256xi1>
    %12 = arith.xori %8, %11 : vector<1x256xi1>
    %13 = arith.andi %12, %6 : vector<1x256xi1>
    %14 = vector.broadcast %2 : i32 to vector<1x256xi32>
    %15 = arith.addi %4, %14 : vector<1x256xi32>
    %16 = arith.select %13, %15, %4 : vector<1x256xi1>, vector<1x256xi32>
    %c0_i32_3 = arith.constant 0 : i32
    %17 = vector.broadcast %c0_i32_3 : i32 to vector<1x256xi32>
    %18 = arith.cmpi ne, %16, %17 : vector<1x256xi32>
    %c15_i32 = arith.constant 15 : i32
    %19 = vector.broadcast %c15_i32 : i32 to vector<1x256xi32>
    %20 = arith.cmpi ne, %16, %19 : vector<1x256xi32>
    %c0 = arith.constant 0 : index
    %c0_4 = arith.constant 0 : index
    %c0_5 = arith.constant 0 : index
    %21 = vector.load %arg1[%c0, %c0_4, %c0_5] : memref<1x8x290xf32, #tpu.memory_space<vmem>>, vector<1x8x256xf32>
    %22 = vector.shape_cast %21 : vector<1x8x256xf32> to vector<8x256xf32>
    %cst = arith.constant 0.000000e+00 : f32
    %23 = vector.shape_cast %18 : vector<1x256xi1> to vector<1x256xi1>
    %24 = vector.broadcast %23 : vector<1x256xi1> to vector<8x256xi1>
    %25 = vector.broadcast %cst : f32 to vector<8x256xf32>
    %26 = arith.select %24, %22, %25 : vector<8x256xi1>, vector<8x256xf32>
    %c0_6 = arith.constant 0 : index
    %c0_7 = arith.constant 0 : index
    %c1 = arith.constant 1 : index
    %27 = vector.load %arg1[%c0_6, %c0_7, %c1] : memref<1x8x290xf32, #tpu.memory_space<vmem>>, vector<1x8x256xf32>
    %28 = vector.shape_cast %27 : vector<1x8x256xf32> to vector<8x256xf32>
    %c0_8 = arith.constant 0 : index
    %c0_9 = arith.constant 0 : index
    %c2 = arith.constant 2 : index
    %29 = vector.load %arg1[%c0_8, %c0_9, %c2] : memref<1x8x290xf32, #tpu.memory_space<vmem>>, vector<1x8x256xf32>
    %30 = vector.shape_cast %29 : vector<1x8x256xf32> to vector<8x256xf32>
    %cst_10 = arith.constant 0.000000e+00 : f32
    %31 = vector.shape_cast %20 : vector<1x256xi1> to vector<1x256xi1>
    %32 = vector.broadcast %31 : vector<1x256xi1> to vector<8x256xi1>
    %33 = vector.broadcast %cst_10 : f32 to vector<8x256xf32>
    %34 = arith.select %32, %30, %33 : vector<8x256xi1>, vector<8x256xf32>
    %c0_11 = arith.constant 0 : index
    %c0_12 = arith.constant 0 : index
    %c16 = arith.constant 16 : index
    %35 = vector.load %arg1[%c0_11, %c0_12, %c16] : memref<1x8x290xf32, #tpu.memory_space<vmem>>, vector<1x8x256xf32>
    %36 = vector.shape_cast %35 : vector<1x8x256xf32> to vector<8x256xf32>
    %cst_13 = arith.constant 0.000000e+00 : f32
    %37 = vector.shape_cast %18 : vector<1x256xi1> to vector<1x256xi1>
    %38 = vector.broadcast %37 : vector<1x256xi1> to vector<8x256xi1>
    %39 = vector.broadcast %cst_13 : f32 to vector<8x256xf32>
    %40 = arith.select %38, %36, %39 : vector<8x256xi1>, vector<8x256xf32>
    %c0_14 = arith.constant 0 : index
    %c0_15 = arith.constant 0 : index
    %c17 = arith.constant 17 : index
    %41 = vector.load %arg1[%c0_14, %c0_15, %c17] : memref<1x8x290xf32, #tpu.memory_space<vmem>>, vector<1x8x256xf32>
    %42 = vector.shape_cast %41 : vector<1x8x256xf32> to vector<8x256xf32>
    %c0_16 = arith.constant 0 : index
    %c0_17 = arith.constant 0 : index
    %c18 = arith.constant 18 : index
    %43 = vector.load %arg1[%c0_16, %c0_17, %c18] : memref<1x8x290xf32, #tpu.memory_space<vmem>>, vector<1x8x256xf32>
    %44 = vector.shape_cast %43 : vector<1x8x256xf32> to vector<8x256xf32>
    %cst_18 = arith.constant 0.000000e+00 : f32
    %45 = vector.shape_cast %20 : vector<1x256xi1> to vector<1x256xi1>
    %46 = vector.broadcast %45 : vector<1x256xi1> to vector<8x256xi1>
    %47 = vector.broadcast %cst_18 : f32 to vector<8x256xf32>
    %48 = arith.select %46, %44, %47 : vector<8x256xi1>, vector<8x256xf32>
    %c0_19 = arith.constant 0 : index
    %c0_20 = arith.constant 0 : index
    %c32 = arith.constant 32 : index
    %49 = vector.load %arg1[%c0_19, %c0_20, %c32] : memref<1x8x290xf32, #tpu.memory_space<vmem>>, vector<1x8x256xf32>
    %50 = vector.shape_cast %49 : vector<1x8x256xf32> to vector<8x256xf32>
    %cst_21 = arith.constant 0.000000e+00 : f32
    %51 = vector.shape_cast %18 : vector<1x256xi1> to vector<1x256xi1>
    %52 = vector.broadcast %51 : vector<1x256xi1> to vector<8x256xi1>
    %53 = vector.broadcast %cst_21 : f32 to vector<8x256xf32>
    %54 = arith.select %52, %50, %53 : vector<8x256xi1>, vector<8x256xf32>
    %c0_22 = arith.constant 0 : index
    %c0_23 = arith.constant 0 : index
    %c33 = arith.constant 33 : index
    %55 = vector.load %arg1[%c0_22, %c0_23, %c33] : memref<1x8x290xf32, #tpu.memory_space<vmem>>, vector<1x8x256xf32>
    %56 = vector.shape_cast %55 : vector<1x8x256xf32> to vector<8x256xf32>
    %c0_24 = arith.constant 0 : index
    %c0_25 = arith.constant 0 : index
    %c34 = arith.constant 34 : index
    %57 = vector.load %arg1[%c0_24, %c0_25, %c34] : memref<1x8x290xf32, #tpu.memory_space<vmem>>, vector<1x8x256xf32>
    %58 = vector.shape_cast %57 : vector<1x8x256xf32> to vector<8x256xf32>
    %cst_26 = arith.constant 0.000000e+00 : f32
    %59 = vector.shape_cast %20 : vector<1x256xi1> to vector<1x256xi1>
    %60 = vector.broadcast %59 : vector<1x256xi1> to vector<8x256xi1>
    %61 = vector.broadcast %cst_26 : f32 to vector<8x256xf32>
    %62 = arith.select %60, %58, %61 : vector<8x256xi1>, vector<8x256xf32>
    %63 = tpu.concatenate %26, %28, %34, %40, %42, %48, %54, %56, %62 in 0 : vector<8x256xf32>, vector<8x256xf32>, vector<8x256xf32>, vector<8x256xf32>, vector<8x256xf32>, vector<8x256xf32>, vector<8x256xf32>, vector<8x256xf32>, vector<8x256xf32> -> vector<72x256xf32>
    %64 = arith.truncf %63 : vector<72x256xf32> to vector<72x256xbf16>
    %c0_27 = arith.constant 0 : index
    %c0_28 = arith.constant 0 : index
    %65 = vector.load %arg2[%c0_27, %c0_28] : memref<8x72xbf16, #tpu.memory_space<vmem>>, vector<8x72xbf16>
    %cst_29 = arith.constant dense<0.000000e+00> : vector<8x256xf32>
    %66 = tpu.matmul %65, %64, %cst_29 {dimension_numbers = #tpu.dot_dimension_numbers<[1], [0], [0], [1], [0, 0, 1, 1], [], []>} : vector<8x72xbf16>, vector<72x256xbf16>, vector<8x256xf32> -> vector<8x256xf32>
    %c0_30 = arith.constant 0 : index
    %c0_31 = arith.constant 0 : index
    %67 = vector.load %arg3[%c0_30, %c0_31] : memref<8x1xf32, #tpu.memory_space<vmem>>, vector<8x1xf32>
    %68 = vector.broadcast %67 : vector<8x1xf32> to vector<8x256xf32>
    %69 = arith.addf %66, %68 : vector<8x256xf32>
    %cst_32 = arith.constant 0.000000e+00 : f32
    %70 = vector.broadcast %cst_32 : f32 to vector<8x256xf32>
    %71 = arith.cmpf oge, %69, %70 : vector<8x256xf32>
    %cst_33 = arith.constant 2.000000e-01 : f32
    %72 = vector.broadcast %cst_33 : f32 to vector<8x256xf32>
    %73 = arith.mulf %72, %69 : vector<8x256xf32>
    %74 = arith.select %71, %69, %73 : vector<8x256xi1>, vector<8x256xf32>
    %c0_34 = arith.constant 0 : index
    %c0_35 = arith.constant 0 : index
    %c0_36 = arith.constant 0 : index
    %75 = vector.load %arg4[%c0_34, %c0_35, %c0_36] : memref<1x8x256xf32, #tpu.memory_space<vmem>>, vector<1x8x256xf32>
    %76 = vector.shape_cast %75 : vector<1x8x256xf32> to vector<8x256xf32>
    %77 = vector.shape_cast %74 : vector<8x256xf32> to vector<1x8x256xf32>
    tpu.vector_store %arg4[%c0_34, %c0_35, %c0_36], %77 {strides = array<i32>} : memref<1x8x256xf32, #tpu.memory_space<vmem>>, vector<1x8x256xf32>,
    return
  }
  func.func @transform_0(%arg0: i32) -> (i32, i32, i32) {
    %c0_i32 = arith.constant 0 : i32
    %c0_i32_0 = arith.constant 0 : i32
    %c0_i32_1 = arith.constant 0 : i32
    return %arg0, %c0_i32, %c0_i32_0 : i32, i32, i32
  }
  func.func @transform_1(%arg0: i32) -> (i32, i32) {
    %c0_i32 = arith.constant 0 : i32
    %c0_i32_0 = arith.constant 0 : i32
    %c0_i32_1 = arith.constant 0 : i32
    return %c0_i32, %c0_i32_0 : i32, i32
  }
  func.func @transform_2(%arg0: i32) -> (i32, i32) {
    %c0_i32 = arith.constant 0 : i32
    %c0_i32_0 = arith.constant 0 : i32
    %c0_i32_1 = arith.constant 0 : i32
    return %c0_i32, %c0_i32_0 : i32, i32
  }
  func.func @transform_3(%arg0: i32) -> (i32, i32, i32) {
    %c0_i32 = arith.constant 0 : i32
    %c0_i32_0 = arith.constant 0 : i32
    %c0_i32_1 = arith.constant 0 : i32
    return %arg0, %c0_i32, %c0_i32_0 : i32, i32, i32
  }
}

module attributes {stable_mosaic.version = 11 : i64} {
  func.func @kernel(%arg0: i32, %arg1: memref<1x8x290xf32, #tpu.memory_space<vmem>>, %arg2: memref<8x72xbf16, #tpu.memory_space<vmem>>, %arg3: memref<8x1xf32, #tpu.memory_space<vmem>>, %arg4: memref<1x8x256xf32, #tpu.memory_space<vmem>>, %arg5: memref<1x16x256xf32, #tpu.memory_space<vmem>>) attributes {dimension_semantics = [#tpu.dimension_semantics<parallel>], iteration_bounds = array<i64: 2>, scalar_prefetch = 0 : i64, scratch_operands = 0 : i64, tpu.core_type = #tpu.core_type<tc>, window_params = [{transform_indices = @transform_0, window_bounds = array<i64: 1, 8, 290>}, {pipeline_mode = #tpu.pipeline_mode<synchronous>, transform_indices = @transform_1, window_bounds = array<i64: 8, 72>}, {pipeline_mode = #tpu.pipeline_mode<synchronous>, transform_indices = @transform_2, window_bounds = array<i64: 8, 1>}, {transform_indices = @transform_3, window_bounds = array<i64: 1, 8, 256>}, {transform_indices = @transform_4, window_bounds = array<i64: 1, 16, 256>}]} {
    %0 = tpu.iota {dimensions = array<i32: 1>} : vector<1x256xi32>
    %c16_i32 = arith.constant 16 : i32
    %c0_i32 = arith.constant 0 : i32
    %1 = arith.cmpi eq, %c16_i32, %c0_i32 : i32
    %c1_i32 = arith.constant 1 : i32
    %2 = arith.select %1, %c1_i32, %c16_i32 : i32
    %3 = vector.broadcast %2 : i32 to vector<1x256xi32>
    %4 = arith.remsi %0, %3 : vector<1x256xi32>
    %c0_i32_0 = arith.constant 0 : i32
    %5 = vector.broadcast %c0_i32_0 : i32 to vector<1x256xi32>
    %6 = arith.cmpi ne, %4, %5 : vector<1x256xi32>
    %c0_i32_1 = arith.constant 0 : i32
    %7 = vector.broadcast %c0_i32_1 : i32 to vector<1x256xi32>
    %8 = arith.cmpi slt, %4, %7 : vector<1x256xi32>
    %c0_i32_2 = arith.constant 0 : i32
    %9 = arith.cmpi slt, %2, %c0_i32_2 : i32
    %10 = vector.broadcast %9 : i1 to vector<1x256xi1>
    %11 = vector.broadcast %10 : vector<1x256xi1> to vector<1x256xi1>
    %12 = arith.xori %8, %11 : vector<1x256xi1>
    %13 = arith.andi %12, %6 : vector<1x256xi1>
    %14 = vector.broadcast %2 : i32 to vector<1x256xi32>
    %15 = arith.addi %4, %14 : vector<1x256xi32>
    %16 = arith.select %13, %15, %4 : vector<1x256xi1>, vector<1x256xi32>
    %c0_i32_3 = arith.constant 0 : i32
    %17 = vector.broadcast %c0_i32_3 : i32 to vector<1x256xi32>
    %18 = arith.cmpi ne, %16, %17 : vector<1x256xi32>
    %c15_i32 = arith.constant 15 : i32
    %19 = vector.broadcast %c15_i32 : i32 to vector<1x256xi32>
    %20 = arith.cmpi ne, %16, %19 : vector<1x256xi32>
    %c0 = arith.constant 0 : index
    %c0_4 = arith.constant 0 : index
    %c0_5 = arith.constant 0 : index
    %21 = vector.load %arg1[%c0, %c0_4, %c0_5] : memref<1x8x290xf32, #tpu.memory_space<vmem>>, vector<1x8x256xf32>
    %22 = vector.shape_cast %21 : vector<1x8x256xf32> to vector<8x256xf32>
    %cst = arith.constant 0.000000e+00 : f32
    %23 = vector.shape_cast %18 : vector<1x256xi1> to vector<1x256xi1>
    %24 = vector.broadcast %23 : vector<1x256xi1> to vector<8x256xi1>
    %25 = vector.broadcast %cst : f32 to vector<8x256xf32>
    %26 = arith.select %24, %22, %25 : vector<8x256xi1>, vector<8x256xf32>
    %c0_6 = arith.constant 0 : index
    %c0_7 = arith.constant 0 : index
    %c1 = arith.constant 1 : index
    %27 = vector.load %arg1[%c0_6, %c0_7, %c1] : memref<1x8x290xf32, #tpu.memory_space<vmem>>, vector<1x8x256xf32>
    %28 = vector.shape_cast %27 : vector<1x8x256xf32> to vector<8x256xf32>
    %c0_8 = arith.constant 0 : index
    %c0_9 = arith.constant 0 : index
    %c2 = arith.constant 2 : index
    %29 = vector.load %arg1[%c0_8, %c0_9, %c2] : memref<1x8x290xf32, #tpu.memory_space<vmem>>, vector<1x8x256xf32>
    %30 = vector.shape_cast %29 : vector<1x8x256xf32> to vector<8x256xf32>
    %cst_10 = arith.constant 0.000000e+00 : f32
    %31 = vector.shape_cast %20 : vector<1x256xi1> to vector<1x256xi1>
    %32 = vector.broadcast %31 : vector<1x256xi1> to vector<8x256xi1>
    %33 = vector.broadcast %cst_10 : f32 to vector<8x256xf32>
    %34 = arith.select %32, %30, %33 : vector<8x256xi1>, vector<8x256xf32>
    %c0_11 = arith.constant 0 : index
    %c0_12 = arith.constant 0 : index
    %c16 = arith.constant 16 : index
    %35 = vector.load %arg1[%c0_11, %c0_12, %c16] : memref<1x8x290xf32, #tpu.memory_space<vmem>>, vector<1x8x256xf32>
    %36 = vector.shape_cast %35 : vector<1x8x256xf32> to vector<8x256xf32>
    %cst_13 = arith.constant 0.000000e+00 : f32
    %37 = vector.shape_cast %18 : vector<1x256xi1> to vector<1x256xi1>
    %38 = vector.broadcast %37 : vector<1x256xi1> to vector<8x256xi1>
    %39 = vector.broadcast %cst_13 : f32 to vector<8x256xf32>
    %40 = arith.select %38, %36, %39 : vector<8x256xi1>, vector<8x256xf32>
    %c0_14 = arith.constant 0 : index
    %c0_15 = arith.constant 0 : index
    %c17 = arith.constant 17 : index
    %41 = vector.load %arg1[%c0_14, %c0_15, %c17] : memref<1x8x290xf32, #tpu.memory_space<vmem>>, vector<1x8x256xf32>
    %42 = vector.shape_cast %41 : vector<1x8x256xf32> to vector<8x256xf32>
    %c0_16 = arith.constant 0 : index
    %c0_17 = arith.constant 0 : index
    %c18 = arith.constant 18 : index
    %43 = vector.load %arg1[%c0_16, %c0_17, %c18] : memref<1x8x290xf32, #tpu.memory_space<vmem>>, vector<1x8x256xf32>
    %44 = vector.shape_cast %43 : vector<1x8x256xf32> to vector<8x256xf32>
    %cst_18 = arith.constant 0.000000e+00 : f32
    %45 = vector.shape_cast %20 : vector<1x256xi1> to vector<1x256xi1>
    %46 = vector.broadcast %45 : vector<1x256xi1> to vector<8x256xi1>
    %47 = vector.broadcast %cst_18 : f32 to vector<8x256xf32>
    %48 = arith.select %46, %44, %47 : vector<8x256xi1>, vector<8x256xf32>
    %c0_19 = arith.constant 0 : index
    %c0_20 = arith.constant 0 : index
    %c32 = arith.constant 32 : index
    %49 = vector.load %arg1[%c0_19, %c0_20, %c32] : memref<1x8x290xf32, #tpu.memory_space<vmem>>, vector<1x8x256xf32>
    %50 = vector.shape_cast %49 : vector<1x8x256xf32> to vector<8x256xf32>
    %cst_21 = arith.constant 0.000000e+00 : f32
    %51 = vector.shape_cast %18 : vector<1x256xi1> to vector<1x256xi1>
    %52 = vector.broadcast %51 : vector<1x256xi1> to vector<8x256xi1>
    %53 = vector.broadcast %cst_21 : f32 to vector<8x256xf32>
    %54 = arith.select %52, %50, %53 : vector<8x256xi1>, vector<8x256xf32>
    %c0_22 = arith.constant 0 : index
    %c0_23 = arith.constant 0 : index
    %c33 = arith.constant 33 : index
    %55 = vector.load %arg1[%c0_22, %c0_23, %c33] : memref<1x8x290xf32, #tpu.memory_space<vmem>>, vector<1x8x256xf32>
    %56 = vector.shape_cast %55 : vector<1x8x256xf32> to vector<8x256xf32>
    %c0_24 = arith.constant 0 : index
    %c0_25 = arith.constant 0 : index
    %c34 = arith.constant 34 : index
    %57 = vector.load %arg1[%c0_24, %c0_25, %c34] : memref<1x8x290xf32, #tpu.memory_space<vmem>>, vector<1x8x256xf32>
    %58 = vector.shape_cast %57 : vector<1x8x256xf32> to vector<8x256xf32>
    %cst_26 = arith.constant 0.000000e+00 : f32
    %59 = vector.shape_cast %20 : vector<1x256xi1> to vector<1x256xi1>
    %60 = vector.broadcast %59 : vector<1x256xi1> to vector<8x256xi1>
    %61 = vector.broadcast %cst_26 : f32 to vector<8x256xf32>
    %62 = arith.select %60, %58, %61 : vector<8x256xi1>, vector<8x256xf32>
    %63 = tpu.concatenate %26, %28, %34, %40, %42, %48, %54, %56, %62 in 0 : vector<8x256xf32>, vector<8x256xf32>, vector<8x256xf32>, vector<8x256xf32>, vector<8x256xf32>, vector<8x256xf32>, vector<8x256xf32>, vector<8x256xf32>, vector<8x256xf32> -> vector<72x256xf32>
    %64 = arith.truncf %63 : vector<72x256xf32> to vector<72x256xbf16>
    %c0_27 = arith.constant 0 : index
    %c0_28 = arith.constant 0 : index
    %65 = vector.load %arg2[%c0_27, %c0_28] : memref<8x72xbf16, #tpu.memory_space<vmem>>, vector<8x72xbf16>
    %cst_29 = arith.constant dense<0.000000e+00> : vector<8x256xf32>
    %66 = tpu.matmul %65, %64, %cst_29 {dimension_numbers = #tpu.dot_dimension_numbers<[1], [0], [0], [1], [0, 0, 1, 1], [], []>} : vector<8x72xbf16>, vector<72x256xbf16>, vector<8x256xf32> -> vector<8x256xf32>
    %c0_30 = arith.constant 0 : index
    %c0_31 = arith.constant 0 : index
    %67 = vector.load %arg3[%c0_30, %c0_31] : memref<8x1xf32, #tpu.memory_space<vmem>>, vector<8x1xf32>
    %68 = vector.broadcast %67 : vector<8x1xf32> to vector<8x256xf32>
    %69 = arith.addf %66, %68 : vector<8x256xf32>
    %c0_32 = arith.constant 0 : index
    %c0_33 = arith.constant 0 : index
    %c0_34 = arith.constant 0 : index
    %70 = vector.load %arg4[%c0_32, %c0_33, %c0_34] : memref<1x8x256xf32, #tpu.memory_space<vmem>>, vector<1x8x256xf32>
    %71 = vector.shape_cast %70 : vector<1x8x256xf32> to vector<8x256xf32>
    %72 = arith.addf %69, %71 : vector<8x256xf32>
    %c0_35 = arith.constant 0 : index
    %c0_36 = arith.constant 0 : index
    %c0_37 = arith.constant 0 : index
    %73 = vector.load %arg4[%c0_35, %c0_36, %c0_37] : memref<1x8x256xf32, #tpu.memory_space<vmem>>, vector<1x8x256xf32>
    %74 = vector.shape_cast %73 : vector<1x8x256xf32> to vector<8x256xf32>
    %75 = tpu.concatenate %74, %72 in 0 : vector<8x256xf32>, vector<8x256xf32> -> vector<16x256xf32>
    %c0_38 = arith.constant 0 : index
    %c0_39 = arith.constant 0 : index
    %c0_40 = arith.constant 0 : index
    %76 = vector.load %arg5[%c0_38, %c0_39, %c0_40] : memref<1x16x256xf32, #tpu.memory_space<vmem>>, vector<1x16x256xf32>
    %77 = vector.shape_cast %76 : vector<1x16x256xf32> to vector<16x256xf32>
    %78 = vector.shape_cast %75 : vector<16x256xf32> to vector<1x16x256xf32>
    tpu.vector_store %arg5[%c0_38, %c0_39, %c0_40], %78 {strides = array<i32>} : memref<1x16x256xf32, #tpu.memory_space<vmem>>, vector<1x16x256xf32>,
    return
  }
  func.func @transform_0(%arg0: i32) -> (i32, i32, i32) {
    %c0_i32 = arith.constant 0 : i32
    %c0_i32_0 = arith.constant 0 : i32
    %c0_i32_1 = arith.constant 0 : i32
    return %arg0, %c0_i32, %c0_i32_0 : i32, i32, i32
  }
  func.func @transform_1(%arg0: i32) -> (i32, i32) {
    %c0_i32 = arith.constant 0 : i32
    %c0_i32_0 = arith.constant 0 : i32
    %c0_i32_1 = arith.constant 0 : i32
    return %c0_i32, %c0_i32_0 : i32, i32
  }
  func.func @transform_2(%arg0: i32) -> (i32, i32) {
    %c0_i32 = arith.constant 0 : i32
    %c0_i32_0 = arith.constant 0 : i32
    %c0_i32_1 = arith.constant 0 : i32
    return %c0_i32, %c0_i32_0 : i32, i32
  }
  func.func @transform_3(%arg0: i32) -> (i32, i32, i32) {
    %c0_i32 = arith.constant 0 : i32
    %c0_i32_0 = arith.constant 0 : i32
    %c0_i32_1 = arith.constant 0 : i32
    return %arg0, %c0_i32, %c0_i32_0 : i32, i32, i32
  }
  func.func @transform_4(%arg0: i32) -> (i32, i32, i32) {
    %c0_i32 = arith.constant 0 : i32
    %c0_i32_0 = arith.constant 0 : i32
    %c0_i32_1 = arith.constant 0 : i32
    return %arg0, %c0_i32, %c0_i32_0 : i32, i32, i32
  }
}

module attributes {stable_mosaic.version = 11 : i64} {
  func.func @kernel(%arg0: i32, %arg1: memref<1x16x256xf32, #tpu.memory_space<vmem>>, %arg2: memref<4x16xbf16, #tpu.memory_space<vmem>>, %arg3: memref<1x4x256xf32, #tpu.memory_space<vmem>>) attributes {dimension_semantics = [#tpu.dimension_semantics<parallel>], iteration_bounds = array<i64: 2>, scalar_prefetch = 0 : i64, scratch_operands = 0 : i64, tpu.core_type = #tpu.core_type<tc>, window_params = [{transform_indices = @transform_0, window_bounds = array<i64: 1, 16, 256>}, {pipeline_mode = #tpu.pipeline_mode<synchronous>, transform_indices = @transform_1, window_bounds = array<i64: 4, 16>}, {transform_indices = @transform_2, window_bounds = array<i64: 1, 4, 256>}]} {
    %c0 = arith.constant 0 : index
    %c0_0 = arith.constant 0 : index
    %c0_1 = arith.constant 0 : index
    %0 = vector.load %arg1[%c0, %c0_0, %c0_1] : memref<1x16x256xf32, #tpu.memory_space<vmem>>, vector<1x16x256xf32>
    %1 = vector.shape_cast %0 : vector<1x16x256xf32> to vector<16x256xf32>
    %2 = arith.truncf %1 : vector<16x256xf32> to vector<16x256xbf16>
    %c0_2 = arith.constant 0 : index
    %c0_3 = arith.constant 0 : index
    %3 = vector.load %arg2[%c0_2, %c0_3] : memref<4x16xbf16, #tpu.memory_space<vmem>>, vector<4x16xbf16>
    %cst = arith.constant dense<0.000000e+00> : vector<4x256xf32>
    %4 = tpu.matmul %3, %2, %cst {dimension_numbers = #tpu.dot_dimension_numbers<[1], [0], [0], [1], [0, 0, 1, 1], [], []>} : vector<4x16xbf16>, vector<16x256xbf16>, vector<4x256xf32> -> vector<4x256xf32>
    %c0_4 = arith.constant 0 : index
    %c0_5 = arith.constant 0 : index
    %c0_6 = arith.constant 0 : index
    %5 = vector.load %arg3[%c0_4, %c0_5, %c0_6] : memref<1x4x256xf32, #tpu.memory_space<vmem>>, vector<1x4x256xf32>
    %6 = vector.shape_cast %5 : vector<1x4x256xf32> to vector<4x256xf32>
    %7 = vector.shape_cast %4 : vector<4x256xf32> to vector<1x4x256xf32>
    tpu.vector_store %arg3[%c0_4, %c0_5, %c0_6], %7 {strides = array<i32>} : memref<1x4x256xf32, #tpu.memory_space<vmem>>, vector<1x4x256xf32>,
    return
  }
  func.func @transform_0(%arg0: i32) -> (i32, i32, i32) {
    %c0_i32 = arith.constant 0 : i32
    %c0_i32_0 = arith.constant 0 : i32
    %c0_i32_1 = arith.constant 0 : i32
    return %arg0, %c0_i32, %c0_i32_0 : i32, i32, i32
  }
  func.func @transform_1(%arg0: i32) -> (i32, i32) {
    %c0_i32 = arith.constant 0 : i32
    %c0_i32_0 = arith.constant 0 : i32
    %c0_i32_1 = arith.constant 0 : i32
    return %c0_i32, %c0_i32_0 : i32, i32
  }
  func.func @transform_2(%arg0: i32) -> (i32, i32, i32) {
    %c0_i32 = arith.constant 0 : i32
    %c0_i32_0 = arith.constant 0 : i32
    %c0_i32_1 = arith.constant 0 : i32
    return %arg0, %c0_i32, %c0_i32_0 : i32, i32, i32
  }
}

module attributes {stable_mosaic.version = 11 : i64} {
  func.func @kernel(%arg0: i32, %arg1: memref<1x16x82xf32, #tpu.memory_space<vmem>>, %arg2: memref<16x9xf32, #tpu.memory_space<vmem>>, %arg3: memref<16x1xf32, #tpu.memory_space<vmem>>, %arg4: memref<16x16xbf16, #tpu.memory_space<vmem>>, %arg5: memref<1x16x64xf32, #tpu.memory_space<vmem>>) attributes {dimension_semantics = [#tpu.dimension_semantics<parallel>], iteration_bounds = array<i64: 2>, scalar_prefetch = 0 : i64, scratch_operands = 0 : i64, tpu.core_type = #tpu.core_type<tc>, window_params = [{transform_indices = @transform_0, window_bounds = array<i64: 1, 16, 82>}, {pipeline_mode = #tpu.pipeline_mode<synchronous>, transform_indices = @transform_1, window_bounds = array<i64: 16, 9>}, {pipeline_mode = #tpu.pipeline_mode<synchronous>, transform_indices = @transform_2, window_bounds = array<i64: 16, 1>}, {pipeline_mode = #tpu.pipeline_mode<synchronous>, transform_indices = @transform_3, window_bounds = array<i64: 16, 16>}, {transform_indices = @transform_4, window_bounds = array<i64: 1, 16, 64>}]} {
    %c0 = arith.constant 0 : index
    %c0_0 = arith.constant 0 : index
    %0 = vector.load %arg2[%c0, %c0_0] : memref<16x9xf32, #tpu.memory_space<vmem>>, vector<16x9xf32>
    %1 = tpu.iota {dimensions = array<i32: 1>} : vector<1x64xi32>
    %c8_i32 = arith.constant 8 : i32
    %c0_i32 = arith.constant 0 : i32
    %2 = arith.cmpi eq, %c8_i32, %c0_i32 : i32
    %c1_i32 = arith.constant 1 : i32
    %3 = arith.select %2, %c1_i32, %c8_i32 : i32
    %4 = vector.broadcast %3 : i32 to vector<1x64xi32>
    %5 = arith.remsi %1, %4 : vector<1x64xi32>
    %c0_i32_1 = arith.constant 0 : i32
    %6 = vector.broadcast %c0_i32_1 : i32 to vector<1x64xi32>
    %7 = arith.cmpi ne, %5, %6 : vector<1x64xi32>
    %c0_i32_2 = arith.constant 0 : i32
    %8 = vector.broadcast %c0_i32_2 : i32 to vector<1x64xi32>
    %9 = arith.cmpi slt, %5, %8 : vector<1x64xi32>
    %c0_i32_3 = arith.constant 0 : i32
    %10 = arith.cmpi slt, %3, %c0_i32_3 : i32
    %11 = vector.broadcast %10 : i1 to vector<1x64xi1>
    %12 = vector.broadcast %11 : vector<1x64xi1> to vector<1x64xi1>
    %13 = arith.xori %9, %12 : vector<1x64xi1>
    %14 = arith.andi %13, %7 : vector<1x64xi1>
    %15 = vector.broadcast %3 : i32 to vector<1x64xi32>
    %16 = arith.addi %5, %15 : vector<1x64xi32>
    %17 = arith.select %14, %16, %5 : vector<1x64xi1>, vector<1x64xi32>
    %c0_i32_4 = arith.constant 0 : i32
    %18 = vector.broadcast %c0_i32_4 : i32 to vector<1x64xi32>
    %19 = arith.cmpi ne, %17, %18 : vector<1x64xi32>
    %c7_i32 = arith.constant 7 : i32
    %20 = vector.broadcast %c7_i32 : i32 to vector<1x64xi32>
    %21 = arith.cmpi ne, %17, %20 : vector<1x64xi32>
    %c0_5 = arith.constant 0 : index
    %c0_6 = arith.constant 0 : index
    %c0_7 = arith.constant 0 : index
    %22 = vector.load %arg1[%c0_5, %c0_6, %c0_7] : memref<1x16x82xf32, #tpu.memory_space<vmem>>, vector<1x16x64xf32>
    %23 = vector.shape_cast %22 : vector<1x16x64xf32> to vector<16x64xf32>
    %cst = arith.constant 0.000000e+00 : f32
    %24 = vector.shape_cast %19 : vector<1x64xi1> to vector<1x64xi1>
    %25 = vector.broadcast %24 : vector<1x64xi1> to vector<16x64xi1>
    %26 = vector.broadcast %cst : f32 to vector<16x64xf32>
    %27 = arith.select %25, %23, %26 : vector<16x64xi1>, vector<16x64xf32>
    %c0_8 = arith.constant 0 : index
    %c0_9 = arith.constant 0 : index
    %c1 = arith.constant 1 : index
    %28 = vector.load %arg1[%c0_8, %c0_9, %c1] : memref<1x16x82xf32, #tpu.memory_space<vmem>>, vector<1x16x64xf32>
    %29 = vector.shape_cast %28 : vector<1x16x64xf32> to vector<16x64xf32>
    %c0_10 = arith.constant 0 : index
    %c0_11 = arith.constant 0 : index
    %c2 = arith.constant 2 : index
    %30 = vector.load %arg1[%c0_10, %c0_11, %c2] : memref<1x16x82xf32, #tpu.memory_space<vmem>>, vector<1x16x64xf32>
    %31 = vector.shape_cast %30 : vector<1x16x64xf32> to vector<16x64xf32>
    %cst_12 = arith.constant 0.000000e+00 : f32
    %32 = vector.shape_cast %21 : vector<1x64xi1> to vector<1x64xi1>
    %33 = vector.broadcast %32 : vector<1x64xi1> to vector<16x64xi1>
    %34 = vector.broadcast %cst_12 : f32 to vector<16x64xf32>
    %35 = arith.select %33, %31, %34 : vector<16x64xi1>, vector<16x64xf32>
    %c0_13 = arith.constant 0 : index
    %c0_14 = arith.constant 0 : index
    %c8 = arith.constant 8 : index
    %36 = vector.load %arg1[%c0_13, %c0_14, %c8] : memref<1x16x82xf32, #tpu.memory_space<vmem>>, vector<1x16x64xf32>
    %37 = vector.shape_cast %36 : vector<1x16x64xf32> to vector<16x64xf32>
    %cst_15 = arith.constant 0.000000e+00 : f32
    %38 = vector.shape_cast %19 : vector<1x64xi1> to vector<1x64xi1>
    %39 = vector.broadcast %38 : vector<1x64xi1> to vector<16x64xi1>
    %40 = vector.broadcast %cst_15 : f32 to vector<16x64xf32>
    %41 = arith.select %39, %37, %40 : vector<16x64xi1>, vector<16x64xf32>
    %c0_16 = arith.constant 0 : index
    %c0_17 = arith.constant 0 : index
    %c9 = arith.constant 9 : index
    %42 = vector.load %arg1[%c0_16, %c0_17, %c9] : memref<1x16x82xf32, #tpu.memory_space<vmem>>, vector<1x16x64xf32>
    %43 = vector.shape_cast %42 : vector<1x16x64xf32> to vector<16x64xf32>
    %c0_18 = arith.constant 0 : index
    %c0_19 = arith.constant 0 : index
    %c10 = arith.constant 10 : index
    %44 = vector.load %arg1[%c0_18, %c0_19, %c10] : memref<1x16x82xf32, #tpu.memory_space<vmem>>, vector<1x16x64xf32>
    %45 = vector.shape_cast %44 : vector<1x16x64xf32> to vector<16x64xf32>
    %cst_20 = arith.constant 0.000000e+00 : f32
    %46 = vector.shape_cast %21 : vector<1x64xi1> to vector<1x64xi1>
    %47 = vector.broadcast %46 : vector<1x64xi1> to vector<16x64xi1>
    %48 = vector.broadcast %cst_20 : f32 to vector<16x64xf32>
    %49 = arith.select %47, %45, %48 : vector<16x64xi1>, vector<16x64xf32>
    %c0_21 = arith.constant 0 : index
    %c0_22 = arith.constant 0 : index
    %c16 = arith.constant 16 : index
    %50 = vector.load %arg1[%c0_21, %c0_22, %c16] : memref<1x16x82xf32, #tpu.memory_space<vmem>>, vector<1x16x64xf32>
    %51 = vector.shape_cast %50 : vector<1x16x64xf32> to vector<16x64xf32>
    %cst_23 = arith.constant 0.000000e+00 : f32
    %52 = vector.shape_cast %19 : vector<1x64xi1> to vector<1x64xi1>
    %53 = vector.broadcast %52 : vector<1x64xi1> to vector<16x64xi1>
    %54 = vector.broadcast %cst_23 : f32 to vector<16x64xf32>
    %55 = arith.select %53, %51, %54 : vector<16x64xi1>, vector<16x64xf32>
    %c0_24 = arith.constant 0 : index
    %c0_25 = arith.constant 0 : index
    %c17 = arith.constant 17 : index
    %56 = vector.load %arg1[%c0_24, %c0_25, %c17] : memref<1x16x82xf32, #tpu.memory_space<vmem>>, vector<1x16x64xf32>
    %57 = vector.shape_cast %56 : vector<1x16x64xf32> to vector<16x64xf32>
    %c0_26 = arith.constant 0 : index
    %c0_27 = arith.constant 0 : index
    %c18 = arith.constant 18 : index
    %58 = vector.load %arg1[%c0_26, %c0_27, %c18] : memref<1x16x82xf32, #tpu.memory_space<vmem>>, vector<1x16x64xf32>
    %59 = vector.shape_cast %58 : vector<1x16x64xf32> to vector<16x64xf32>
    %cst_28 = arith.constant 0.000000e+00 : f32
    %60 = vector.shape_cast %21 : vector<1x64xi1> to vector<1x64xi1>
    %61 = vector.broadcast %60 : vector<1x64xi1> to vector<16x64xi1>
    %62 = vector.broadcast %cst_28 : f32 to vector<16x64xf32>
    %63 = arith.select %61, %59, %62 : vector<16x64xi1>, vector<16x64xf32>
    %64 = vector.extract_strided_slice %0 {offsets = [0, 0], sizes = [16, 1], strides = [1, 1]} : vector<16x9xf32> to vector<16x1xf32>
    %65 = vector.broadcast %64 : vector<16x1xf32> to vector<16x64xf32>
    %66 = arith.mulf %27, %65 : vector<16x64xf32>
    %67 = vector.extract_strided_slice %0 {offsets = [0, 1], sizes = [16, 1], strides = [1, 1]} : vector<16x9xf32> to vector<16x1xf32>
    %68 = vector.broadcast %67 : vector<16x1xf32> to vector<16x64xf32>
    %69 = arith.mulf %29, %68 : vector<16x64xf32>
    %70 = arith.addf %66, %69 : vector<16x64xf32>
    %71 = vector.extract_strided_slice %0 {offsets = [0, 2], sizes = [16, 1], strides = [1, 1]} : vector<16x9xf32> to vector<16x1xf32>
    %72 = vector.broadcast %71 : vector<16x1xf32> to vector<16x64xf32>
    %73 = arith.mulf %35, %72 : vector<16x64xf32>
    %74 = arith.addf %70, %73 : vector<16x64xf32>
    %75 = vector.extract_strided_slice %0 {offsets = [0, 3], sizes = [16, 1], strides = [1, 1]} : vector<16x9xf32> to vector<16x1xf32>
    %76 = vector.broadcast %75 : vector<16x1xf32> to vector<16x64xf32>
    %77 = arith.mulf %41, %76 : vector<16x64xf32>
    %78 = arith.addf %74, %77 : vector<16x64xf32>
    %79 = vector.extract_strided_slice %0 {offsets = [0, 4], sizes = [16, 1], strides = [1, 1]} : vector<16x9xf32> to vector<16x1xf32>
    %80 = vector.broadcast %79 : vector<16x1xf32> to vector<16x64xf32>
    %81 = arith.mulf %43, %80 : vector<16x64xf32>
    %82 = arith.addf %78, %81 : vector<16x64xf32>
    %83 = vector.extract_strided_slice %0 {offsets = [0, 5], sizes = [16, 1], strides = [1, 1]} : vector<16x9xf32> to vector<16x1xf32>
    %84 = vector.broadcast %83 : vector<16x1xf32> to vector<16x64xf32>
    %85 = arith.mulf %49, %84 : vector<16x64xf32>
    %86 = arith.addf %82, %85 : vector<16x64xf32>
    %87 = vector.extract_strided_slice %0 {offsets = [0, 6], sizes = [16, 1], strides = [1, 1]} : vector<16x9xf32> to vector<16x1xf32>
    %88 = vector.broadcast %87 : vector<16x1xf32> to vector<16x64xf32>
    %89 = arith.mulf %55, %88 : vector<16x64xf32>
    %90 = arith.addf %86, %89 : vector<16x64xf32>
    %91 = vector.extract_strided_slice %0 {offsets = [0, 7], sizes = [16, 1], strides = [1, 1]} : vector<16x9xf32> to vector<16x1xf32>
    %92 = vector.broadcast %91 : vector<16x1xf32> to vector<16x64xf32>
    %93 = arith.mulf %57, %92 : vector<16x64xf32>
    %94 = arith.addf %90, %93 : vector<16x64xf32>
    %95 = vector.extract_strided_slice %0 {offsets = [0, 8], sizes = [16, 1], strides = [1, 1]} : vector<16x9xf32> to vector<16x1xf32>
    %96 = vector.broadcast %95 : vector<16x1xf32> to vector<16x64xf32>
    %97 = arith.mulf %63, %96 : vector<16x64xf32>
    %98 = arith.addf %94, %97 : vector<16x64xf32>
    %c0_29 = arith.constant 0 : index
    %c0_30 = arith.constant 0 : index
    %99 = vector.load %arg3[%c0_29, %c0_30] : memref<16x1xf32, #tpu.memory_space<vmem>>, vector<16x1xf32>
    %100 = vector.broadcast %99 : vector<16x1xf32> to vector<16x64xf32>
    %101 = arith.addf %98, %100 : vector<16x64xf32>
    %c0_31 = arith.constant 0 : index
    %c0_32 = arith.constant 0 : index
    %102 = vector.load %arg4[%c0_31, %c0_32] : memref<16x16xbf16, #tpu.memory_space<vmem>>, vector<16x16xbf16>
    %103 = arith.truncf %101 : vector<16x64xf32> to vector<16x64xbf16>
    %cst_33 = arith.constant dense<0.000000e+00> : vector<16x64xf32>
    %104 = tpu.matmul %102, %103, %cst_33 {dimension_numbers = #tpu.dot_dimension_numbers<[1], [0], [0], [1], [0, 0, 1, 1], [], []>} : vector<16x16xbf16>, vector<16x64xbf16>, vector<16x64xf32> -> vector<16x64xf32>
    %cst_34 = arith.constant 0.000000e+00 : f32
    %105 = vector.broadcast %cst_34 : f32 to vector<16x64xf32>
    %106 = arith.maximumf %104, %105 : vector<16x64xf32>
    %c0_35 = arith.constant 0 : index
    %c0_36 = arith.constant 0 : index
    %c0_37 = arith.constant 0 : index
    %107 = vector.load %arg5[%c0_35, %c0_36, %c0_37] : memref<1x16x64xf32, #tpu.memory_space<vmem>>, vector<1x16x64xf32>
    %108 = vector.shape_cast %107 : vector<1x16x64xf32> to vector<16x64xf32>
    %109 = vector.shape_cast %106 : vector<16x64xf32> to vector<1x16x64xf32>
    tpu.vector_store %arg5[%c0_35, %c0_36, %c0_37], %109 {strides = array<i32>} : memref<1x16x64xf32, #tpu.memory_space<vmem>>, vector<1x16x64xf32>,
    return
  }
  func.func @transform_0(%arg0: i32) -> (i32, i32, i32) {
    %c0_i32 = arith.constant 0 : i32
    %c0_i32_0 = arith.constant 0 : i32
    %c0_i32_1 = arith.constant 0 : i32
    return %arg0, %c0_i32, %c0_i32_0 : i32, i32, i32
  }
  func.func @transform_1(%arg0: i32) -> (i32, i32) {
    %c0_i32 = arith.constant 0 : i32
    %c0_i32_0 = arith.constant 0 : i32
    %c0_i32_1 = arith.constant 0 : i32
    return %c0_i32, %c0_i32_0 : i32, i32
  }
  func.func @transform_2(%arg0: i32) -> (i32, i32) {
    %c0_i32 = arith.constant 0 : i32
    %c0_i32_0 = arith.constant 0 : i32
    %c0_i32_1 = arith.constant 0 : i32
    return %c0_i32, %c0_i32_0 : i32, i32
  }
  func.func @transform_3(%arg0: i32) -> (i32, i32) {
    %c0_i32 = arith.constant 0 : i32
    %c0_i32_0 = arith.constant 0 : i32
    %c0_i32_1 = arith.constant 0 : i32
    return %c0_i32, %c0_i32_0 : i32, i32
  }
  func.func @transform_4(%arg0: i32) -> (i32, i32, i32) {
    %c0_i32 = arith.constant 0 : i32
    %c0_i32_0 = arith.constant 0 : i32
    %c0_i32_1 = arith.constant 0 : i32
    return %arg0, %c0_i32, %c0_i32_0 : i32, i32, i32
  }
}

module attributes {stable_mosaic.version = 11 : i64} {
  func.func @kernel(%arg0: i32, %arg1: memref<1x16x64xf32, #tpu.memory_space<vmem>>, %arg2: memref<4x16xbf16, #tpu.memory_space<vmem>>, %arg3: memref<64x256xf32, #tpu.memory_space<vmem>>, %arg4: memref<1x4x256xf32, #tpu.memory_space<vmem>>, %arg5: memref<1x4x256xf32, #tpu.memory_space<vmem>>, %arg6: memref<1x4x256xf32, #tpu.memory_space<vmem>>) attributes {dimension_semantics = [#tpu.dimension_semantics<parallel>], iteration_bounds = array<i64: 2>, scalar_prefetch = 0 : i64, scratch_operands = 0 : i64, tpu.core_type = #tpu.core_type<tc>, window_params = [{transform_indices = @transform_0, window_bounds = array<i64: 1, 16, 64>}, {pipeline_mode = #tpu.pipeline_mode<synchronous>, transform_indices = @transform_1, window_bounds = array<i64: 4, 16>}, {pipeline_mode = #tpu.pipeline_mode<synchronous>, transform_indices = @transform_2, window_bounds = array<i64: 64, 256>}, {transform_indices = @transform_3, window_bounds = array<i64: 1, 4, 256>}, {transform_indices = @transform_4, window_bounds = array<i64: 1, 4, 256>}, {transform_indices = @transform_5, window_bounds = array<i64: 1, 4, 256>}]} {
    %c0 = arith.constant 0 : index
    %c0_0 = arith.constant 0 : index
    %0 = vector.load %arg2[%c0, %c0_0] : memref<4x16xbf16, #tpu.memory_space<vmem>>, vector<4x16xbf16>
    %c0_1 = arith.constant 0 : index
    %c0_2 = arith.constant 0 : index
    %c0_3 = arith.constant 0 : index
    %1 = vector.load %arg1[%c0_1, %c0_2, %c0_3] : memref<1x16x64xf32, #tpu.memory_space<vmem>>, vector<1x16x64xf32>
    %2 = vector.shape_cast %1 : vector<1x16x64xf32> to vector<16x64xf32>
    %3 = arith.truncf %2 : vector<16x64xf32> to vector<16x64xbf16>
    %cst = arith.constant dense<0.000000e+00> : vector<4x64xf32>
    %4 = tpu.matmul %0, %3, %cst {dimension_numbers = #tpu.dot_dimension_numbers<[1], [0], [0], [1], [0, 0, 1, 1], [], []>} : vector<4x16xbf16>, vector<16x64xbf16>, vector<4x64xf32> -> vector<4x64xf32>
    %5 = arith.negf %4 : vector<4x64xf32>
    %6 = math.exp %5 : vector<4x64xf32>
    %cst_4 = arith.constant 1.000000e+00 : f32
    %7 = vector.broadcast %cst_4 : f32 to vector<4x64xf32>
    %8 = arith.addf %7, %6 : vector<4x64xf32>
    %9 = arith.divf %7, %8 : vector<4x64xf32>
    %c0_5 = arith.constant 0 : index
    %c0_6 = arith.constant 0 : index
    %10 = vector.load %arg3[%c0_5, %c0_6] : memref<64x256xf32, #tpu.memory_space<vmem>>, vector<64x256xf32>
    %cst_7 = arith.constant dense<0.000000e+00> : vector<4x256xf32>
    %11 = tpu.matmul %9, %10, %cst_7 {dimension_numbers = #tpu.dot_dimension_numbers<[1], [0], [0], [1], [0, 0, 1, 1], [], []>} : vector<4x64xf32>, vector<64x256xf32>, vector<4x256xf32> -> vector<4x256xf32>
    %c0_8 = arith.constant 0 : index
    %c0_9 = arith.constant 0 : index
    %c0_10 = arith.constant 0 : index
    %12 = vector.load %arg4[%c0_8, %c0_9, %c0_10] : memref<1x4x256xf32, #tpu.memory_space<vmem>>, vector<1x4x256xf32>
    %13 = vector.shape_cast %12 : vector<1x4x256xf32> to vector<4x256xf32>
    %14 = arith.mulf %13, %11 : vector<4x256xf32>
    %c0_11 = arith.constant 0 : index
    %c0_12 = arith.constant 0 : index
    %c0_13 = arith.constant 0 : index
    %15 = vector.load %arg5[%c0_11, %c0_12, %c0_13] : memref<1x4x256xf32, #tpu.memory_space<vmem>>, vector<1x4x256xf32>
    %16 = vector.shape_cast %15 : vector<1x4x256xf32> to vector<4x256xf32>
    %17 = arith.addf %14, %16 : vector<4x256xf32>
    %c0_14 = arith.constant 0 : index
    %c0_15 = arith.constant 0 : index
    %c0_16 = arith.constant 0 : index
    %18 = vector.load %arg6[%c0_14, %c0_15, %c0_16] : memref<1x4x256xf32, #tpu.memory_space<vmem>>, vector<1x4x256xf32>
    %19 = vector.shape_cast %18 : vector<1x4x256xf32> to vector<4x256xf32>
    %20 = vector.shape_cast %17 : vector<4x256xf32> to vector<1x4x256xf32>
    tpu.vector_store %arg6[%c0_14, %c0_15, %c0_16], %20 {strides = array<i32>} : memref<1x4x256xf32, #tpu.memory_space<vmem>>, vector<1x4x256xf32>,
    return
  }
  func.func @transform_0(%arg0: i32) -> (i32, i32, i32) {
    %c0_i32 = arith.constant 0 : i32
    %c0_i32_0 = arith.constant 0 : i32
    %c0_i32_1 = arith.constant 0 : i32
    return %arg0, %c0_i32, %c0_i32_0 : i32, i32, i32
  }
  func.func @transform_1(%arg0: i32) -> (i32, i32) {
    %c0_i32 = arith.constant 0 : i32
    %c0_i32_0 = arith.constant 0 : i32
    %c0_i32_1 = arith.constant 0 : i32
    return %c0_i32, %c0_i32_0 : i32, i32
  }
  func.func @transform_2(%arg0: i32) -> (i32, i32) {
    %c0_i32 = arith.constant 0 : i32
    %c0_i32_0 = arith.constant 0 : i32
    %c0_i32_1 = arith.constant 0 : i32
    return %c0_i32, %c0_i32_0 : i32, i32
  }
  func.func @transform_3(%arg0: i32) -> (i32, i32, i32) {
    %c0_i32 = arith.constant 0 : i32
    %c0_i32_0 = arith.constant 0 : i32
    %c0_i32_1 = arith.constant 0 : i32
    return %arg0, %c0_i32, %c0_i32_0 : i32, i32, i32
  }
  func.func @transform_4(%arg0: i32) -> (i32, i32, i32) {
    %c0_i32 = arith.constant 0 : i32
    %c0_i32_0 = arith.constant 0 : i32
    %c0_i32_1 = arith.constant 0 : i32
    return %arg0, %c0_i32, %c0_i32_0 : i32, i32, i32
  }
  func.func @transform_5(%arg0: i32) -> (i32, i32, i32) {
    %c0_i32 = arith.constant 0 : i32
    %c0_i32_0 = arith.constant 0 : i32
    %c0_i32_1 = arith.constant 0 : i32
    return %arg0, %c0_i32, %c0_i32_0 : i32, i32, i32
  }
}

</mosaic_0001>

<bundles_post_ra>
// kernel: _lambda_.9
= control target key start
LH: loop header
LB: loop body
LE: loop exit
PB: predicated region body
PF: predicated region fallthrough
CT: control target
= control target key end

     0   :  { %s715_s15 = smov 0   ;;  %s873_s0 = inlined_call_operand.vmem [shape: f32[2,4,290], index: 0, kind: input, shape index: {}]   ;;  %s874_s1 = inlined_call_operand.vmem [shape: bf16[4,36], index: 1, kind: input, shape index: {}]   ;;  %s875_s2 = inlined_call_operand.vmem [shape: f32[4,1], index: 2, kind: input, shape index: {}]   ;;  %s876_s3 = inlined_call_operand.vmem [shape: f32[2,4,256], index: 3, kind: input, shape index: {}]   ;;  %s877_s4 = inlined_call_operand.vmem [shape: f32[2,8,256], index: 4, kind: output, shape index: {}]  }
   0x1 LB: > { %s597_s16 = sadd.s32 4294967295, %s679_s15   ;;  %p601_p0 = scmp.ge.s32.totalorder %s679_s15, 1  ;;  %s679_s15 = sphi %s715_s15, %s14_s15  }
   0x2   : > { %p172_p1 = scmp.lt.s32.totalorder %s679_s15, 3 }
   0x4   : > { %p173_p2 = pnand %p601_p0, %p172_p1 }
   0x5   : > { %p203_p3 = scmp.lt.s32.totalorder (!%p173_p2), %s597_s16, 1  ;;  %s681_s21 = smov (!%p173_p2), 112  }
   0x6   : > { %176 = sbr.rel (%p173_p2) target bundleno = 356 (0x164), region = 36  ;;  %s682_s22 = smov (!%p173_p2), 126  }
   0x7   : > { %s683_s23 = smov (!%p173_p2), 110   ;;  %s684_s24 = smov (!%p173_p2), 96  }
   0x8   : > { %s685_s25 = smov (!%p173_p2), 94   ;;  %s686_s26 = smov (!%p173_p2), 111  }
   0x9   : > { %s687_s5 = smov (!%p173_p2), 95   ;;  %s688_s6 = smov (!%p173_p2), 127  }
   0xb   : > { %s887_s16 = smov (!%p203_p3, %s597_s16), 1  ;;  %v219_v45 = vlaneseq  ;;  %vm375_vm0 = vcmask 769024   ;;  %vm473_vm3 = vcmask 1041408   ;;  %vm329_vm4 = vcmask 900096  }
   0xc   : > { %s613_s17 = smul.u32 12, %s887_s16  ;;  %s611_s27 = sshll.u32 %s887_s16, 3  ;;  %vm306_vm5 = vcmask 916480   ;;  %vm352_vm6 = vcmask 785408   ;;  %vm442_vm7 = vcmask 777216   ;;  %vm283_vm9 = vcmask 1031168  }
   0xd   : > { %s212_s30 = scalar_lea.vmem %s876_s3, %s611_s27  ;;  %v220_v48 = vand.u32 127, %v219_v45  ;;  %vm418_vm10 = vcmask 908288   ;;  %vm395_vm11 = vcmask 1039360   ;;  %vm447_vm12 = vcmask 1043456   ;;  %s612_s11 = sshll.u32 %s887_s16, 4 }
   0xe   : > { %s729_s20 = scalar_lea.vmem %s873_s0, %s613_s17  ;;  %v758_v35 = vld [vmem:[%s212_s30] sm:$0xff]  ;;  %vm469_vm14 = vcmask 293888   ;;  %s217_s14 = scalar_lea.vmem %s877_s4, %s612_s11 }
   0xf   : > { %v264_v0 = vld [vmem:[%s729_s20 + $0x8] sm:$0xf]  ;;  %v733_v1 = vld [vmem:[%s729_s20] sm:$0xff]  ;;  %v773_v50 = vadd.s32 128, %v220_v48  ;;  %v226_v55 = vand.u32 15, %v220_v48 }
  0x10   : > { %273 = vst [vmem:[#allocation1 + $0x10] ss:$2 sm:$0xff] %v264_v0  ;;  %v291_v2 = vld [vmem:[%s729_s20 + $0x8] sm:$0xf] }
  0x11   : > { %256 = vst [vmem:[#allocation1] ss:$2 sm:$0xff] %v733_v1  ;;  %v314_v6 = vld [vmem:[%s729_s20 + $0x8] sm:$0xf]  ;;  %v233_v51 = vand.u32 15, %v773_v50  ;;  %vm784_vm2 = vcmp.ne.s32.totalorder %v226_v55, 15 }
  0x12   : > { %v337_v11 = vld [vmem:[%s729_s20 + $0x8] sm:$0xf]  ;;  %vm805_vm8 = vcmp.ne.s32.totalorder %v226_v55, 0 }
  0x13   : > { %v360_v16 = vld [vmem:[%s729_s20 + $0x8] sm:$0xf]  ;;  %vm780_vm1 = vcmp.ne.s32.totalorder %v233_v51, 15  ;;  %vm838_vm13 = vcmp.ne.s32.totalorder %v233_v51, 0  ;;  %v462_v51 = vld [vmem:[%s874_s1] sm:$0x3] }
  0x17   : > { %v276_v3 = vld.sshfl [vmem:[#allocation1 + $0x10] sm:$0xff pattern:$0x75316420] }
  0x18   : > { %296 = vst [vmem:[#allocation1 + $0x10] ss:$2 sm:$0xff] %v291_v2  ;;  %v737_v4 = vld.sshfl [vmem:[#allocation1] sm:$0xff pattern:$0x75316420] }
  0x19   : > { %v739_v5 = vld.sshfl [vmem:[#allocation1 + $0x8] sm:$0xff pattern:$0x75316420] }
  0x1a   : > { %271 = vst [vmem:[#allocation1] ss:$2 sm:$0xff] %v733_v1 }
  0x1f   : > { %v299_v7 = vld.sshfl [vmem:[#allocation1 + $0x10] sm:$0xff pattern:$0x75316420] }
  0x20   : > { %319 = vst [vmem:[#allocation1 + $0x10] ss:$2 sm:$0xff] %v314_v6  ;;  %304 = vrot.lane.b32.xlu2 %v299_v7, %s681_s21 }
  0x21   : > { %v274_v8 = vld.sshfl [vmem:[#allocation1] sm:$0xff pattern:$0x75316420]  ;;  %v275_v9 = vld.sshfl [vmem:[#allocation1 + $0x8] sm:$0xff pattern:$0x75316420] }
  0x22   : > { %v631_v10 = vpack.i.bf16 %v275_v9, %v274_v8  ;;  %294 = vst [vmem:[#allocation1] ss:$2 sm:$0xff] %v733_v1  ;;  %v463_v9 = vld [vmem:[%s875_s2] sm:$0xf] }
  0x24   : > { %632 = vrot.lane.b32.xlu0 %v631_v10, %s682_s22  ;;  %v689_v10 = vmov 0  }
  0x25   : > { %671 = vset.pattern.permute.xlu1 %v689_v10  ;;  %672 = vset.pattern.permute.xlu0 %v689_v10 }
  0x27   : > { %v322_v12 = vld.sshfl [vmem:[#allocation1 + $0x10] sm:$0xff pattern:$0x75316420] }
  0x28   : > { %327 = vrot.lane.b32.xlu1 %v322_v12, %s683_s23  ;;  %342 = vst [vmem:[#allocation1 + $0x10] ss:$2 sm:$0xff] %v337_v11 }
  0x29   : > { %v297_v13 = vld.sshfl [vmem:[#allocation1] sm:$0xff pattern:$0x75316420]  ;;  %v298_v14 = vld.sshfl [vmem:[#allocation1 + $0x8] sm:$0xff pattern:$0x75316420] }
  0x2a   : > { %317 = vst [vmem:[#allocation1] ss:$2 sm:$0xff] %v733_v1  ;;  %v636_v15 = vpack.i.bf16 %v298_v14, %v297_v13 }
  0x2f   : > { %v345_v17 = vld.sshfl [vmem:[#allocation1 + $0x10] sm:$0xff pattern:$0x75316420] }
  0x30   : > { %365 = vst [vmem:[#allocation1 + $0x10] ss:$2 sm:$0xff] %v360_v16  ;;  %637 = vrot.lane.b32.xlu1 %v636_v15, %s681_s21  ;;  %350 = vrot.lane.b32.xlu2 %v345_v17, %s684_s24 }
  0x31   : > { %v320_v18 = vld.sshfl [vmem:[#allocation1] sm:$0xff pattern:$0x75316420]  ;;  %v321_v19 = vld.sshfl [vmem:[#allocation1 + $0x8] sm:$0xff pattern:$0x75316420] }
  0x32   : > { %340 = vst [vmem:[#allocation1] ss:$2 sm:$0xff] %v733_v1  ;;  %v641_v20 = vpack.i.bf16 %v321_v19, %v320_v18 }
  0x37   : > { %v368_v21 = vld.sshfl [vmem:[#allocation1 + $0x10] sm:$0xff pattern:$0x75316420] }
  0x38   : > { %385 = vst [vmem:[#allocation1 + $0x11] ss:$2 sm:$0xff] %v264_v0  ;;  %373 = vrot.lane.b32.xlu0 %v368_v21, %s685_s25  ;;  %642 = vrot.lane.b32.xlu1 %v641_v20, %s683_s23 }
  0x39   : > { %v343_v22 = vld.sshfl [vmem:[#allocation1] sm:$0xff pattern:$0x75316420]  ;;  %v344_v23 = vld.sshfl [vmem:[#allocation1 + $0x8] sm:$0xff pattern:$0x75316420] }
  0x3a   : > { %363 = vst [vmem:[#allocation1] ss:$2 sm:$0xff] %v733_v1  ;;  %v646_v24 = vpack.i.bf16 %v344_v23, %v343_v22 }
  0x3c   : > { %647 = vrot.lane.b32.xlu2 %v646_v24, %s684_s24 }
  0x3f   : > { %v388_v25 = vld.sshfl [vmem:[#allocation1 + $0x10] sm:$0xff pattern:$0x75316420] }
  0x40   : > { %408 = vst [vmem:[#allocation1 + $0x10] ss:$2 sm:$0xff] %v314_v6 }
  0x41   : > { %v366_v26 = vld.sshfl [vmem:[#allocation1] sm:$0xff pattern:$0x75316420]  ;;  %v367_v27 = vld.sshfl [vmem:[#allocation1 + $0x8] sm:$0xff pattern:$0x75316420] }
  0x42   : > { %v651_v28 = vpack.i.bf16 %v367_v27, %v366_v26  ;;  %383 = vst [vmem:[#allocation1 + $0x1] ss:$2 sm:$0xff] %v733_v1 }
  0x44   : > { %652 = vrot.lane.b32.xlu0 %v651_v28, %s685_s25 }
  0x47   : > { %v411_v29 = vld.sshfl [vmem:[#allocation1 + $0x10] sm:$0xff pattern:$0x75316420] }
  0x48   : > { %432 = vst [vmem:[#allocation1 + $0x11] ss:$2 sm:$0xff] %v360_v16  ;;  %416 = vrot.lane.b32.xlu1 %v411_v29, %s686_s26 }
  0x49   : > { %v386_v30 = vld.sshfl [vmem:[#allocation1] sm:$0xff pattern:$0x75316420]  ;;  %v387_v31 = vld.sshfl [vmem:[#allocation1 + $0x8] sm:$0xff pattern:$0x75316420] }
  0x4a   : > { %406 = vst [vmem:[#allocation1] ss:$2 sm:$0xff] %v733_v1  ;;  %v666_v40 = vpack.i.bf16 %v387_v31, %v386_v30 }
  0x4f   : > { %v435_v36 = vld.sshfl [vmem:[#allocation1 + $0x10] sm:$0xff pattern:$0x75316420] }
  0x50   : > { %281 = vrot.lane.b32.xlu1 %v276_v3, %s682_s22 }
  0x51   : > { %v409_v32 = vld.sshfl [vmem:[#allocation1] sm:$0xff pattern:$0x75316420]  ;;  %v410_v33 = vld.sshfl [vmem:[#allocation1 + $0x8] sm:$0xff pattern:$0x75316420] }
  0x52   : > { %v656_v34 = vpack.i.bf16 %v410_v33, %v409_v32  ;;  %430 = vst [vmem:[#allocation1 + $0x1] ss:$2 sm:$0xff] %v733_v1 }
  0x54   : > { %657 = vrot.lane.b32.xlu0 %v656_v34, %s686_s26 }
  0x58   : > { %466 = vperm.xlu1 %671, %v463_v9  }
  0x59   : > { %v433_v37 = vld.sshfl [vmem:[#allocation1] sm:$0xff pattern:$0x75316420]  ;;  %v434_v38 = vld.sshfl [vmem:[#allocation1 + $0x8] sm:$0xff pattern:$0x75316420] }
  0x5a   : > { %v661_v39 = vpack.i.bf16 %v434_v38, %v433_v37  ;;  %508 = vst [vmem:[#allocation1] ss:$2 sm:$0xff] %v758_v35 }
  0x5c   : > { %440 = vrot.lane.b32.xlu0 %v435_v36, %s687_s5  ;;  %662 = vrot.lane.b32.xlu2 %v661_v39, %s687_s5  ;;  %v261_v39 = vsel %vm805_vm8, %v737_v4, 0.0 }
  0x61   : > { %v509_v10 = vld.sshfl [vmem:[#allocation1] sm:$0xff pattern:$0x75316420] }
  0x64   : > { %393 = vrot.lane.b32.xlu0 %v388_v25, %s688_s6  ;;  %667 = vrot.lane.b32.xlu2 %v666_v40, %s688_s6 }
  0x7a   : > { %v761_v41 = vpop.permute.xlu2 %304 }
  0x8a   : > { %v765_v43 = vpop.permute.xlu2 %350 }
  0x96   : > { %v763_v42 = vpop.permute.xlu0 %632  ;;  %v769_v47 = vpop.permute.xlu2 %647 }
  0x97   : > { %v649_v7 = vunpack.i.l.bf16 %v769_v47  ;;  %v650_v13 = vunpack.i.h.bf16 %v769_v47  ;;  %v635_v21 = vunpack.i.h.bf16 %v763_v42  ;;  %v634_v22 = vunpack.i.l.bf16 %v763_v42 }
  0x99   : > { %v353_v18 = vsel %vm352_vm6, %v649_v7, %v650_v13  ;;  %v284_v37 = vsel %vm283_vm9, %v634_v22, %v635_v21 }
  0x9a   : > { %v767_v44 = vpop.permute.xlu1 %327  ;;  %v357_v27 = vsel %vm805_vm8, %v353_v18, 0.0 }
  0xa2   : > { %v771_v49 = vpop.permute.xlu1 %637 }
  0xa3   : > { %v640_v11 = vunpack.i.h.bf16 %v771_v49  ;;  %v639_v12 = vunpack.i.l.bf16 %v771_v49  ;;  %v354_v49 = vsel %vm352_vm6, %v650_v13, %v765_v43 }
  0xa4   : > { %v358_v43 = vsel %vm838_vm13, %v354_v49, 0.0 }
  0xa5   : > { %v307_v23 = vsel %vm306_vm5, %v639_v12, %v640_v11 }
  0xa6   : > { %v311_v33 = vsel %vm805_vm8, %v307_v23, 0.0 }
  0xa7   : > { %v402_v45 = vrot.slane %v311_v33, 4 }
  0xaa   : > { %v374_v46 = vpop.permute.xlu0 %373  ;;  %v643_v63 = vpop.permute.xlu1 %642 }
  0xab   : > { %v644_v2 = vunpack.i.l.bf16 %v643_v63  ;;  %v645_v8 = vunpack.i.h.bf16 %v643_v63 }
  0xad   : > { %v330_v14 = vsel %vm329_vm4, %v644_v2, %v645_v8  ;;  %v331_v34 = vsel %vm329_vm4, %v645_v8, %v767_v44  ;;  %v288_v44 = vsel %vm784_vm2, %v284_v37, 0.0 }
  0xae   : > { %v334_v19 = vsel %vm784_vm2, %v330_v14, 0.0 }
  0xaf   : > { %v425_v29 = vrot.slane %v334_v19, 4 }
  0xb6   : > { %v653_v52 = vpop.permute.xlu0 %652  ;;  %v776_v56 = vpop.permute.xlu2 %662 }
  0xb7   : > { %v655_v53 = vunpack.i.h.bf16 %v653_v52  ;;  %v654_v54 = vunpack.i.l.bf16 %v653_v52  ;;  %v665_v15 = vunpack.i.h.bf16 %v776_v56  ;;  %v664_v16 = vunpack.i.l.bf16 %v776_v56 }
  0xb9   : > { %v377_v58 = vsel %vm375_vm0, %v655_v53, %v374_v46  ;;  %v376_v60 = vsel %vm375_vm0, %v654_v54, %v655_v53  ;;  %v443_v28 = vsel %vm442_vm7, %v664_v16, %v665_v15  ;;  %v335_v46 = vsel %vm780_vm1, %v331_v34, 0.0 }
  0xba   : > { %v381_v61 = vsel %vm780_vm1, %v377_v58, 0.0  ;;  %v380_v62 = vsel %vm784_vm2, %v376_v60, 0.0  ;;  %v417_v24 = vpop.permute.xlu1 %416  ;;  %v454_v36 = vsel %vm447_vm12, %v357_v27, %v443_v28  ;;  %v426_v52 = vrot.slane %v335_v46, 4 }
  0xbb   : > { %v461_v0 = vpack.c.bf16 %v381_v61, %v381_v61  ;;  %v460_v1 = vpack.c.bf16 %v380_v62, %v380_v62  ;;  %v450_v54 = vsel %vm447_vm12, %v288_v44, %v402_v45  ;;  %v308_v60 = vsel %vm306_vm5, %v640_v11, %v761_v41  ;;  %v510_v11 = vld.sshfl [vmem:[#allocation1 + $0x8] sm:$0xff pattern:$0x75316420] }
  0xbc   : > { %515 = vst [vmem:[#allocation1] ss:$2 sm:$0xff] %v758_v35 }
  0xbd   : > { %v478_v3 = vsel %vm473_vm3, %v461_v0, 0  ;;  %v475_v6 = vsel %vm473_vm3, %v460_v1, 0  ;;  %v312_v0 = vsel %vm838_vm13, %v308_v60, 0.0  ;;  %v262_v1 = vsel %vm838_vm13, %v739_v5, 0.0 }
  0xbe   : > { %498 = vmatpush.bf16.msra.mxu1 %v478_v3  ;;  %485 = vmatpush.bf16.msra.mxu0 %v475_v6  ;;  %v668_v17 = vpop.permute.xlu2 %667  ;;  %v403_v3 = vrot.slane %v312_v0, 4 }
  0xbf   : > { %v670_v25 = vunpack.i.h.bf16 %v668_v17  ;;  %v669_v26 = vunpack.i.l.bf16 %v668_v17 }
  0xc1   : > { %v396_v40 = vsel %vm395_vm11, %v669_v26, %v670_v25 }
  0xc2   : > { %v448_v48 = vsel %vm447_vm12, %v261_v39, %v396_v40  ;;  %v282_v56 = vpop.permute.xlu1 %281 }
  0xc3   : > { %v456_v59 = vpack.c.bf16 %v450_v54, %v448_v48  ;;  %v285_v63 = vsel %vm283_vm9, %v635_v21, %v282_v56  ;;  %v516_v14 = vld.sshfl [vmem:[#allocation1] sm:$0xff pattern:$0x75316420]  ;;  %v517_v21 = vld.sshfl [vmem:[#allocation1 + $0x8] sm:$0xff pattern:$0x75316420] }
  0xc4   : > { %v289_v41 = vsel %vm780_vm1, %v285_v63, 0.0 }
  0xc5   : > { %v451_v8 = vsel %vm447_vm12, %v289_v41, %v403_v3 }
  0xc6   : > { %v658_v30 = vpop.permute.xlu0 %657 }
  0xc7   : > { %v660_v31 = vunpack.i.h.bf16 %v658_v30  ;;  %v659_v32 = vunpack.i.l.bf16 %v658_v30 }
  0xc9   : > { %v419_v38 = vsel %vm418_vm10, %v659_v32, %v660_v31  ;;  %v420_v4 = vsel %vm418_vm10, %v660_v31, %v417_v24 }
  0xca   : > { %v452_v42 = vsel %vm447_vm12, %v419_v38, %v425_v29  ;;  %v453_v61 = vsel %vm447_vm12, %v420_v4, %v426_v52  ;;  %v467_v57 = vpop.permute.xlu1 %466 }
  0xcb   : > { %v458_v47 = vpack.c.bf16 %v454_v36, %v452_v42 }
  0xcd   : > { %486 = vmatpush.bf16.msra.mxu0 %v458_v47 }
  0xce   : > { %v441_v53 = vpop.permute.xlu0 %440 }
  0xcf   : > { %v444_v58 = vsel %vm442_vm7, %v665_v15, %v441_v53 }
  0xd0   : > { %v455_v62 = vsel %vm447_vm12, %v358_v43, %v444_v58 }
  0xd1   : > { %487 = vmatpush.bf16.msra.mxu0 %v456_v59  ;;  %v459_v50 = vpack.c.bf16 %v455_v62, %v453_v61 }
  0xd3   : > { %499 = vmatpush.bf16.msra.mxu1 %v459_v50 }
  0xd4   : > { %607 = vmatmul.msk.bf16.vlgmr.msra.gmra.mxu0 %vm469_vm14, %v462_v51 }
  0xd6   : > { %v394_v2 = vpop.permute.xlu0 %393 }
  0xd7   : > { %v397_v6 = vsel %vm395_vm11, %v670_v25, %v394_v2 }
  0xd8   : > { %v449_v7 = vsel %vm447_vm12, %v262_v1, %v397_v6 }
  0xd9   : > { %v457_v9 = vpack.c.bf16 %v451_v8, %v449_v7 }
  0xdb   : > { %500 = vmatpush.bf16.msra.mxu1 %v457_v9 }
  0xde   : > { %608 = vmatmul.msk.bf16.vlgmr.msra.gmra.mxu1 %vm469_vm14, %v462_v51 }
 0x151   : > { %v489_v12 = vpop.f32.mrf.mxu0 }
 0x152   : > { %v490_v13 = vadd.f32 %v489_v12, %v467_v57 }
 0x154   : > { %v513_v5 = vadd.f32 %v509_v10, %v490_v13 }
 0x156   : > { %v522_v15 = vrot.slane %v513_v5, 4 }
 0x158   : > { %v526_v16 = vsel %vm447_vm12, %v516_v14, %v522_v15 }
 0x159   : > { %v491_v17 = vpop.f32.mrf.mxu0  ;;  %528 = vst [vmem:[%s217_s14] sm:$0xff] %v526_v16 }
 0x15b   : > { %v502_v18 = vpop.f32.mrf.mxu1 }
 0x15c   : > { %v503_v19 = vadd.f32 %v502_v18, %v467_v57 }
 0x15e   : > { %v514_v20 = vadd.f32 %v510_v11, %v503_v19 }
 0x160   : > { %v523_v35 = vrot.slane %v514_v20, 4 }
 0x162   : > { %v527_v22 = vsel %vm447_vm12, %v517_v21, %v523_v35 }
 0x163   : > { %529 = vst [vmem:[%s217_s14 + $0x8] sm:$0xff] %v527_v22  ;;  %v504_v23 = vpop.f32.mrf.mxu1 }
 0x164 PF: > { %s14_s15 = sadd.s32 1, %s679_s15  }
 0x165   : > { %p11_p4 = scmp.ge.s32.totalorder %s14_s15, 4  }
 0x167   :  { %13 = sbr.rel (!%p11_p4) target bundleno = 1 (0x1), region = 79 }

// kernel: _lambda_.8
= control target key start
LH: loop header
LB: loop body
LE: loop exit
PB: predicated region body
PF: predicated region fallthrough
CT: control target
= control target key end

     0   :  { %s636_s12 = smov 0   ;;  %s775_s0 = inlined_call_operand.vmem [shape: f32[2,4,290], index: 0, kind: input, shape index: {}]   ;;  %s776_s1 = inlined_call_operand.vmem [shape: bf16[4,36], index: 1, kind: input, shape index: {}]   ;;  %s777_s2 = inlined_call_operand.vmem [shape: f32[4,1], index: 2, kind: input, shape index: {}]   ;;  %s778_s3 = inlined_call_operand.vmem [shape: f32[2,4,256], index: 3, kind: output, shape index: {}]  }
   0x1 LB: > { %s526_s13 = sadd.s32 4294967295, %s605_s12   ;;  %p530_p0 = scmp.ge.s32.totalorder %s605_s12, 1  ;;  %s605_s12 = sphi %s636_s12, %s13_s12  }
   0x2   : > { %p137_p1 = scmp.lt.s32.totalorder %s605_s12, 3 }
   0x4   : > { %p138_p2 = pnand %p530_p0, %p137_p1 }
   0x5   : > { %p161_p3 = scmp.lt.s32.totalorder (!%p138_p2), %s526_s13, 1  ;;  %s607_s18 = smov (!%p138_p2), 126  }
   0x6   : > { %141 = sbr.rel (%p138_p2) target bundleno = 363 (0x16b), region = 32  ;;  %s608_s19 = smov (!%p138_p2), 112  }
   0x7   : > { %s609_s20 = smov (!%p138_p2), 110   ;;  %s610_s21 = smov (!%p138_p2), 96  }
   0x8   : > { %s611_s22 = smov (!%p138_p2), 94   ;;  %s612_s23 = smov (!%p138_p2), 127  }
   0x9   : > { %s613_s24 = smov (!%p138_p2), 111   ;;  %s614_s25 = smov (!%p138_p2), 95  }
   0xb   : > { %s788_s13 = smov (!%p161_p3, %s526_s13), 1  ;;  %v172_v41 = vlaneseq  ;;  %vm328_vm0 = vcmask 769024   ;;  %vm426_vm2 = vcmask 1041408   ;;  %vm259_vm4 = vcmask 916480  }
   0xc   : > { %s539_s14 = smul.u32 12, %s788_s13  ;;  %vm282_vm5 = vcmask 900096   ;;  %vm305_vm6 = vcmask 785408   ;;  %vm236_vm8 = vcmask 1031168   ;;  %vm371_vm9 = vcmask 908288   ;;  %s538_s30 = sshll.u32 %s788_s13, 3 }
   0xd   : > { %v676_v44 = vand.u32 127, %v172_v41  ;;  %vm395_vm10 = vcmask 777216   ;;  %vm348_vm11 = vcmask 1039360   ;;  %vm400_vm12 = vcmask 1043456   ;;  %s170_s6 = scalar_lea.vmem %s778_s3, %s538_s30 }
   0xe   : > { %s165_s17 = scalar_lea.vmem %s775_s0, %s539_s14  ;;  %vm422_vm14 = vcmask 293888  }
   0xf   : > { %v650_v0 = vld [vmem:[%s165_s17] sm:$0xff]  ;;  %v217_v1 = vld [vmem:[%s165_s17 + $0x8] sm:$0xf]  ;;  %v174_v45 = vadd.s32 128, %v676_v44  ;;  %v179_v54 = vand.u32 15, %v676_v44 }
  0x10   : > { %209 = vst [vmem:[#allocation1] ss:$2 sm:$0xff] %v650_v0  ;;  %v244_v2 = vld [vmem:[%s165_s17 + $0x8] sm:$0xf] }
  0x11   : > { %226 = vst [vmem:[#allocation1 + $0x10] ss:$2 sm:$0xff] %v217_v1  ;;  %v267_v6 = vld [vmem:[%s165_s17 + $0x8] sm:$0xf]  ;;  %v186_v50 = vand.u32 15, %v174_v45  ;;  %vm690_vm3 = vcmp.ne.s32.totalorder %v179_v54, 15 }
  0x12   : > { %v290_v11 = vld [vmem:[%s165_s17 + $0x8] sm:$0xf]  ;;  %vm740_vm13 = vcmp.ne.s32.totalorder %v179_v54, 0 }
  0x13   : > { %v313_v16 = vld [vmem:[%s165_s17 + $0x8] sm:$0xf]  ;;  %vm681_vm1 = vcmp.ne.s32.totalorder %v186_v50, 15  ;;  %vm709_vm7 = vcmp.ne.s32.totalorder %v186_v50, 0 }
  0x17   : > { %v653_v3 = vld.sshfl [vmem:[#allocation1] sm:$0xff pattern:$0x75316420]  ;;  %v655_v4 = vld.sshfl [vmem:[#allocation1 + $0x8] sm:$0xff pattern:$0x75316420] }
  0x18   : > { %224 = vst [vmem:[#allocation1] ss:$2 sm:$0xff] %v650_v0  ;;  %v229_v5 = vld.sshfl [vmem:[#allocation1 + $0x10] sm:$0xff pattern:$0x75316420] }
  0x19   : > { %249 = vst [vmem:[#allocation1 + $0x10] ss:$2 sm:$0xff] %v244_v2 }
  0x1f   : > { %v228_v7 = vld.sshfl [vmem:[#allocation1 + $0x8] sm:$0xff pattern:$0x75316420]  ;;  %v658_v8 = vld.sshfl [vmem:[#allocation1] sm:$0xff pattern:$0x75316420] }
  0x20   : > { %v557_v9 = vpack.i.bf16 %v229_v5, %v228_v7  ;;  %247 = vst [vmem:[#allocation1] ss:$2 sm:$0xff] %v650_v0  ;;  %v252_v10 = vld.sshfl [vmem:[#allocation1 + $0x10] sm:$0xff pattern:$0x75316420] }
  0x21   : > { %272 = vst [vmem:[#allocation1 + $0x10] ss:$2 sm:$0xff] %v267_v6 }
  0x22   : > { %558 = vrot.lane.b32.xlu0 %v557_v9, %s607_s18  ;;  %v416_v9 = vld [vmem:[%s777_s2] sm:$0xf] }
  0x27   : > { %v251_v12 = vld.sshfl [vmem:[#allocation1 + $0x8] sm:$0xff pattern:$0x75316420]  ;;  %v250_v13 = vld.sshfl [vmem:[#allocation1] sm:$0xff pattern:$0x75316420] }
  0x28   : > { %v275_v14 = vld.sshfl [vmem:[#allocation1 + $0x10] sm:$0xff pattern:$0x75316420]  ;;  %v562_v15 = vpack.i.bf16 %v252_v10, %v251_v12  ;;  %270 = vst [vmem:[#allocation1] ss:$2 sm:$0xff] %v650_v0  ;;  %v615_v12 = vmov 0  }
  0x29   : > { %295 = vst [vmem:[#allocation1 + $0x10] ss:$2 sm:$0xff] %v290_v11  ;;  %597 = vset.pattern.permute.xlu1 %v615_v12  ;;  %598 = vset.pattern.permute.xlu0 %v615_v12 }
  0x2a   : > { %563 = vrot.lane.b32.xlu2 %v562_v15, %s608_s19 }
  0x2f   : > { %v273_v17 = vld.sshfl [vmem:[#allocation1] sm:$0xff pattern:$0x75316420]  ;;  %v274_v18 = vld.sshfl [vmem:[#allocation1 + $0x8] sm:$0xff pattern:$0x75316420] }
  0x30   : > { %v298_v19 = vld.sshfl [vmem:[#allocation1 + $0x10] sm:$0xff pattern:$0x75316420]  ;;  %293 = vst [vmem:[#allocation1] ss:$2 sm:$0xff] %v650_v0  ;;  %v567_v20 = vpack.i.bf16 %v275_v14, %v274_v18 }
  0x31   : > { %318 = vst [vmem:[#allocation1 + $0x10] ss:$2 sm:$0xff] %v313_v16 }
  0x32   : > { %253 = vrot.lane.b32.xlu2 %v250_v13, %s608_s19  ;;  %568 = vrot.lane.b32.xlu1 %v567_v20, %s609_s20 }
  0x37   : > { %v296_v21 = vld.sshfl [vmem:[#allocation1] sm:$0xff pattern:$0x75316420]  ;;  %v297_v22 = vld.sshfl [vmem:[#allocation1 + $0x8] sm:$0xff pattern:$0x75316420] }
  0x38   : > { %316 = vst [vmem:[#allocation1] ss:$2 sm:$0xff] %v650_v0  ;;  %v321_v23 = vld.sshfl [vmem:[#allocation1 + $0x10] sm:$0xff pattern:$0x75316420]  ;;  %v572_v24 = vpack.i.bf16 %v298_v19, %v297_v22 }
  0x39   : > { %338 = vst [vmem:[#allocation1 + $0x11] ss:$2 sm:$0xff] %v217_v1 }
  0x3a   : > { %276 = vrot.lane.b32.xlu1 %v273_v17, %s609_s20  ;;  %573 = vrot.lane.b32.xlu2 %v572_v24, %s610_s21 }
  0x3f   : > { %v320_v25 = vld.sshfl [vmem:[#allocation1 + $0x8] sm:$0xff pattern:$0x75316420]  ;;  %v319_v26 = vld.sshfl [vmem:[#allocation1] sm:$0xff pattern:$0x75316420] }
  0x40   : > { %v341_v27 = vld.sshfl [vmem:[#allocation1 + $0x10] sm:$0xff pattern:$0x75316420]  ;;  %v577_v28 = vpack.i.bf16 %v321_v23, %v320_v25  ;;  %336 = vst [vmem:[#allocation1 + $0x1] ss:$2 sm:$0xff] %v650_v0 }
  0x41   : > { %361 = vst [vmem:[#allocation1 + $0x10] ss:$2 sm:$0xff] %v267_v6 }
  0x42   : > { %578 = vrot.lane.b32.xlu0 %v577_v28, %s611_s22  ;;  %299 = vrot.lane.b32.xlu2 %v296_v21, %s610_s21 }
  0x47   : > { %v339_v29 = vld.sshfl [vmem:[#allocation1] sm:$0xff pattern:$0x75316420]  ;;  %v340_v30 = vld.sshfl [vmem:[#allocation1 + $0x8] sm:$0xff pattern:$0x75316420] }
  0x48   : > { %359 = vst [vmem:[#allocation1] ss:$2 sm:$0xff] %v650_v0  ;;  %v364_v31 = vld.sshfl [vmem:[#allocation1 + $0x10] sm:$0xff pattern:$0x75316420]  ;;  %v592_v32 = vpack.i.bf16 %v341_v27, %v340_v30 }
  0x49   : > { %385 = vst [vmem:[#allocation1 + $0x11] ss:$2 sm:$0xff] %v313_v16 }
  0x4a   : > { %322 = vrot.lane.b32.xlu0 %v319_v26, %s611_s22  ;;  %593 = vrot.lane.b32.xlu2 %v592_v32, %s612_s23 }
  0x4f   : > { %v363_v33 = vld.sshfl [vmem:[#allocation1 + $0x8] sm:$0xff pattern:$0x75316420]  ;;  %v362_v34 = vld.sshfl [vmem:[#allocation1] sm:$0xff pattern:$0x75316420] }
  0x50   : > { %v582_v35 = vpack.i.bf16 %v364_v31, %v363_v33  ;;  %383 = vst [vmem:[#allocation1 + $0x1] ss:$2 sm:$0xff] %v650_v0  ;;  %v388_v36 = vld.sshfl [vmem:[#allocation1 + $0x10] sm:$0xff pattern:$0x75316420] }
  0x52   : > { %583 = vrot.lane.b32.xlu0 %v582_v35, %s613_s24 }
  0x57   : > { %v387_v37 = vld.sshfl [vmem:[#allocation1 + $0x8] sm:$0xff pattern:$0x75316420]  ;;  %v386_v39 = vld.sshfl [vmem:[#allocation1] sm:$0xff pattern:$0x75316420] }
  0x58   : > { %v587_v38 = vpack.i.bf16 %v388_v36, %v387_v37  ;;  %v215_v37 = vsel %vm709_vm7, %v655_v4, 0.0 }
  0x5a   : > { %365 = vrot.lane.b32.xlu0 %v362_v34, %s613_s24  ;;  %588 = vrot.lane.b32.xlu1 %v587_v38, %s614_s25 }
  0x62   : > { %389 = vrot.lane.b32.xlu1 %v386_v39, %s614_s25  ;;  %342 = vrot.lane.b32.xlu0 %v339_v29, %s612_s23 }
  0x6a   : > { %230 = vrot.lane.b32.xlu1 %v658_v8, %s607_s18 }
  0x72   : > { %419 = vperm.xlu1 %597, %v416_v9  }
  0x84   : > { %v670_v40 = vpop.permute.xlu2 %563 }
  0x85   : > { %v566_v1 = vunpack.i.h.bf16 %v670_v40  ;;  %v565_v2 = vunpack.i.l.bf16 %v670_v40  ;;  %v214_v40 = vsel %vm740_vm13, %v653_v3, 0.0 }
  0x87   : > { %v261_v13 = vsel %vm259_vm4, %v565_v2, %v566_v1 }
  0x88   : > { %v265_v25 = vsel %vm709_vm7, %v261_v13, 0.0 }
  0x89   : > { %v356_v34 = vrot.slane %v265_v25, 4 }
  0x8c   : > { %v672_v42 = vpop.permute.xlu2 %253 }
  0x8d   : > { %v260_v44 = vsel %vm259_vm4, %v672_v42, %v565_v2 }
  0x94   : > { %v674_v43 = vpop.permute.xlu0 %558  ;;  %v679_v46 = vpop.permute.xlu2 %573 }
  0x95   : > { %v576_v10 = vunpack.i.h.bf16 %v679_v46  ;;  %v575_v11 = vunpack.i.l.bf16 %v679_v46  ;;  %v561_v14 = vunpack.i.h.bf16 %v674_v43  ;;  %v560_v15 = vunpack.i.l.bf16 %v674_v43 }
  0x97   : > { %v307_v21 = vsel %vm305_vm6, %v575_v11, %v576_v10  ;;  %v238_v27 = vsel %vm236_vm8, %v560_v15, %v561_v14 }
  0x98   : > { %v311_v30 = vsel %vm709_vm7, %v307_v21, 0.0  ;;  %v242_v38 = vsel %vm681_vm1, %v238_v27, 0.0 }
  0x9c   : > { %v300_v61 = vpop.permute.xlu2 %299 }
  0xa4   : > { %v569_v56 = vpop.permute.xlu1 %568  ;;  %v594_v16 = vpop.permute.xlu2 %593 }
  0xa5   : > { %v571_v5 = vunpack.i.h.bf16 %v569_v56  ;;  %v570_v6 = vunpack.i.l.bf16 %v569_v56  ;;  %v596_v22 = vunpack.i.h.bf16 %v594_v16  ;;  %v595_v23 = vunpack.i.l.bf16 %v594_v16 }
  0xa7   : > { %v284_v17 = vsel %vm282_vm5, %v570_v6, %v571_v5  ;;  %v350_v39 = vsel %vm348_vm11, %v595_v23, %v596_v22 }
  0xa8   : > { %v288_v24 = vsel %vm681_vm1, %v284_v17, 0.0 }
  0xa9   : > { %v379_v33 = vrot.slane %v288_v24, 4 }
  0xac   : > { %v277_v7 = vpop.permute.xlu1 %276 }
  0xad   : > { %v283_v32 = vsel %vm282_vm5, %v277_v7, %v570_v6 }
  0xae   : > { %v287_v45 = vsel %vm690_vm3, %v283_v32, 0.0 }
  0xaf   : > { %v378_v51 = vrot.slane %v287_v45, 4 }
  0xb4   : > { %v579_v47 = vpop.permute.xlu0 %578 }
  0xb5   : > { %v581_v48 = vunpack.i.h.bf16 %v579_v47  ;;  %v580_v49 = vunpack.i.l.bf16 %v579_v47  ;;  %v306_v47 = vsel %vm305_vm6, %v300_v61, %v575_v11  ;;  %v415_v61 = vld [vmem:[%s776_s1] sm:$0x3] }
  0xb7   : > { %v330_v52 = vsel %vm328_vm0, %v580_v49, %v581_v48  ;;  %v402_v48 = vsel %vm400_vm12, %v215_v37, %v350_v39 }
  0xb8   : > { %v334_v53 = vsel %vm681_vm1, %v330_v52, 0.0 }
  0xb9   : > { %v414_v55 = vpack.c.bf16 %v334_v53, %v334_v53  ;;  %v310_v53 = vsel %vm740_vm13, %v306_v47, 0.0 }
  0xbb   : > { %v431_v58 = vsel %vm426_vm2, %v414_v55, 0 }
  0xbc   : > { %v323_v59 = vpop.permute.xlu0 %322  ;;  %451 = vmatpush.bf16.msra.mxu1 %v431_v58 }
  0xbd   : > { %v329_v60 = vsel %vm328_vm0, %v323_v59, %v580_v49  ;;  %v404_v49 = vsel %vm400_vm12, %v242_v38, %v356_v34 }
  0xbe   : > { %v333_v62 = vsel %vm690_vm3, %v329_v60, 0.0  ;;  %v410_v56 = vpack.c.bf16 %v404_v49, %v402_v48 }
  0xbf   : > { %v413_v63 = vpack.c.bf16 %v333_v62, %v333_v62  ;;  %v264_v62 = vsel %vm740_vm13, %v260_v44, 0.0 }
  0xc1   : > { %v428_v0 = vsel %vm426_vm2, %v413_v63, 0 }
  0xc2   : > { %438 = vmatpush.bf16.msra.mxu0 %v428_v0  ;;  %v355_v0 = vrot.slane %v264_v62, 4 }
  0xc4   : > { %v584_v8 = vpop.permute.xlu0 %583 }
  0xc5   : > { %v586_v19 = vunpack.i.h.bf16 %v584_v8  ;;  %v585_v20 = vunpack.i.l.bf16 %v584_v8 }
  0xc7   : > { %v373_v31 = vsel %vm371_vm9, %v585_v20, %v586_v19 }
  0xc8   : > { %v406_v41 = vsel %vm400_vm12, %v373_v31, %v379_v33 }
  0xcc   : > { %v589_v26 = vpop.permute.xlu1 %588  ;;  %v366_v35 = vpop.permute.xlu0 %365 }
  0xcd   : > { %v591_v28 = vunpack.i.h.bf16 %v589_v26  ;;  %v590_v29 = vunpack.i.l.bf16 %v589_v26  ;;  %v372_v4 = vsel %vm371_vm9, %v366_v35, %v585_v20 }
  0xce   : > { %v405_v58 = vsel %vm400_vm12, %v372_v4, %v378_v51 }
  0xcf   : > { %v397_v36 = vsel %vm395_vm10, %v590_v29, %v591_v28 }
  0xd0   : > { %v408_v43 = vsel %vm400_vm12, %v311_v30, %v397_v36 }
  0xd1   : > { %v412_v46 = vpack.c.bf16 %v408_v43, %v406_v41 }
  0xd3   : > { %452 = vmatpush.bf16.msra.mxu1 %v412_v46 }
  0xd4   : > { %v390_v52 = vpop.permute.xlu1 %389  ;;  %v343_v60 = vpop.permute.xlu0 %342 }
  0xd5   : > { %v396_v55 = vsel %vm395_vm10, %v390_v52, %v590_v29  ;;  %v349_v63 = vsel %vm348_vm11, %v343_v60, %v595_v23 }
  0xd6   : > { %v407_v59 = vsel %vm400_vm12, %v310_v53, %v396_v55  ;;  %v401_v2 = vsel %vm400_vm12, %v214_v40, %v349_v63 }
  0xd7   : > { %453 = vmatpush.bf16.msra.mxu1 %v410_v56  ;;  %v411_v54 = vpack.c.bf16 %v407_v59, %v405_v58 }
  0xd9   : > { %439 = vmatpush.bf16.msra.mxu0 %v411_v54 }
  0xda   : > { %535 = vmatmul.msk.bf16.vlgmr.msra.gmra.mxu1 %vm422_vm14, %v415_v61 }
  0xdc   : > { %v231_v42 = vpop.permute.xlu1 %230 }
  0xdd   : > { %v237_v1 = vsel %vm236_vm8, %v231_v42, %v560_v15 }
  0xde   : > { %v241_v5 = vsel %vm690_vm3, %v237_v1, 0.0 }
  0xdf   : > { %v403_v6 = vsel %vm400_vm12, %v241_v5, %v355_v0 }
  0xe0   : > { %v409_v7 = vpack.c.bf16 %v403_v6, %v401_v2 }
  0xe2   : > { %440 = vmatpush.bf16.msra.mxu0 %v409_v7 }
  0xe4   : > { %v420_v8 = vpop.permute.xlu1 %419 }
  0xe5   : > { %534 = vmatmul.msk.bf16.vlgmr.msra.gmra.mxu0 %vm422_vm14, %v415_v61 }
 0x157   : > { %v455_v9 = vpop.f32.mrf.mxu1 }
 0x158   : > { %v456_v10 = vadd.f32 %v455_v9, %v420_v8 }
 0x15a   : > { %v462_v11 = vmul.f32 0.2, %v456_v10  ;;  %vm460_vm15 = vcmp.ge.f32.partialorder %v456_v10, 0.0 }
 0x15c   : > { %v464_v12 = vsel %vm460_vm15, %v456_v10, %v462_v11 }
 0x15d   : > { %v467_v15 = vrot.slane %v464_v12, 4 }
 0x15f   : > { %v457_v3 = vpop.f32.mrf.mxu1 }
 0x162   : > { %v442_v13 = vpop.f32.mrf.mxu0 }
 0x163   : > { %v443_v14 = vadd.f32 %v442_v13, %v420_v8 }
 0x165   : > { %vm459_vm0 = vcmp.ge.f32.partialorder %v443_v14, 0.0  ;;  %v461_v16 = vmul.f32 0.2, %v443_v14 }
 0x167   : > { %v463_v57 = vsel %vm459_vm0, %v443_v14, %v461_v16 }
 0x168   : > { %v468_v17 = vsel %vm400_vm12, %v463_v57, %v467_v15 }
 0x169   : > { %470 = vst [vmem:[%s170_s6] sm:$0xff] %v468_v17 }
 0x16a   : > { %v444_v18 = vpop.f32.mrf.mxu0 }
 0x16b PF: > { %s13_s12 = sadd.s32 1, %s605_s12  }
 0x16c   : > { %p10_p4 = scmp.ge.s32.totalorder %s13_s12, 4  }
 0x16e   :  { %12 = sbr.rel (!%p10_p4) target bundleno = 1 (0x1), region = 72 }

// kernel: _lambda_.11
= control target key start
LH: loop header
LB: loop body
LE: loop exit
PB: predicated region body
PF: predicated region fallthrough
CT: control target
= control target key end

     0   :  { %s637_s15 = smov 0   ;;  %s746_s0 = inlined_call_operand.vmem [shape: f32[2,8,290], index: 0, kind: input, shape index: {}]   ;;  %s747_s1 = inlined_call_operand.vmem [shape: bf16[8,72], index: 1, kind: input, shape index: {}]   ;;  %s748_s2 = inlined_call_operand.vmem [shape: f32[8,1], index: 2, kind: input, shape index: {}]   ;;  %s749_s3 = inlined_call_operand.vmem [shape: f32[2,8,256], index: 3, kind: input, shape index: {}]   ;;  %s750_s4 = inlined_call_operand.vmem [shape: f32[2,16,256], index: 4, kind: output, shape index: {}]  }
   0x1 LB: > { %s493_s16 = sadd.s32 4294967295, %s600_s15   ;;  %p497_p0 = scmp.ge.s32.totalorder %s600_s15, 1  ;;  %s600_s15 = sphi %s637_s15, %s14_s15  }
   0x2   : > { %p172_p1 = scmp.lt.s32.totalorder %s600_s15, 3 }
   0x4   : > { %p173_p2 = pnand %p497_p0, %p172_p1 }
   0x5   : > { %p203_p3 = scmp.lt.s32.totalorder (!%p173_p2), %s493_s16, 1  ;;  %s602_s21 = smov (!%p173_p2), 96  }
   0x6   : > { %176 = sbr.rel (%p173_p2) target bundleno = 313 (0x139), region = 36  ;;  %s603_s22 = smov (!%p173_p2), 94  }
   0x7   : > { %s604_s23 = smov (!%p173_p2), 95   ;;  %s605_s24 = smov (!%p173_p2), 110  }
   0x8   : > { %s606_s25 = smov (!%p173_p2), 111   ;;  %s607_s26 = smov (!%p173_p2), 126  }
   0x9   : > { %s608_s27 = smov (!%p173_p2), 112   ;;  %s609_s28 = smov (!%p173_p2), 127  }
   0xb   : > { %s764_s16 = smov (!%p203_p3, %s493_s16), 1  ;;  %v219_v5 = vlaneseq  ;;  %vm324_vm0 = vcmask 769024   ;;  %vm359_vm2 = vcmask 777216   ;;  %vm311_vm3 = vcmask 785408   ;;  %v375_v43 = vld [vmem:[%s748_s2] sm:$0xff] }
   0xc   : > { %s533_s17 = smul.u32 24, %s764_s16  ;;  %vm385_vm4 = vcmask 1043456   ;;  %vm610_vm7 = vmmov 1   ;;  %vm348_vm10 = vcmask 908288   ;;  %vm298_vm12 = vcmask 900096   ;;  %s531_s7 = sshll.u32 %s764_s16, 4 }
   0xd   : > { %v220_v6 = vand.u32 127, %v219_v5  ;;  %v611_v47 = vmov 0   ;;  %vm337_vm15 = vcmask 1039360   ;;  %s212_s10 = scalar_lea.vmem %s749_s3, %s531_s7  ;;  %s532_s11 = sshll.u32 %s764_s16, 5 }
   0xe   : > { %s207_s20 = scalar_lea.vmem %s746_s0, %s533_s17  ;;  %592 = vset.pattern.permute.xlu1 %v611_v47  ;;  %593 = vset.pattern.permute.xlu0 %v611_v47  ;;  %s217_s14 = scalar_lea.vmem %s750_s4, %s532_s11 }
   0xf   : > { %v651_v0 = vld [vmem:[%s207_s20] sm:$0xff]  ;;  %v653_v1 = vld [vmem:[%s207_s20 + $0x8] sm:$0xff]  ;;  %v258_v3 = vld [vmem:[%s207_s20 + $0x10] sm:$0xff]  ;;  %v226_v7 = vand.u32 15, %v220_v6  ;;  %v221_v8 = vadd.s32 128, %v220_v6 }
  0x10   : > { %v557_v2 = vpack.i.bf16 %v653_v1, %v651_v0 }
  0x11   : > { %vm657_vm1 = vcmp.ne.s32.totalorder %v226_v7, 15  ;;  %v233_v16 = vand.u32 15, %v221_v8  ;;  %vm664_vm5 = vcmp.ne.s32.totalorder %v226_v7, 0 }
  0x12   : > { %558 = vrot.lane.b32.xlu1 %v557_v2, %s602_s21  ;;  %553 = vrot.lane.b32.xlu0 %v557_v2, %s603_s22  ;;  %vm679_vm8 = vmpackc.low %vm610_vm7, %vm664_vm5 }
  0x13   : > { %563 = vrot.lane.b32.xlu2 %v557_v2, %s604_s23  ;;  %vm671_vm6 = vcmp.ne.s32.totalorder %v233_v16, 15  ;;  %vm688_vm9 = vcmp.ne.s32.totalorder %v233_v16, 0  ;;  %vm506_vm13 = vmpackc.low %vm657_vm1, %vm610_vm7 }
  0x14   : > { %vm697_vm11 = vmpackc.low %vm610_vm7, %vm688_vm9 }
  0x15   : > { %vm519_vm14 = vmpackc.low %vm671_vm6, %vm610_vm7 }
  0x1a   : > { %309 = vrot.lane.b32.xlu1 %v258_v3, %s602_s21  ;;  %322 = vrot.lane.b32.xlu0 %v258_v3, %s603_s22 }
  0x1b   : > { %357 = vrot.lane.b32.xlu2 %v258_v3, %s604_s23 }
  0x22   : > { %568 = vrot.lane.b32.xlu0 %v557_v2, %s605_s24  ;;  %296 = vrot.lane.b32.xlu1 %v258_v3, %s605_s24 }
  0x23   : > { %573 = vrot.lane.b32.xlu2 %v557_v2, %s606_s25 }
  0x2a   : > { %346 = vrot.lane.b32.xlu0 %v258_v3, %s606_s25  ;;  %578 = vrot.lane.b32.xlu1 %v557_v2, %s607_s26 }
  0x2b   : > { %270 = vrot.lane.b32.xlu2 %v258_v3, %s607_s26 }
  0x32   : > { %583 = vrot.lane.b32.xlu0 %v557_v2, %s608_s27  ;;  %283 = vrot.lane.b32.xlu1 %v258_v3, %s608_s27 }
  0x33   : > { %588 = vrot.lane.b32.xlu2 %v557_v2, %s609_s28 }
  0x3a   : > { %335 = vrot.lane.b32.xlu0 %v258_v3, %s609_s28  ;;  %378 = vperm.xlu1 %592, %v375_v43  }
  0x6d   : > { %v564_v4 = vpop.permute.xlu2 %563 }
  0x6e   : > { %v566_v15 = vunpack.i.h.bf16 %v564_v4  ;;  %v565_v17 = vunpack.i.l.bf16 %v564_v4 }
  0x70   : > { %v360_v26 = vsel %vm359_vm2, %v565_v17, %v566_v15  ;;  %v374_v17 = vld [vmem:[%s747_s1] sm:$0xf] }
  0x75   : > { %v358_v9 = vpop.permute.xlu2 %357 }
  0x76   : > { %v361_v36 = vsel %vm359_vm2, %v566_v15, %v358_v9  ;;  %vm285_vm2 = vcmask 916480  }
  0x7d   : > { %v574_v32 = vpop.permute.xlu2 %573 }
  0x7e   : > { %v576_v40 = vunpack.i.h.bf16 %v574_v32  ;;  %v575_v41 = vunpack.i.l.bf16 %v574_v32 }
  0x80   : > { %v349_v50 = vsel %vm348_vm10, %v575_v41, %v576_v40 }
  0x84   : > { %v559_v10 = vpop.permute.xlu1 %558  ;;  %v554_v11 = vpop.permute.xlu0 %553 }
  0x85   : > { %v556_v12 = vunpack.i.h.bf16 %v554_v11  ;;  %v555_v13 = vunpack.i.l.bf16 %v554_v11  ;;  %v561_v18 = vunpack.i.h.bf16 %v559_v10  ;;  %v560_v19 = vunpack.i.l.bf16 %v559_v10  ;;  %v271_v51 = vpop.permute.xlu2 %270 }
  0x87   : > { %v325_v20 = vsel %vm324_vm0, %v555_v13, %v556_v12  ;;  %v312_v25 = vsel %vm311_vm3, %v560_v19, %v561_v18 }
  0x88   : > { %v329_v21 = vsel %vm657_vm1, %v325_v20, 0.0  ;;  %v504_v33 = vpack.c.bf16 %v360_v26, %v312_v25 }
  0x89   : > { %v372_v22 = vpack.c.bf16 %v329_v21, %v329_v21 }
  0x8b   : > { %v387_v24 = vsel %vm385_vm4, %v372_v22, 0 }
  0x8c   : > { %v310_v28 = vpop.permute.xlu1 %309  ;;  %v323_v29 = vpop.permute.xlu0 %322  ;;  %395 = vmatpush.bf16.msra.mxu0 %v387_v24 }
  0x8d   : > { %v326_v30 = vsel %vm324_vm0, %v556_v12, %v323_v29  ;;  %v313_v38 = vsel %vm311_vm3, %v561_v18, %v310_v28  ;;  %v589_v59 = vpop.permute.xlu2 %588  ;;  %vm272_vm0 = vcmask 1031168   ;;  %vm509_vm3 = vmpackc.low %vm664_vm5, %vm657_vm1  ;;  %vm381_vm1 = vcmask 588800  }
  0x8e   : > { %v330_v34 = vsel %vm671_vm6, %v326_v30, 0.0  ;;  %v517_v44 = vpack.c.bf16 %v361_v36, %v313_v38  ;;  %v591_v60 = vunpack.i.h.bf16 %v589_v59  ;;  %v590_v61 = vunpack.i.l.bf16 %v589_v59 }
  0x8f   : > { %v373_v35 = vpack.c.bf16 %v330_v34, %v330_v34 }
  0x90   : > { %505 = vmatpush.bf16.msk.msra.mxu0 %vm679_vm8, %v504_v33  ;;  %v338_v6 = vsel %vm337_vm15, %v590_v61, %v591_v60 }
  0x91   : > { %v390_v39 = vsel %vm385_vm4, %v373_v35, 0  ;;  %vm522_vm4 = vmpackc.low %vm688_vm9, %vm671_vm6  ;;  %v513_v13 = vpack.c.bf16 %v338_v6, %v651_v0  ;;  %v418_v0 = vld [vmem:[%s212_s10] sm:$0xff] }
  0x92   : > { %408 = vmatpush.bf16.msra.mxu1 %v390_v39  ;;  %422 = vst [vmem:[%s217_s14] sm:$0xff] %v418_v0 }
  0x94   : > { %v569_v45 = vpop.permute.xlu0 %568  ;;  %v297_v46 = vpop.permute.xlu1 %296 }
  0x95   : > { %v571_v48 = vunpack.i.h.bf16 %v569_v45  ;;  %v570_v49 = vunpack.i.l.bf16 %v569_v45 }
  0x96   : > { %518 = vmatpush.bf16.msk.msra.mxu1 %vm697_vm11, %v517_v44 }
  0x97   : > { %v299_v52 = vsel %vm298_vm12, %v570_v49, %v571_v48  ;;  %v300_v56 = vsel %vm298_vm12, %v571_v48, %v297_v46 }
  0x98   : > { %v507_v53 = vpack.c.bf16 %v299_v52, %v349_v50 }
  0x9a   : > { %508 = vmatpush.bf16.msk.msra.mxu0 %vm506_vm13, %v507_v53 }
  0x9c   : > { %v347_v54 = vpop.permute.xlu0 %346  ;;  %v579_v55 = vpop.permute.xlu1 %578 }
  0x9d   : > { %v350_v57 = vsel %vm348_vm10, %v576_v40, %v347_v54  ;;  %v581_v62 = vunpack.i.h.bf16 %v579_v55  ;;  %v580_v63 = vunpack.i.l.bf16 %v579_v55 }
  0x9e   : > { %v520_v58 = vpack.c.bf16 %v300_v56, %v350_v57 }
  0x9f   : > { %v274_v7 = vsel %vm272_vm0, %v581_v62, %v271_v51  ;;  %v273_v9 = vsel %vm272_vm0, %v580_v63, %v581_v62 }
  0xa0   : > { %521 = vmatpush.bf16.msk.msra.mxu1 %vm519_vm14, %v520_v58 }
  0xa4   : > { %v584_v2 = vpop.permute.xlu0 %583  ;;  %v284_v3 = vpop.permute.xlu1 %283 }
  0xa5   : > { %v586_v4 = vunpack.i.h.bf16 %v584_v2  ;;  %v585_v5 = vunpack.i.l.bf16 %v584_v2 }
  0xa7   : > { %v287_v8 = vsel %vm285_vm2, %v586_v4, %v284_v3  ;;  %v286_v10 = vsel %vm285_vm2, %v585_v5, %v586_v4 }
  0xa8   : > { %v523_v11 = vpack.c.bf16 %v287_v8, %v274_v7  ;;  %v510_v12 = vpack.c.bf16 %v286_v10, %v273_v9 }
  0xaa   : > { %511 = vmatpush.bf16.msk.msra.mxu0 %vm509_vm3, %v510_v12  ;;  %524 = vmatpush.bf16.msk.msra.mxu1 %vm522_vm4, %v523_v11 }
  0xac   : > { %v336_v14 = vpop.permute.xlu0 %335  ;;  %v379_v18 = vpop.permute.xlu1 %378 }
  0xad   : > { %v339_v15 = vsel %vm337_vm15, %v591_v60, %v336_v14 }
  0xae   : > { %v526_v16 = vpack.c.bf16 %v339_v15, %v653_v1  ;;  %514 = vmatpush.bf16.msk.msra.mxu0 %vm679_vm8, %v513_v13  ;;  %v419_v1 = vld [vmem:[%s212_s10 + $0x8] sm:$0xff] }
  0xaf   : > { %423 = vst [vmem:[%s217_s14 + $0x8] sm:$0xff] %v419_v1 }
  0xb0   : > { %527 = vmatpush.bf16.msk.msra.mxu1 %vm697_vm11, %v526_v16 }
  0xb1   : > { %515 = vmatmul.msk.bf16.vlgmr.msra.gmra.mxu0 %vm381_vm1, %v374_v17 }
  0xb3   : > { %528 = vmatmul.msk.bf16.vlgmr.msra.gmra.mxu1 %vm381_vm1, %v374_v17 }
 0x12e   : > { %v401_v19 = vpop.f32.mrf.mxu0 }
 0x12f   : > { %v402_v20 = vadd.f32 %v401_v19, %v379_v18 }
 0x130   : > { %v414_v21 = vpop.f32.mrf.mxu1 }
 0x131   : > { %v420_v22 = vadd.f32 %v418_v0, %v402_v20  ;;  %v415_v23 = vadd.f32 %v414_v21, %v379_v18 }
 0x133   : > { %424 = vst [vmem:[%s217_s14 + $0x10] sm:$0xff] %v420_v22  ;;  %v421_v24 = vadd.f32 %v419_v1, %v415_v23 }
 0x135   : > { %425 = vst [vmem:[%s217_s14 + $0x18] sm:$0xff] %v421_v24 }
 0x136   : > { %v403_v25 = vpop.f32.mrf.mxu0 }
 0x138   : > { %v416_v26 = vpop.f32.mrf.mxu1 }
 0x139 PF: > { %s14_s15 = sadd.s32 1, %s600_s15  }
 0x13a   : > { %p11_p4 = scmp.ge.s32.totalorder %s14_s15, 4  }
 0x13c   :  { %13 = sbr.rel (!%p11_p4) target bundleno = 1 (0x1), region = 69 }

// kernel: _lambda_.10
= control target key start
LH: loop header
LB: loop body
LE: loop exit
PB: predicated region body
PF: predicated region fallthrough
CT: control target
= control target key end

     0   :  { %s570_s12 = smov 0   ;;  %s675_s0 = inlined_call_operand.vmem [shape: f32[2,8,290], index: 0, kind: input, shape index: {}]   ;;  %s676_s1 = inlined_call_operand.vmem [shape: bf16[8,72], index: 1, kind: input, shape index: {}]   ;;  %s677_s2 = inlined_call_operand.vmem [shape: f32[8,1], index: 2, kind: input, shape index: {}]   ;;  %s678_s3 = inlined_call_operand.vmem [shape: f32[2,8,256], index: 3, kind: output, shape index: {}]  }
   0x1 LB: > { %s434_s13 = sadd.s32 4294967295, %s538_s12   ;;  %p438_p0 = scmp.ge.s32.totalorder %s538_s12, 1  ;;  %s538_s12 = sphi %s570_s12, %s13_s12  }
   0x2   : > { %p137_p1 = scmp.lt.s32.totalorder %s538_s12, 3 }
   0x4   : > { %p138_p2 = pnand %p438_p0, %p137_p1 }
   0x5   : > { %p161_p3 = scmp.lt.s32.totalorder (!%p138_p2), %s434_s13, 1  ;;  %s540_s18 = smov (!%p138_p2), 96  }
   0x6   : > { %141 = sbr.rel (%p138_p2) target bundleno = 313 (0x139), region = 32  ;;  %s541_s19 = smov (!%p138_p2), 94  }
   0x7   : > { %s542_s20 = smov (!%p138_p2), 95   ;;  %s543_s21 = smov (!%p138_p2), 110  }
   0x8   : > { %s544_s22 = smov (!%p138_p2), 111   ;;  %s545_s23 = smov (!%p138_p2), 126  }
   0x9   : > { %s546_s24 = smov (!%p138_p2), 112   ;;  %s547_s25 = smov (!%p138_p2), 127  }
   0xb   : > { %s692_s13 = smov (!%p161_p3, %s434_s13), 1  ;;  %v172_v5 = vlaneseq  ;;  %vm277_vm0 = vcmask 769024   ;;  %vm312_vm2 = vcmask 777216   ;;  %vm264_vm3 = vcmask 785408   ;;  %v328_v43 = vld [vmem:[%s677_s2] sm:$0xff] }
   0xc   : > { %s471_s14 = smul.u32 24, %s692_s13  ;;  %vm338_vm4 = vcmask 1043456   ;;  %vm548_vm7 = vmmov 1   ;;  %vm301_vm10 = vcmask 908288   ;;  %vm251_vm12 = vcmask 900096   ;;  %s470_s30 = sshll.u32 %s692_s13, 4 }
   0xd   : > { %v173_v6 = vand.u32 127, %v172_v5  ;;  %v549_v47 = vmov 0   ;;  %vm290_vm15 = vcmask 1039360   ;;  %s170_s6 = scalar_lea.vmem %s678_s3, %s470_s30 }
   0xe   : > { %s165_s17 = scalar_lea.vmem %s675_s0, %s471_s14  ;;  %530 = vset.pattern.permute.xlu1 %v549_v47  ;;  %531 = vset.pattern.permute.xlu0 %v549_v47 }
   0xf   : > { %v584_v0 = vld [vmem:[%s165_s17] sm:$0xff]  ;;  %v586_v1 = vld [vmem:[%s165_s17 + $0x8] sm:$0xff]  ;;  %v211_v3 = vld [vmem:[%s165_s17 + $0x10] sm:$0xff]  ;;  %v179_v7 = vand.u32 15, %v173_v6  ;;  %v174_v8 = vadd.s32 128, %v173_v6 }
  0x10   : > { %v495_v2 = vpack.i.bf16 %v586_v1, %v584_v0 }
  0x11   : > { %vm590_vm1 = vcmp.ne.s32.totalorder %v179_v7, 15  ;;  %v186_v16 = vand.u32 15, %v174_v8  ;;  %vm597_vm5 = vcmp.ne.s32.totalorder %v179_v7, 0 }
  0x12   : > { %496 = vrot.lane.b32.xlu1 %v495_v2, %s540_s18  ;;  %491 = vrot.lane.b32.xlu0 %v495_v2, %s541_s19  ;;  %vm612_vm8 = vmpackc.low %vm548_vm7, %vm597_vm5 }
  0x13   : > { %501 = vrot.lane.b32.xlu2 %v495_v2, %s542_s20  ;;  %vm604_vm6 = vcmp.ne.s32.totalorder %v186_v16, 15  ;;  %vm621_vm9 = vcmp.ne.s32.totalorder %v186_v16, 0  ;;  %vm445_vm13 = vmpackc.low %vm590_vm1, %vm548_vm7 }
  0x14   : > { %vm630_vm11 = vmpackc.low %vm548_vm7, %vm621_vm9 }
  0x15   : > { %vm458_vm14 = vmpackc.low %vm604_vm6, %vm548_vm7 }
  0x1a   : > { %262 = vrot.lane.b32.xlu1 %v211_v3, %s540_s18  ;;  %275 = vrot.lane.b32.xlu0 %v211_v3, %s541_s19 }
  0x1b   : > { %310 = vrot.lane.b32.xlu2 %v211_v3, %s542_s20 }
  0x22   : > { %506 = vrot.lane.b32.xlu0 %v495_v2, %s543_s21  ;;  %249 = vrot.lane.b32.xlu1 %v211_v3, %s543_s21 }
  0x23   : > { %511 = vrot.lane.b32.xlu2 %v495_v2, %s544_s22 }
  0x2a   : > { %299 = vrot.lane.b32.xlu0 %v211_v3, %s544_s22  ;;  %516 = vrot.lane.b32.xlu1 %v495_v2, %s545_s23 }
  0x2b   : > { %223 = vrot.lane.b32.xlu2 %v211_v3, %s545_s23 }
  0x32   : > { %521 = vrot.lane.b32.xlu0 %v495_v2, %s546_s24  ;;  %236 = vrot.lane.b32.xlu1 %v211_v3, %s546_s24 }
  0x33   : > { %526 = vrot.lane.b32.xlu2 %v495_v2, %s547_s25 }
  0x3a   : > { %288 = vrot.lane.b32.xlu0 %v211_v3, %s547_s25  ;;  %331 = vperm.xlu1 %530, %v328_v43  }
  0x6d   : > { %v502_v4 = vpop.permute.xlu2 %501 }
  0x6e   : > { %v504_v15 = vunpack.i.h.bf16 %v502_v4  ;;  %v503_v17 = vunpack.i.l.bf16 %v502_v4 }
  0x70   : > { %v313_v26 = vsel %vm312_vm2, %v503_v17, %v504_v15  ;;  %v327_v17 = vld [vmem:[%s676_s1] sm:$0xf] }
  0x75   : > { %v311_v9 = vpop.permute.xlu2 %310 }
  0x76   : > { %v314_v36 = vsel %vm312_vm2, %v504_v15, %v311_v9  ;;  %vm238_vm2 = vcmask 916480  }
  0x7d   : > { %v512_v32 = vpop.permute.xlu2 %511 }
  0x7e   : > { %v514_v40 = vunpack.i.h.bf16 %v512_v32  ;;  %v513_v41 = vunpack.i.l.bf16 %v512_v32 }
  0x80   : > { %v302_v50 = vsel %vm301_vm10, %v513_v41, %v514_v40 }
  0x84   : > { %v497_v10 = vpop.permute.xlu1 %496  ;;  %v492_v11 = vpop.permute.xlu0 %491 }
  0x85   : > { %v494_v12 = vunpack.i.h.bf16 %v492_v11  ;;  %v493_v13 = vunpack.i.l.bf16 %v492_v11  ;;  %v499_v18 = vunpack.i.h.bf16 %v497_v10  ;;  %v498_v19 = vunpack.i.l.bf16 %v497_v10  ;;  %v224_v51 = vpop.permute.xlu2 %223 }
  0x87   : > { %v278_v20 = vsel %vm277_vm0, %v493_v13, %v494_v12  ;;  %v265_v25 = vsel %vm264_vm3, %v498_v19, %v499_v18 }
  0x88   : > { %v282_v21 = vsel %vm590_vm1, %v278_v20, 0.0  ;;  %v443_v33 = vpack.c.bf16 %v313_v26, %v265_v25 }
  0x89   : > { %v325_v22 = vpack.c.bf16 %v282_v21, %v282_v21 }
  0x8b   : > { %v340_v24 = vsel %vm338_vm4, %v325_v22, 0 }
  0x8c   : > { %v263_v28 = vpop.permute.xlu1 %262  ;;  %v276_v29 = vpop.permute.xlu0 %275  ;;  %348 = vmatpush.bf16.msra.mxu0 %v340_v24 }
  0x8d   : > { %v279_v30 = vsel %vm277_vm0, %v494_v12, %v276_v29  ;;  %v266_v38 = vsel %vm264_vm3, %v499_v18, %v263_v28  ;;  %v527_v59 = vpop.permute.xlu2 %526  ;;  %vm225_vm0 = vcmask 1031168   ;;  %vm448_vm3 = vmpackc.low %vm597_vm5, %vm590_vm1  ;;  %vm334_vm1 = vcmask 588800  }
  0x8e   : > { %v283_v34 = vsel %vm604_vm6, %v279_v30, 0.0  ;;  %v456_v44 = vpack.c.bf16 %v314_v36, %v266_v38  ;;  %v529_v60 = vunpack.i.h.bf16 %v527_v59  ;;  %v528_v61 = vunpack.i.l.bf16 %v527_v59 }
  0x8f   : > { %v326_v35 = vpack.c.bf16 %v283_v34, %v283_v34 }
  0x90   : > { %444 = vmatpush.bf16.msk.msra.mxu0 %vm612_vm8, %v443_v33  ;;  %v291_v6 = vsel %vm290_vm15, %v528_v61, %v529_v60 }
  0x91   : > { %v343_v39 = vsel %vm338_vm4, %v326_v35, 0  ;;  %vm461_vm4 = vmpackc.low %vm621_vm9, %vm604_vm6  ;;  %v452_v13 = vpack.c.bf16 %v291_v6, %v584_v0 }
  0x92   : > { %361 = vmatpush.bf16.msra.mxu1 %v343_v39 }
  0x94   : > { %v507_v45 = vpop.permute.xlu0 %506  ;;  %v250_v46 = vpop.permute.xlu1 %249 }
  0x95   : > { %v509_v48 = vunpack.i.h.bf16 %v507_v45  ;;  %v508_v49 = vunpack.i.l.bf16 %v507_v45 }
  0x96   : > { %457 = vmatpush.bf16.msk.msra.mxu1 %vm630_vm11, %v456_v44 }
  0x97   : > { %v252_v52 = vsel %vm251_vm12, %v508_v49, %v509_v48  ;;  %v253_v56 = vsel %vm251_vm12, %v509_v48, %v250_v46 }
  0x98   : > { %v446_v53 = vpack.c.bf16 %v252_v52, %v302_v50 }
  0x9a   : > { %447 = vmatpush.bf16.msk.msra.mxu0 %vm445_vm13, %v446_v53 }
  0x9c   : > { %v300_v54 = vpop.permute.xlu0 %299  ;;  %v517_v55 = vpop.permute.xlu1 %516 }
  0x9d   : > { %v303_v57 = vsel %vm301_vm10, %v514_v40, %v300_v54  ;;  %v519_v62 = vunpack.i.h.bf16 %v517_v55  ;;  %v518_v63 = vunpack.i.l.bf16 %v517_v55 }
  0x9e   : > { %v459_v58 = vpack.c.bf16 %v253_v56, %v303_v57 }
  0x9f   : > { %v227_v7 = vsel %vm225_vm0, %v519_v62, %v224_v51  ;;  %v226_v9 = vsel %vm225_vm0, %v518_v63, %v519_v62 }
  0xa0   : > { %460 = vmatpush.bf16.msk.msra.mxu1 %vm458_vm14, %v459_v58 }
  0xa4   : > { %v522_v2 = vpop.permute.xlu0 %521  ;;  %v237_v3 = vpop.permute.xlu1 %236 }
  0xa5   : > { %v524_v4 = vunpack.i.h.bf16 %v522_v2  ;;  %v523_v5 = vunpack.i.l.bf16 %v522_v2 }
  0xa7   : > { %v240_v8 = vsel %vm238_vm2, %v524_v4, %v237_v3  ;;  %v239_v10 = vsel %vm238_vm2, %v523_v5, %v524_v4 }
  0xa8   : > { %v462_v11 = vpack.c.bf16 %v240_v8, %v227_v7  ;;  %v449_v12 = vpack.c.bf16 %v239_v10, %v226_v9 }
  0xaa   : > { %450 = vmatpush.bf16.msk.msra.mxu0 %vm448_vm3, %v449_v12  ;;  %463 = vmatpush.bf16.msk.msra.mxu1 %vm461_vm4, %v462_v11 }
  0xac   : > { %v289_v14 = vpop.permute.xlu0 %288  ;;  %v332_v18 = vpop.permute.xlu1 %331 }
  0xad   : > { %v292_v15 = vsel %vm290_vm15, %v529_v60, %v289_v14 }
  0xae   : > { %v465_v16 = vpack.c.bf16 %v292_v15, %v586_v1  ;;  %453 = vmatpush.bf16.msk.msra.mxu0 %vm612_vm8, %v452_v13 }
  0xb0   : > { %466 = vmatpush.bf16.msk.msra.mxu1 %vm630_vm11, %v465_v16 }
  0xb1   : > { %454 = vmatmul.msk.bf16.vlgmr.msra.gmra.mxu0 %vm334_vm1, %v327_v17 }
  0xb3   : > { %467 = vmatmul.msk.bf16.vlgmr.msra.gmra.mxu1 %vm334_vm1, %v327_v17 }
 0x12e   : > { %v354_v0 = vpop.f32.mrf.mxu0 }
 0x12f   : > { %v355_v19 = vadd.f32 %v354_v0, %v332_v18 }
 0x130   : > { %v367_v20 = vpop.f32.mrf.mxu1 }
 0x131   : > { %vm371_vm5 = vcmp.ge.f32.partialorder %v355_v19, 0.0  ;;  %v373_v1 = vmul.f32 0.2, %v355_v19  ;;  %v368_v21 = vadd.f32 %v367_v20, %v332_v18 }
 0x133   : > { %v375_v22 = vsel %vm371_vm5, %v355_v19, %v373_v1  ;;  %vm372_vm6 = vcmp.ge.f32.partialorder %v368_v21, 0.0  ;;  %v374_v23 = vmul.f32 0.2, %v368_v21 }
 0x134   : > { %377 = vst [vmem:[%s170_s6] sm:$0xff] %v375_v22 }
 0x135   : > { %v376_v24 = vsel %vm372_vm6, %v368_v21, %v374_v23 }
 0x136   : > { %378 = vst [vmem:[%s170_s6 + $0x8] sm:$0xff] %v376_v24  ;;  %v356_v25 = vpop.f32.mrf.mxu0 }
 0x138   : > { %v369_v26 = vpop.f32.mrf.mxu1 }
 0x139 PF: > { %s13_s12 = sadd.s32 1, %s538_s12  }
 0x13a   : > { %p10_p4 = scmp.ge.s32.totalorder %s13_s12, 4  }
 0x13c   :  { %12 = sbr.rel (!%p10_p4) target bundleno = 1 (0x1), region = 62 }

// kernel: _lambda_.12
= control target key start
LH: loop header
LB: loop body
LE: loop exit
PB: predicated region body
PF: predicated region fallthrough
CT: control target
= control target key end

     0   :  { %s290_s9 = smov 0   ;;  %s310_s0 = inlined_call_operand.vmem [shape: f32[2,16,256], index: 0, kind: input, shape index: {}]   ;;  %s311_s1 = inlined_call_operand.vmem [shape: bf16[4,16], index: 1, kind: input, shape index: {}]   ;;  %s312_s2 = inlined_call_operand.vmem [shape: f32[2,4,256], index: 2, kind: output, shape index: {}]  }
   0x1 LB: > { %s244_s10 = sadd.s32 4294967295, %s273_s9   ;;  %p248_p0 = scmp.ge.s32.totalorder %s273_s9, 1  ;;  %s273_s9 = sphi %s290_s9, %s12_s9  }
   0x2   : > { %p112_p1 = scmp.lt.s32.totalorder %s273_s9, 3 }
   0x4   : > { %p113_p2 = pnand %p248_p0, %p112_p1 }
   0x5   : > { %p134_p3 = scmp.lt.s32.totalorder (!%p113_p2), %s244_s10, 1 }
   0x6   : > { %116 = sbr.rel (%p113_p2) target bundleno = 155 (0x9b), region = 28 }
   0xb   : > { %s314_s10 = smov (!%p134_p3, %s244_s10), 1  ;;  %v151_v6 = vld [vmem:[%s311_s1] sm:$0x3]  ;;  %vm152_vm0 = vcmask 130048   ;;  %vm185_vm1 = vcmask 1043456  }
   0xc   : > { %s257_s11 = sshll.u32 %s314_s10, 5  ;;  %s258_s17 = sshll.u32 %s314_s10, 3 }
   0xd   : > { %s138_s14 = scalar_lea.vmem %s310_s0, %s257_s11  ;;  %s143_s20 = scalar_lea.vmem %s312_s2, %s258_s17 }
   0xe   : > { %v145_v0 = vld [vmem:[%s138_s14] sm:$0xff]  ;;  %v147_v1 = vld [vmem:[%s138_s14 + $0x10] sm:$0xff]  ;;  %v146_v2 = vld [vmem:[%s138_s14 + $0x8] sm:$0xff] }
   0xf   : > { %v149_v3 = vpack.c.bf16 %v147_v1, %v145_v0  ;;  %v148_v4 = vld [vmem:[%s138_s14 + $0x18] sm:$0xff] }
  0x10   : > { %v150_v5 = vpack.c.bf16 %v148_v4, %v146_v2 }
  0x11   : > { %163 = vmatpush.bf16.msra.mxu0 %v149_v3 }
  0x12   : > { %176 = vmatpush.bf16.msra.mxu1 %v150_v5 }
  0x14   : > { %253 = vmatmul.msk.bf16.vlgmr.msra.gmra.mxu0 %vm152_vm0, %v151_v6 }
  0x15   : > { %254 = vmatmul.msk.bf16.vlgmr.msra.gmra.mxu1 %vm152_vm0, %v151_v6 }
  0x91   : > { %v165_v7 = vpop.f32.mrf.mxu0 }
  0x92   : > { %v178_v8 = vpop.f32.mrf.mxu1 }
  0x93   : > { %v184_v9 = vrot.slane %v178_v8, 4 }
  0x95   : > { %v186_v10 = vsel %vm185_vm1, %v165_v7, %v184_v9 }
  0x96   : > { %188 = vst [vmem:[%s143_s20] sm:$0xff] %v186_v10 }
  0x99   : > { %v167_v11 = vpop.f32.mrf.mxu0 }
  0x9a   : > { %v180_v12 = vpop.f32.mrf.mxu1 }
  0x9b PF: > { %s12_s9 = sadd.s32 1, %s273_s9  }
  0x9c   : > { %p9_p4 = scmp.ge.s32.totalorder %s12_s9, 4  }
  0x9e   :  { %11 = sbr.rel (!%p9_p4) target bundleno = 1 (0x1), region = 58 }

// kernel: _lambda_.15
= control target key start
LH: loop header
LB: loop body
LE: loop exit
PB: predicated region body
PF: predicated region fallthrough
CT: control target
= control target key end

     0   :  { %s529_s18 = smov 0   ;;  %s607_s0 = inlined_call_operand.vmem [shape: f32[2,16,64], index: 0, kind: input, shape index: {}]   ;;  %s608_s1 = inlined_call_operand.vmem [shape: bf16[4,16], index: 1, kind: input, shape index: {}]   ;;  %s609_s2 = inlined_call_operand.vmem [shape: f32[64,256], index: 2, kind: input, shape index: {}]   ;;  %s610_s3 = inlined_call_operand.vmem [shape: f32[2,4,256], index: 3, kind: input, shape index: {}]   ;;  %s611_s4 = inlined_call_operand.vmem [shape: f32[2,4,256], index: 4, kind: input, shape index: {}]   ;;  %s612_s5 = inlined_call_operand.vmem [shape: f32[2,4,256], index: 5, kind: output, shape index: {}]  }
   0x1 LB: > { %s456_s19 = sadd.s32 4294967295, %s497_s18   ;;  %p460_p0 = scmp.ge.s32.totalorder %s497_s18, 1  ;;  %s497_s18 = sphi %s529_s18, %s15_s18  }
   0x2   : > { %p207_p1 = scmp.lt.s32.totalorder %s497_s18, 3 }
   0x4   : > { %p208_p2 = pnand %p460_p0, %p207_p1 }
   0x5   : > { %p245_p3 = scmp.lt.s32.totalorder (!%p208_p2), %s456_s19, 1 }
   0x6   : > { %211 = sbr.rel (%p208_p2) target bundleno = 314 (0x13a), region = 40 }
   0xb   : > { %s614_s19 = smov (!%p245_p3, %s456_s19), 1  ;;  %v266_v3 = vld [vmem:[%s608_s1] sm:$0x3]  ;;  %vm270_vm0 = vcmask 130048   ;;  %v320_v4 = vld [vmem:[%s609_s2 + $0x70] sm:$0xff]  ;;  %v321_v5 = vld [vmem:[%s609_s2 + $0x78] sm:$0xff] }
   0xc   : > { %s475_s20 = sshll.u32 %s614_s19, 4  ;;  %v318_v6 = vld [vmem:[%s609_s2 + $0x60] sm:$0xff]  ;;  %334 = vmatpush.msra.mxu1 %v320_v4  ;;  %354 = vmatpush.msra.mxu2 %v321_v5  ;;  %v319_v7 = vld [vmem:[%s609_s2 + $0x68] sm:$0xff]  ;;  %v316_v8 = vld [vmem:[%s609_s2 + $0x50] sm:$0xff]  ;;  %vm322_vm4 = vcmask 523264   ;;  %s476_s10 = sshll.u32 %s614_s19, 3 }
   0xd   : > { %s249_s23 = scalar_lea.vmem %s607_s0, %s475_s20  ;;  %v317_v9 = vld [vmem:[%s609_s2 + $0x58] sm:$0xff]  ;;  %v314_v10 = vld [vmem:[%s609_s2 + $0x40] sm:$0xff]  ;;  %v315_v11 = vld [vmem:[%s609_s2 + $0x48] sm:$0xff]  ;;  %s254_s13 = scalar_lea.vmem %s610_s3, %s476_s10  ;;  %vm370_vm6 = vcmask 1043456  }
   0xe   : > { %v267_v0 = vld [vmem:[%s249_s23] sm:$0xff]  ;;  %v268_v1 = vld [vmem:[%s249_s23 + $0x8] sm:$0xff]  ;;  %335 = vmatpush.msra.mxu1 %v318_v6  ;;  %355 = vmatpush.msra.mxu2 %v319_v7  ;;  %v312_v12 = vld [vmem:[%s609_s2 + $0x30] sm:$0xff]  ;;  %s259_s16 = scalar_lea.vmem %s611_s4, %s476_s10  ;;  %s264_s19 = scalar_lea.vmem %s612_s5, %s476_s10 }
   0xf   : > { %v269_v2 = vpack.c.bf16 %v268_v1, %v267_v0  ;;  %v313_v13 = vld [vmem:[%s609_s2 + $0x38] sm:$0xff]  ;;  %v310_v14 = vld [vmem:[%s609_s2 + $0x20] sm:$0xff]  ;;  %v311_v15 = vld [vmem:[%s609_s2 + $0x28] sm:$0xff] }
  0x10   : > { %336 = vmatpush.msra.mxu1 %v316_v8  ;;  %356 = vmatpush.msra.mxu2 %v317_v9  ;;  %v308_v16 = vld [vmem:[%s609_s2 + $0x10] sm:$0xff]  ;;  %v309_v17 = vld [vmem:[%s609_s2 + $0x18] sm:$0xff]  ;;  %v306_v18 = vld [vmem:[%s609_s2] sm:$0xff] }
  0x11   : > { %281 = vmatpush.bf16.msra.mxu0 %v269_v2  ;;  %v307_v19 = vld [vmem:[%s609_s2 + $0x8] sm:$0xff]  ;;  %v366_v36 = vld [vmem:[%s254_s13] sm:$0xff] }
  0x12   : > { %337 = vmatpush.msra.mxu1 %v314_v10  ;;  %357 = vmatpush.msra.mxu2 %v315_v11  ;;  %v374_v40 = vld [vmem:[%s259_s16] sm:$0xff] }
  0x14   : > { %469 = vmatmul.msk.bf16.vlgmr.msra.gmra.mxu0 %vm270_vm0, %v266_v3  ;;  %338 = vmatpush.msra.mxu1 %v312_v12 }
  0x15   : > { %358 = vmatpush.msra.mxu2 %v313_v13 }
  0x16   : > { %339 = vmatpush.msra.mxu1 %v310_v14 }
  0x17   : > { %359 = vmatpush.msra.mxu2 %v311_v15 }
  0x18   : > { %340 = vmatpush.msra.mxu1 %v308_v16 }
  0x19   : > { %360 = vmatpush.msra.mxu2 %v309_v17 }
  0x1a   : > { %341 = vmatpush.msra.mxu1 %v306_v18 }
  0x1b   : > { %361 = vmatpush.msra.mxu2 %v307_v19 }
  0x91   : > { %v283_v20 = vpop.f32.mrf.mxu0 }
  0x92   : > { %v470_v21 = vmul.f32 -1.442695, %v283_v20 }
  0x94   : > { %487 = vpow2.f32 %v470_v21 }
  0x99   : > { %v285_v22 = vpop.f32.mrf.mxu0 }
  0x9a   : > { %v488_v23 = vpop.eup %487 }
  0x9b   : > { %v290_v24 = vadd.f32 1.0, %v488_v23 }
  0x9d   : > { %489 = vrcp.f32 %v290_v24  ;;  %v302_v28 = vand.u32 2147483648, %v290_v24  ;;  %v300_v30 = vand.u32 2147483647, %v290_v24  ;;  %vm296_vm2 = vweird.f32 %v290_v24 }
  0x9f   : > { %v303_v32 = vor.u32 1.1754944e-38, %v302_v28  ;;  %vm301_vm5 = vcmp.eq.f32.partialorder %v300_v30, 8.507059e+37 }
  0xa3   : > { %v490_v25 = vpop.eup %489 }
  0xa4   : > { %v292_v26 = vmul.f32 %v490_v25, %v290_v24  ;;  %vm297_vm1 = vweird.f32 %v490_v25 }
  0xa5   : > { %vm298_vm3 = vmor %vm296_vm2, %vm297_vm1 }
  0xa6   : > { %v293_v27 = vsub.f32 1.0, %v292_v26 }
  0xa8   : > { %v294_v29 = vmul.f32 %v490_v25, %v293_v27 }
  0xaa   : > { %v295_v31 = vadd.f32 %v490_v25, %v294_v29 }
  0xac   : > { %v299_v33 = vsel %vm298_vm3, %v490_v25, %v295_v31 }
  0xad   : > { %v304_v34 = vsel %vm301_vm5, %v303_v32, %v299_v33 }
  0xae   : > { %471 = vmatmul.msk.f32.vlgmr.msra.gmra.mxu1 %vm322_vm4, %v304_v34  ;;  %472 = vmatmul.msk.f32.vlgmr.msra.gmra.mxu2 %vm322_vm4, %v304_v34 }
 0x12b   : > { %v343_v38 = vpop.f32.mrf.mxu1 }
 0x131   : > { %v363_v35 = vpop.f32.mrf.mxu2 }
 0x132   : > { %v369_v37 = vrot.slane %v363_v35, 4 }
 0x134   : > { %v371_v39 = vsel %vm370_vm6, %v343_v38, %v369_v37 }
 0x135   : > { %v373_v41 = vmul.f32 %v371_v39, %v366_v36 }
 0x137   : > { %v375_v42 = vadd.f32 %v374_v40, %v373_v41 }
 0x139   : > { %376 = vst [vmem:[%s264_s19] sm:$0xff] %v375_v42 }
 0x13a PF: > { %s15_s18 = sadd.s32 1, %s497_s18  }
 0x13b   : > { %p12_p4 = scmp.ge.s32.totalorder %s15_s18, 4  }
 0x13d   :  { %14 = sbr.rel (!%p12_p4) target bundleno = 1 (0x1), region = 76 }

// kernel: _lambda_.13
= control target key start
LH: loop header
LB: loop body
LE: loop exit
PB: predicated region body
PF: predicated region fallthrough
CT: control target
= control target key end

     0   :  { %s611_s15 = smov 0   ;;  %s731_s0 = inlined_call_operand.vmem [shape: f32[2,16,82], index: 0, kind: input, shape index: {}]   ;;  %s732_s1 = inlined_call_operand.vmem [shape: f32[16,9], index: 1, kind: input, shape index: {}]   ;;  %s733_s2 = inlined_call_operand.vmem [shape: f32[16,1], index: 2, kind: input, shape index: {}]   ;;  %s734_s3 = inlined_call_operand.vmem [shape: bf16[16,16], index: 3, kind: input, shape index: {}]   ;;  %s735_s4 = inlined_call_operand.vmem [shape: f32[2,16,64], index: 4, kind: output, shape index: {}]  }
   0x1 LB: > { %s499_s16 = sadd.s32 4294967295, %s567_s15   ;;  %p503_p0 = scmp.ge.s32.totalorder %s567_s15, 1  ;;  %s567_s15 = sphi %s611_s15, %s14_s15  }
   0x2   : > { %p162_p1 = scmp.lt.s32.totalorder %s567_s15, 3 }
   0x4   : > { %p163_p2 = pnand %p503_p0, %p162_p1 }
   0x5   : > { %p188_p3 = scmp.lt.s32.totalorder (!%p163_p2), %s499_s16, 1  ;;  %s573_s25 = smov (!%p163_p2), 126  }
   0x6   : > { %166 = sbr.rel (%p163_p2) target bundleno = 418 (0x1a2), region = 36  ;;  %s575_s26 = smov (!%p163_p2), 120  }
   0x7   : > { %s578_s27 = smov (!%p163_p2), 118   ;;  %s580_s28 = smov (!%p163_p2), 112  }
   0x8   : > { %s582_s29 = smov (!%p163_p2), 110   ;;  %s583_s30 = smov (!%p163_p2), 119  }
   0x9   : > { %s584_s5 = smov (!%p163_p2), 127   ;;  %s585_s6 = smov (!%p163_p2), 111  }
   0xb   : > { %v622_v0 = vld [vmem:[%s732_s1] sm:$0xff]  ;;  %v569_v1 = vmov 4   ;;  %v570_v2 = vmov 1   ;;  %v571_v3 = vmov 7   ;;  %v630_v4 = vld [vmem:[%s732_s1 + $0x8] sm:$0xff]  ;;  %s741_s16 = smov (!%p188_p3, %s499_s16), 1  ;;  %v201_v42 = vlaneseq }
   0xc   : > { %544 = vset.pattern.permute.xlu1 %v569_v1  ;;  %543 = vset.pattern.permute.xlu0 %v570_v2  ;;  %s515_s21 = sshll.u32 %s741_s16, 4  ;;  %v572_v6 = vmov 0   ;;  %v574_v7 = vmov 2   ;;  %v576_v9 = vmov 3   ;;  %v577_v10 = vmov 5   ;;  %v400_v22 = vld [vmem:[%s733_s2 + $0x8] sm:$0xff] }
   0xd   : > { %324 = vperm.xlu1 %544, %v622_v0   ;;  %280 = vperm.xlu0 %543, %v622_v0   ;;  %s192_s24 = scalar_lea.vmem %s731_s0, %s515_s21  ;;  %v579_v11 = vmov 6   ;;  %v581_v12 = vmov 8   ;;  %v399_v26 = vld [vmem:[%s733_s2] sm:$0xff]  ;;  %v202_v45 = vand.u32 127, %v201_v42  ;;  %vm421_vm2 = vcmask 130048   ;;  %s197_s17 = scalar_lea.vmem %s735_s4, %s515_s21 }
   0xe   : > { %545 = vset.pattern.permute.xlu2 %v571_v3  ;;  %v643_v5 = vld [vmem:[%s192_s24] sm:$0xff]  ;;  %v650_v8 = vld [vmem:[%s192_s24 + $0x8] sm:$0xff]  ;;  %vm441_vm3 = vcmask 523264  }
   0xf   : > { %368 = vperm.xlu2 %545, %v622_v0   ;;  %v207_v47 = vand.u32 7, %v202_v45 }
  0x11   : > { %vm686_vm0 = vcmp.ne.s32.totalorder %v207_v47, 0  ;;  %vm693_vm1 = vcmp.ne.s32.totalorder %v207_v47, 7 }
  0x12   : > { %v221_v49 = vsel %vm686_vm0, %v643_v5, 0.0  ;;  %v222_v55 = vsel %vm686_vm0, %v650_v8, 0.0 }
  0x15   : > { %284 = vperm.xlu0 %543, %v630_v4   ;;  %328 = vperm.xlu1 %544, %v630_v4  }
  0x17   : > { %372 = vperm.xlu2 %545, %v630_v4  }
  0x1d   : > { %547 = vset.pattern.permute.xlu1 %v572_v6  ;;  %546 = vset.pattern.permute.xlu0 %v572_v6 }
  0x1e   : > { %274 = vperm.xlu1 %547, %v630_v4   ;;  %269 = vperm.xlu0 %546, %v622_v0  }
  0x1f   : > { %227 = vrot.lane.b32.xlu2 %v643_v5, %s573_s25 }
  0x20   : > { %549 = vset.pattern.permute.xlu2 %v574_v7 }
  0x26   : > { %229 = vrot.lane.b32.xlu1 %v650_v8, %s573_s25  ;;  %235 = vrot.lane.b32.xlu0 %v643_v5, %s575_s26 }
  0x27   : > { %548 = vset.pattern.permute.xlu1 %v574_v7  ;;  %304 = vperm.xlu2 %549, %v630_v4  }
  0x28   : > { %551 = vset.pattern.permute.xlu0 %v576_v9 }
  0x2e   : > { %300 = vperm.xlu1 %548, %v622_v0   ;;  %316 = vperm.xlu0 %551, %v630_v4  }
  0x2f   : > { %550 = vset.pattern.permute.xlu2 %v576_v9 }
  0x30   : > { %312 = vperm.xlu2 %550, %v622_v0  }
  0x36   : > { %237 = vrot.lane.b32.xlu1 %v650_v8, %s575_s26  ;;  %552 = vset.pattern.permute.xlu0 %v577_v10 }
  0x37   : > { %553 = vset.pattern.permute.xlu1 %v577_v10  ;;  %344 = vperm.xlu0 %552, %v622_v0  }
  0x38   : > { %245 = vrot.lane.b32.xlu2 %v650_v8, %s578_s27 }
  0x39   : > { %554 = vset.pattern.permute.xlu2 %v579_v11 }
  0x3e   : > { %243 = vrot.lane.b32.xlu1 %v643_v5, %s578_s27 }
  0x3f   : > { %555 = vset.pattern.permute.xlu0 %v579_v11 }
  0x40   : > { %251 = vrot.lane.b32.xlu2 %v643_v5, %s580_s28 }
  0x46   : > { %348 = vperm.xlu1 %553, %v630_v4  }
  0x48   : > { %356 = vperm.xlu2 %554, %v622_v0  }
  0x4e   : > { %253 = vrot.lane.b32.xlu1 %v650_v8, %s580_s28 }
  0x4f   : > { %557 = vset.pattern.permute.xlu1 %v581_v12 }
  0x50   : > { %558 = vset.pattern.permute.xlu2 %v572_v6 }
  0x56   : > { %259 = vrot.lane.b32.xlu1 %v643_v5, %s582_s29 }
  0x5e   : > { %392 = vperm.xlu1 %557, %v630_v4  }
  0x66   : > { %559 = vset.pattern.permute.xlu1 %v572_v6 }
  0x69   : > { %v369_v17 = vpop.permute.xlu2 %368 }
  0x6a   : > { %v375_v18 = vmul.f32 %v369_v17, %v643_v5 }
  0x71   : > { %v373_v24 = vpop.permute.xlu2 %372 }
  0x72   : > { %v376_v25 = vmul.f32 %v373_v24, %v650_v8 }
  0x79   : > { %v228_v28 = vpop.permute.xlu2 %227 }
  0x7a   : > { %v233_v56 = vsel %vm693_vm1, %v228_v28, 0.0 }
  0x7f   : > { %v325_v13 = vpop.permute.xlu1 %324  ;;  %v281_v14 = vpop.permute.xlu0 %280 }
  0x80   : > { %v331_v15 = vmul.f32 %v325_v13, %v643_v5  ;;  %v287_v16 = vmul.f32 %v281_v14, %v643_v5 }
  0x81   : > { %v305_v30 = vpop.permute.xlu2 %304 }
  0x82   : > { %335 = vrot.lane.b32.xlu1 %v331_v15, %s583_s30  ;;  %291 = vrot.lane.b32.xlu2 %v287_v16, %s584_s5 }
  0x87   : > { %v285_v19 = vpop.permute.xlu0 %284  ;;  %v329_v21 = vpop.permute.xlu1 %328 }
  0x88   : > { %v288_v20 = vmul.f32 %v285_v19, %v650_v8  ;;  %v332_v23 = vmul.f32 %v329_v21, %v650_v8 }
  0x8a   : > { %293 = vrot.lane.b32.xlu0 %v288_v20, %s584_s5  ;;  %379 = vrot.lane.b32.xlu1 %v375_v18, %s585_s6  ;;  %v313_v32 = vpop.permute.xlu2 %312 }
  0x8b   : > { %261 = vrot.lane.b32.xlu2 %v650_v8, %s582_s29 }
  0x90   : > { %v275_v27 = vpop.permute.xlu1 %274  ;;  %v270_v38 = vpop.permute.xlu0 %269 }
  0x91   : > { %v277_v54 = vmul.f32 %v270_v38, %v221_v49  ;;  %v278_v59 = vmul.f32 %v275_v27, %v222_v55 }
  0x92   : > { %360 = vperm.xlu0 %555, %v630_v4   ;;  %408 = vperm.xlu1 %559, %v400_v22   ;;  %v246_v34 = vpop.permute.xlu2 %245 }
  0x93   : > { %337 = vrot.lane.b32.xlu2 %v332_v23, %s583_s30  ;;  %v250_v7 = vsel %vm693_vm1, %v246_v34, 0.0 }
  0x98   : > { %v230_v29 = vpop.permute.xlu1 %229  ;;  %v236_v41 = vpop.permute.xlu0 %235 }
  0x99   : > { %v234_v57 = vsel %vm693_vm1, %v230_v29, 0.0 }
  0x9a   : > { %556 = vset.pattern.permute.xlu0 %v581_v12  ;;  %v252_v36 = vpop.permute.xlu2 %251  ;;  %v308_v63 = vmul.f32 %v305_v30, %v234_v57 }
  0x9b   : > { %381 = vrot.lane.b32.xlu2 %v376_v25, %s585_s6  ;;  %388 = vperm.xlu0 %556, %v622_v0   ;;  %v241_v0 = vsel %vm686_vm0, %v236_v41, 0.0  ;;  %v257_v20 = vsel %vm686_vm0, %v252_v36, 0.0 }
  0x9c   : > { %v319_v8 = vmul.f32 %v313_v32, %v241_v0 }
  0xa0   : > { %v301_v31 = vpop.permute.xlu1 %300  ;;  %v317_v46 = vpop.permute.xlu0 %316 }
  0xa1   : > { %v307_v60 = vmul.f32 %v301_v31, %v233_v56 }
  0xa2   : > { %v357_v39 = vpop.permute.xlu2 %356 }
  0xa3   : > { %403 = vperm.xlu2 %558, %v399_v26   ;;  %560 = vset.pattern.permute.xlu0 %v572_v6  ;;  %v363_v26 = vmul.f32 %v357_v39, %v257_v20  ;;  %v517_v39 = vld [vmem:[%s734_s3] sm:$0xff] }
  0xa8   : > { %v238_v33 = vpop.permute.xlu1 %237 }
  0xa9   : > { %v345_v52 = vpop.permute.xlu0 %344  ;;  %v242_v61 = vsel %vm686_vm0, %v238_v33, 0.0 }
  0xaa   : > { %v320_v5 = vmul.f32 %v317_v46, %v242_v61 }
  0xb0   : > { %v244_v35 = vpop.permute.xlu1 %243 }
  0xb1   : > { %v249_v11 = vsel %vm693_vm1, %v244_v35, 0.0 }
  0xb2   : > { %v351_v19 = vmul.f32 %v345_v52, %v249_v11 }
  0xb8   : > { %v349_v37 = vpop.permute.xlu1 %348 }
  0xb9   : > { %v352_v12 = vmul.f32 %v349_v37, %v250_v7 }
  0xc0   : > { %v254_v40 = vpop.permute.xlu1 %253 }
  0xc1   : > { %v258_v14 = vsel %vm686_vm0, %v254_v40, 0.0 }
  0xc8   : > { %v260_v44 = vpop.permute.xlu1 %259 }
  0xc9   : > { %v265_v30 = vsel %vm693_vm1, %v260_v44, 0.0 }
  0xd0   : > { %v393_v51 = vpop.permute.xlu1 %392 }
  0xdc   : > { %v292_v43 = vpop.permute.xlu2 %291 }
  0xdd   : > { %v297_v58 = vadd.f32 %v292_v43, %v277_v54 }
  0xdf   : > { %v309_v4 = vadd.f32 %v307_v60, %v297_v58 }
  0xe1   : > { %v321_v10 = vadd.f32 %v319_v8, %v309_v4 }
  0xe5   : > { %v262_v50 = vpop.permute.xlu2 %261 }
  0xe6   : > { %v266_v25 = vsel %vm693_vm1, %v262_v50, 0.0 }
  0xe7   : > { %v396_v28 = vmul.f32 %v393_v51, %v266_v25 }
  0xed   : > { %v338_v1 = vpop.permute.xlu2 %337 }
  0xf4   : > { %v336_v2 = vpop.permute.xlu1 %335 }
  0xf5   : > { %v341_v15 = vadd.f32 %v336_v2, %v321_v10  ;;  %v382_v21 = vpop.permute.xlu2 %381 }
  0xf7   : > { %v353_v24 = vadd.f32 %v351_v19, %v341_v15 }
  0xf9   : > { %v365_v29 = vadd.f32 %v363_v26, %v353_v24 }
  0xfc   : > { %v294_v62 = vpop.permute.xlu0 %293  ;;  %v380_v22 = vpop.permute.xlu1 %379 }
  0xfd   : > { %v298_v3 = vadd.f32 %v294_v62, %v278_v59  ;;  %v385_v32 = vadd.f32 %v380_v22, %v365_v29  ;;  %v404_v36 = vpop.permute.xlu2 %403 }
  0xff   : > { %v310_v6 = vadd.f32 %v308_v63, %v298_v3 }
 0x101   : > { %v322_v9 = vadd.f32 %v320_v5, %v310_v6 }
 0x103   : > { %v342_v13 = vadd.f32 %v338_v1, %v322_v9 }
 0x104   : > { %v361_v16 = vpop.permute.xlu0 %360  ;;  %v409_v35 = vpop.permute.xlu1 %408 }
 0x105   : > { %v354_v17 = vadd.f32 %v352_v12, %v342_v13  ;;  %v364_v18 = vmul.f32 %v361_v16, %v258_v14 }
 0x107   : > { %v366_v23 = vadd.f32 %v364_v18, %v354_v17 }
 0x109   : > { %v386_v27 = vadd.f32 %v382_v21, %v366_v23 }
 0x10b   : > { %v398_v33 = vadd.f32 %v396_v28, %v386_v27 }
 0x10d   : > { %v389_v31 = vpop.permute.xlu0 %388  ;;  %v412_v38 = vadd.f32 %v409_v35, %v398_v33 }
 0x10e   : > { %v395_v34 = vmul.f32 %v389_v31, %v265_v30 }
 0x110   : > { %v397_v37 = vadd.f32 %v395_v34, %v385_v32 }
 0x112   : > { %v411_v40 = vadd.f32 %v404_v36, %v397_v37 }
 0x114   : > { %v415_v41 = vpack.c.bf16 %v412_v38, %v411_v40 }
 0x116   : > { %432 = vmatpush.bf16.msra.mxu0 %v415_v41 }
 0x119   : > { %512 = vmatmul.msk.bf16.vlgmr.msra.gmra.mxu0 %vm421_vm2, %v517_v39 }
 0x196   : > { %v434_v42 = vpop.f32.mrf.mxu0 }
 0x197   : > { %v439_v43 = vmax.f32 %v434_v42, 0.0 }
 0x199   : > { %442 = vst.msk [vmem:[%s197_s17] sm:$0xff] %vm441_vm3, %v439_v43 }
 0x19e   : > { %v436_v44 = vpop.f32.mrf.mxu0 }
 0x19f   : > { %v440_v45 = vmax.f32 %v436_v44, 0.0 }
 0x1a1   : > { %443 = vst.msk [vmem:[%s197_s17 + $0x8] sm:$0xff] %vm441_vm3, %v440_v45 }
 0x1a2 PF: > { %s14_s15 = sadd.s32 1, %s567_s15  }
 0x1a3   : > { %p11_p4 = scmp.ge.s32.totalorder %s14_s15, 4  }
 0x1a5   :  { %13 = sbr.rel (!%p11_p4) target bundleno = 1 (0x1), region = 66 }

</bundles_post_ra>
